<compile_context>
chip_gen: v7x
topology: tpu7x:2x2x1
jax: 0.10.0
libtpu: 0.0.40
codegen_flags: <defaults>
</compile_context>

<pallas_src>
import functools
import math

import jax
import jax.numpy as jnp
from jax.experimental import pallas as pl
from jax.experimental.pallas import tpu as pltpu

# ----------------------------- config ---------------------------------------
D_MODEL = 32
N_HEADS = 4
D_FC = 64
N_LEVELS = 2
N_POINTS = 2          # enc_n_points == dec_n_points
NUM_ENC_LAYERS = 2
NUM_DEC_LAYERS = 2
N_QUERIES = 8
LN_EPS = 1e-5


def _round_up(x, m):
    return ((x + m - 1) // m) * m


_PARALLEL1 = pltpu.CompilerParams(dimension_semantics=("parallel",))


# ----------------------------- Pallas kernels --------------------------------
def _linear_kernel(x_ref, w_ref, b_ref, o_ref, *, act):
    acc = jnp.dot(x_ref[...], w_ref[...], preferred_element_type=jnp.float32)
    acc = acc + b_ref[...].astype(jnp.float32)
    if act == "relu":
        acc = jnp.maximum(acc, 0.0)
    o_ref[...] = acc.astype(o_ref.dtype)


def pallas_linear(x, w, b, act=None):
    """y = x @ w + b (optionally fused ReLU). x: (..., K), w: (K, N), b: (N,)."""
    orig_shape = x.shape
    K = orig_shape[-1]
    N = w.shape[1]
    x2 = x.reshape(-1, K)
    M = x2.shape[0]
    # single tile for moderate M (avoids padding 160->256 etc.); 128-row tiles for large M
    tm = _round_up(M, 8) if M <= 512 else 128
    Mp = _round_up(M, tm)
    if Mp != M:
        x2 = jnp.pad(x2, ((0, Mp - M), (0, 0)))
    out = pl.pallas_call(
        functools.partial(_linear_kernel, act=act),
        out_shape=jax.ShapeDtypeStruct((Mp, N), jnp.float32),
        grid=(Mp // tm,),
        in_specs=[
            pl.BlockSpec((tm, K), lambda i: (i, 0)),
            pl.BlockSpec((K, N), lambda i: (0, 0)),
            pl.BlockSpec((1, N), lambda i: (0, 0)),
        ],
        out_specs=pl.BlockSpec((tm, N), lambda i: (i, 0)),
        compiler_params=_PARALLEL1,
    )(x2, w, b.reshape(1, N))
    return out[:M].reshape(*orig_shape[:-1], N)


def _layernorm_rows(y, g, b, eps):
    mu = jnp.mean(y, axis=-1, keepdims=True)
    yc = y - mu
    var = jnp.mean(yc * yc, axis=-1, keepdims=True)
    return yc * jax.lax.rsqrt(var + eps) * g + b


def _ffn_ln_kernel(x_ref, w1_ref, b1_ref, w2_ref, b2_ref, g_ref, bt_ref, o_ref, *, eps):
    """LayerNorm(x + lin2(relu(lin1(x)))) — FFN hidden never leaves VMEM."""
    x = x_ref[...].astype(jnp.float32)
    h = jnp.dot(x, w1_ref[...], preferred_element_type=jnp.float32) + b1_ref[...]
    h = jnp.maximum(h, 0.0)
    y = x + jnp.dot(h, w2_ref[...], preferred_element_type=jnp.float32) + b2_ref[...]
    o_ref[...] = _layernorm_rows(y, g_ref[...], bt_ref[...], eps).astype(o_ref.dtype)


def pallas_ffn_ln(x, w1, b1, w2, b2, gamma, beta):
    orig_shape = x.shape
    D = orig_shape[-1]
    DF = w1.shape[1]
    x2 = x.reshape(-1, D)
    M = x2.shape[0]
    tm = _round_up(M, 8) if M <= 512 else 128
    Mp = _round_up(M, tm)
    if Mp != M:
        x2 = jnp.pad(x2, ((0, Mp - M), (0, 0)))
    out = pl.pallas_call(
        functools.partial(_ffn_ln_kernel, eps=LN_EPS),
        out_shape=jax.ShapeDtypeStruct((Mp, D), jnp.float32),
        grid=(Mp // tm,),
        in_specs=[
            pl.BlockSpec((tm, D), lambda i: (i, 0)),
            pl.BlockSpec((D, DF), lambda i: (0, 0)),
            pl.BlockSpec((1, DF), lambda i: (0, 0)),
            pl.BlockSpec((DF, D), lambda i: (0, 0)),
            pl.BlockSpec((1, D), lambda i: (0, 0)),
            pl.BlockSpec((1, D), lambda i: (0, 0)),
            pl.BlockSpec((1, D), lambda i: (0, 0)),
        ],
        out_specs=pl.BlockSpec((tm, D), lambda i: (i, 0)),
        compiler_params=_PARALLEL1,
    )(x2, w1, b1.reshape(1, DF), w2, b2.reshape(1, D),
      gamma.reshape(1, D), beta.reshape(1, D))
    return out[:M].reshape(orig_shape)


def _deform_combine_kernel(a_ref, v_ref, wo_ref, bo_ref, res_ref, g_ref, bt_ref,
                           o_ref, *, n_heads, head_dim, eps):
    """out = LN(res + bias + sum_h A[h] @ (V[h] @ Wo[h*Dh:(h+1)*Dh, :]))."""
    a = a_ref[0]                                   # (nH, Lq, S)
    v = v_ref[0]                                   # (nH, S, Dh)
    wo = wo_ref[...].astype(jnp.float32)           # (C, C)
    y = res_ref[0].astype(jnp.float32) + bo_ref[...].astype(jnp.float32)
    for h in range(n_heads):
        wo_h = wo[h * head_dim:(h + 1) * head_dim, :]                         # (Dh, C)
        vp = jnp.dot(v[h].astype(jnp.float32), wo_h,
                     preferred_element_type=jnp.float32)                      # (S, C)
        y = y + jnp.dot(a[h].astype(jnp.float32), vp,
                        preferred_element_type=jnp.float32)                   # (Lq, C)
    o_ref[0] = _layernorm_rows(y, g_ref[...], bt_ref[...], eps).astype(o_ref.dtype)


def pallas_deform_combine_add_ln(A, v_heads, wo, bo, residual, gamma, beta):
    """A: (B, nH, Lq, S) combined attention*bilinear weights; v_heads: (B, nH, S, Dh)."""
    B, nH, Lq, S = A.shape
    Dh = v_heads.shape[-1]
    C = nH * Dh
    return pl.pallas_call(
        functools.partial(_deform_combine_kernel, n_heads=nH, head_dim=Dh, eps=LN_EPS),
        out_shape=jax.ShapeDtypeStruct((B, Lq, C), jnp.float32),
        grid=(B,),
        in_specs=[
            pl.BlockSpec((1, nH, Lq, S), lambda b: (b, 0, 0, 0)),
            pl.BlockSpec((1, nH, S, Dh), lambda b: (b, 0, 0, 0)),
            pl.BlockSpec((C, C), lambda b: (0, 0)),
            pl.BlockSpec((1, C), lambda b: (0, 0)),
            pl.BlockSpec((1, Lq, C), lambda b: (b, 0, 0)),
            pl.BlockSpec((1, C), lambda b: (0, 0)),
            pl.BlockSpec((1, C), lambda b: (0, 0)),
        ],
        out_specs=pl.BlockSpec((1, Lq, C), lambda b: (b, 0, 0)),
        compiler_params=_PARALLEL1,
    )(A, v_heads, wo, bo.reshape(1, C), residual, gamma.reshape(1, C), beta.reshape(1, C))


def _self_attn_block_kernel(tgt_ref, qpos_ref, wqk_ref, bqk_ref, wv_ref, bv_ref,
                            wo_ref, bo_ref, g_ref, bt_ref, o_ref,
                            *, n_heads, scale, eps):
    """Fused decoder self-attention block: QK/V proj + per-head attention +
    output proj + residual + LayerNorm, one batch element per grid step."""
    tgt = tgt_ref[0].astype(jnp.float32)           # (L, C)
    x = tgt + qpos_ref[0].astype(jnp.float32)      # query/key input
    C = tgt.shape[-1]
    Dh = C // n_heads
    qk = jnp.dot(x, wqk_ref[...], preferred_element_type=jnp.float32) + bqk_ref[...]   # (L, 2C)
    v = jnp.dot(tgt, wv_ref[...], preferred_element_type=jnp.float32) + bv_ref[...]    # (L, C)
    wo = wo_ref[...].astype(jnp.float32)
    y = tgt + bo_ref[...].astype(jnp.float32)      # residual + out-proj bias
    for h in range(n_heads):
        c0 = h * Dh
        q_h = qk[:, c0:c0 + Dh]
        k_h = qk[:, C + c0:C + c0 + Dh]
        v_h = v[:, c0:c0 + Dh]
        s = jnp.dot(q_h, k_h.T, preferred_element_type=jnp.float32) * scale
        s = s - jnp.max(s, axis=-1, keepdims=True)
        p = jnp.exp(s)
        p = p / jnp.sum(p, axis=-1, keepdims=True)
        attn_h = jnp.dot(p, v_h, preferred_element_type=jnp.float32)           # (L, Dh)
        y = y + jnp.dot(attn_h, wo[c0:c0 + Dh, :], preferred_element_type=jnp.float32)
    o_ref[0] = _layernorm_rows(y, g_ref[...], bt_ref[...], eps).astype(o_ref.dtype)


def self_attn_block(p, tgt, query_pos, ln_g, ln_b):
    """nn.MultiheadAttention(q=tgt+pos, k=tgt+pos, v=tgt) + residual + LayerNorm."""
    B, L, C = tgt.shape
    H = N_HEADS
    Dh = C // H
    wqk = p["in_w"][:, :2 * C]
    bqk = p["in_b"][:2 * C]
    wv = p["in_w"][:, 2 * C:]
    bv = p["in_b"][2 * C:]
    return pl.pallas_call(
        functools.partial(_self_attn_block_kernel, n_heads=H,
                          scale=1.0 / math.sqrt(Dh), eps=LN_EPS),
        out_shape=jax.ShapeDtypeStruct((B, L, C), jnp.float32),
        grid=(B,),
        in_specs=[
            pl.BlockSpec((1, L, C), lambda b: (b, 0, 0)),     # tgt
            pl.BlockSpec((1, L, C), lambda b: (b, 0, 0)),     # query_pos
            pl.BlockSpec((C, 2 * C), lambda b: (0, 0)),       # wqk
            pl.BlockSpec((1, 2 * C), lambda b: (0, 0)),       # bqk
            pl.BlockSpec((C, C), lambda b: (0, 0)),           # wv
            pl.BlockSpec((1, C), lambda b: (0, 0)),           # bv
            pl.BlockSpec((C, C), lambda b: (0, 0)),           # out_w
            pl.BlockSpec((1, C), lambda b: (0, 0)),           # out_b
            pl.BlockSpec((1, C), lambda b: (0, 0)),           # ln gamma
            pl.BlockSpec((1, C), lambda b: (0, 0)),           # ln beta
        ],
        out_specs=pl.BlockSpec((1, L, C), lambda b: (b, 0, 0)),
        compiler_params=_PARALLEL1,
    )(tgt, query_pos, wqk, bqk.reshape(1, 2 * C), wv, bv.reshape(1, C),
      p["out_w"], p["out_b"].reshape(1, C), ln_g.reshape(1, C), ln_b.reshape(1, C))


# ----------------------------- model pieces ----------------------------------
def build_attn_interp_matrix(sampling_locations, attw, spatial_shapes_list):
    """Dense replacement for the bilinear grid-sample gather.

    Builds A[b, h, q, s] = sum_{l, p, corner} attw[b,q,h,l,p] * bilinear_w * in_bounds
    so that the deformable-attention output (before out_proj) is simply A @ value.
    sampling_locations: (B, Lq, nH, nL, nP, 2), attw: (B, Lq, nH, nL, nP).
    Returns (B, nH, Lq, sum_l H_l*W_l).
    """
    # TODO(synk): interpolation-matrix / one-hot construction kept in plain JAX
    # (pure elementwise + einsum; no data-dependent gather remains).
    mats = []
    for lvl, (H, W) in enumerate(spatial_shapes_list):
        loc = sampling_locations[:, :, :, lvl]            # (B, Lq, nH, nP, 2)
        wgt_p = attw[:, :, :, lvl]                        # (B, Lq, nH, nP)
        x = loc[..., 0] * W - 0.5
        y = loc[..., 1] * H - 0.5
        x0 = jnp.floor(x)
        y0 = jnp.floor(y)
        lx = x - x0
        ly = y - y0
        cols = jnp.arange(H * W, dtype=jnp.int32)

        def corner(ix, iy, cw):
            inb = (ix >= 0) & (ix <= W - 1) & (iy >= 0) & (iy <= H - 1)
            flat = (jnp.clip(iy, 0, H - 1).astype(jnp.int32) * W
                    + jnp.clip(ix, 0, W - 1).astype(jnp.int32))        # (B,Lq,nH,nP)
            onehot = (flat[..., None] == cols).astype(jnp.float32)     # (B,Lq,nH,nP,HW)
            return onehot * jnp.where(inb, cw, 0.0)[..., None]

        m = (corner(x0, y0, (1 - lx) * (1 - ly))
             + corner(x0 + 1, y0, lx * (1 - ly))
             + corner(x0, y0 + 1, (1 - lx) * ly)
             + corner(x0 + 1, y0 + 1, lx * ly))                         # (B,Lq,nH,nP,HW)
        mats.append(jnp.einsum('bqhp,bqhps->bhqs', wgt_p, m))           # fold attw, sum points
    return jnp.concatenate(mats, axis=-1)                               # (B, nH, Lq, S)


def ms_deform_attn_block(p, query, residual, reference_points, value_in,
                         spatial_shapes_list, padding_mask, ln_g, ln_b):
    """MSDeformAttn + residual + LayerNorm, with sampling done as dense matmuls."""
    B, Lq, C = query.shape
    Lv = value_in.shape[1]
    nH, nL, nP = N_HEADS, N_LEVELS, N_POINTS
    Dh = C // nH

    # value projection
    value = pallas_linear(value_in, p["value_proj"]["w"], p["value_proj"]["b"])
    if padding_mask is not None:
        value = jnp.where(padding_mask[..., None], 0.0, value)
    v_heads = jnp.transpose(value.reshape(B, Lv, nH, Dh), (0, 2, 1, 3))   # (B, nH, Lv, Dh)

    # fused sampling-offset + attention-weight projection (one kernel, N = 48)
    w_cat = jnp.concatenate([p["samp_off"]["w"], p["attn_w"]["w"]], axis=1)
    b_cat = jnp.concatenate([p["samp_off"]["b"], p["attn_w"]["b"]], axis=0)
    proj = pallas_linear(query, w_cat, b_cat)
    n_off = nH * nL * nP * 2
    offs = proj[..., :n_off].reshape(B, Lq, nH, nL, nP, 2)
    attw = jax.nn.softmax(proj[..., n_off:].reshape(B, Lq, nH, nL * nP), axis=-1)
    attw = attw.reshape(B, Lq, nH, nL, nP)

    offset_normalizer = jnp.array([[w, h] for (h, w) in spatial_shapes_list],
                                  dtype=jnp.float32)
    sampling_locations = (reference_points[:, :, None, :, None, :]
                          + offs / offset_normalizer[None, None, None, :, None, :])

    A = build_attn_interp_matrix(sampling_locations, attw, spatial_shapes_list)

    # per-head (A @ V @ Wo) + out-proj bias + residual + LayerNorm, fused
    return pallas_deform_combine_add_ln(A, v_heads, p["out_proj"]["w"],
                                        p["out_proj"]["b"], residual, ln_g, ln_b)


def encoder_layer(p, src, pos, reference_points, spatial_shapes_list, padding_mask):
    src = ms_deform_attn_block(p["self_attn"], src + pos, src, reference_points, src,
                               spatial_shapes_list, padding_mask,
                               p["norm1"]["g"], p["norm1"]["b"])
    src = pallas_ffn_ln(src, p["lin1"]["w"], p["lin1"]["b"],
                        p["lin2"]["w"], p["lin2"]["b"],
                        p["norm2"]["g"], p["norm2"]["b"])
    return src


def decoder_layer(p, tgt, query_pos, reference_points_input, memory,
                  spatial_shapes_list, padding_mask):
    # self attention (fused QKV + attention + out proj + residual + LN)
    tgt = self_attn_block(p["self_attn"], tgt, query_pos,
                          p["norm2"]["g"], p["norm2"]["b"])
    # cross (deformable) attention + residual + LN
    tgt = ms_deform_attn_block(p["cross_attn"], tgt + query_pos, tgt,
                               reference_points_input, memory,
                               spatial_shapes_list, padding_mask,
                               p["norm1"]["g"], p["norm1"]["b"])
    # FFN + residual + LN
    tgt = pallas_ffn_ln(tgt, p["lin1"]["w"], p["lin1"]["b"],
                        p["lin2"]["w"], p["lin2"]["b"],
                        p["norm3"]["g"], p["norm3"]["b"])
    return tgt


def get_valid_ratio(mask):
    _, H, W = mask.shape
    valid_H = jnp.sum(~mask[:, :, 0], axis=1).astype(jnp.float32)
    valid_W = jnp.sum(~mask[:, 0, :], axis=1).astype(jnp.float32)
    return jnp.stack([valid_W / W, valid_H / H], axis=-1)


def get_encoder_reference_points(spatial_shapes_list, valid_ratios):
    ref_list = []
    for lvl, (H, W) in enumerate(spatial_shapes_list):
        ref_y, ref_x = jnp.meshgrid(
            jnp.linspace(0.5, H - 0.5, H, dtype=jnp.float32),
            jnp.linspace(0.5, W - 0.5, W, dtype=jnp.float32), indexing="ij")
        ref_y = ref_y.reshape(-1)[None] / (valid_ratios[:, None, lvl, 1] * H)
        ref_x = ref_x.reshape(-1)[None] / (valid_ratios[:, None, lvl, 0] * W)
        ref_list.append(jnp.stack((ref_x, ref_y), -1))
    reference_points = jnp.concatenate(ref_list, 1)                       # (B, Len, 2)
    return reference_points[:, :, None] * valid_ratios[:, None]           # (B, Len, nL, 2)


def deformable_transformer_forward(params, srcs, masks, pos_embeds, query_embed):
    # (1) flatten multi-scale inputs (get_flatten_embed)
    spatial_shapes_list = [(s.shape[2], s.shape[3]) for s in srcs]
    src_flat, mask_flat, pos_flat = [], [], []
    for lvl, (src, mask, pos) in enumerate(zip(srcs, masks, pos_embeds)):
        B, C, H, W = src.shape
        src_flat.append(jnp.transpose(src.reshape(B, C, H * W), (0, 2, 1)))
        pos_l = jnp.transpose(pos.reshape(B, C, H * W), (0, 2, 1))
        pos_flat.append(pos_l + params["level_embed"][lvl][None, None, :])
        mask_flat.append(mask.reshape(B, H * W))
    src_flatten = jnp.concatenate(src_flat, axis=1)
    lvl_pos_embed_flatten = jnp.concatenate(pos_flat, axis=1)
    mask_flatten = jnp.concatenate(mask_flat, axis=1)
    valid_ratios = jnp.stack([get_valid_ratio(m) for m in masks], axis=1)  # (B, nL, 2)
    # level_start_index is implicit: levels are split statically in JAX.

    # (2) encoder
    enc_ref_points = get_encoder_reference_points(spatial_shapes_list, valid_ratios)
    memory = src_flatten
    for lp in params["encoder"]:
        memory = encoder_layer(lp, memory, lvl_pos_embed_flatten, enc_ref_points,
                               spatial_shapes_list, mask_flatten)

    # (3) queries: split pos / tgt embeds, build initial reference points (tiny -> plain JAX)
    bs, _, c = memory.shape
    pos_embed_q = query_embed[:, :c]
    tgt_embed = query_embed[:, c:]
    pos_embed_q = jnp.broadcast_to(pos_embed_q[None], (bs,) + pos_embed_q.shape)
    tgt_embed = jnp.broadcast_to(tgt_embed[None], (bs,) + tgt_embed.shape)
    reference_points = jax.nn.sigmoid(
        jnp.matmul(pos_embed_q, params["sample"]["w"]) + params["sample"]["b"])
    init_reference_out = reference_points

    # (4) decoder (return_intermediate_dec=False; query_pos = positional half of query_embed)
    ref_input = reference_points[:, :, None] * valid_ratios[:, None]       # (B, nq, nL, 2)
    output = tgt_embed
    for lp in params["decoder"]:
        output = decoder_layer(lp, output, pos_embed_q, ref_input, memory,
                               spatial_shapes_list, mask_flatten)
    inter_references_out = reference_points

    return output, init_reference_out, inter_references_out, None, None


# ----------------------------- parameter init --------------------------------
def _xavier(key, shape, fan_in, fan_out):
    limit = math.sqrt(6.0 / (fan_in + fan_out))
    return jax.random.uniform(key, shape, jnp.float32, -limit, limit)


def _init_linear(key, d_in, d_out):
    return {"w": _xavier(key, (d_in, d_out), d_in, d_out),
            "b": jnp.zeros((d_out,), jnp.float32)}


def _init_layernorm(d):
    return {"g": jnp.ones((d,), jnp.float32), "b": jnp.zeros((d,), jnp.float32)}


def _init_msdeform(key):
    k1, k2 = jax.random.split(key)
    nH, nL, nP, C = N_HEADS, N_LEVELS, N_POINTS, D_MODEL
    # sampling_offsets: zero weight, directional-grid bias (MSDeformAttn._reset_parameters)
    thetas = jnp.arange(nH, dtype=jnp.float32) * (2.0 * math.pi / nH)
    grid = jnp.stack([jnp.cos(thetas), jnp.sin(thetas)], -1)
    grid = grid / jnp.max(jnp.abs(grid), axis=-1, keepdims=True)
    grid = jnp.tile(grid[:, None, None, :], (1, nL, nP, 1))
    grid = grid * jnp.arange(1, nP + 1, dtype=jnp.float32)[None, None, :, None]
    return {
        "samp_off": {"w": jnp.zeros((C, nH * nL * nP * 2), jnp.float32),
                     "b": grid.reshape(-1)},
        "attn_w": {"w": jnp.zeros((C, nH * nL * nP), jnp.float32),
                   "b": jnp.zeros((nH * nL * nP,), jnp.float32)},
        "value_proj": _init_linear(k1, C, C),
        "out_proj": _init_linear(k2, C, C),
    }


def _init_encoder_layer(key):
    k = jax.random.split(key, 3)
    return {"self_attn": _init_msdeform(k[0]),
            "norm1": _init_layernorm(D_MODEL),
            "lin1": _init_linear(k[1], D_MODEL, D_FC),
            "lin2": _init_linear(k[2], D_FC, D_MODEL),
            "norm2": _init_layernorm(D_MODEL)}


def _init_decoder_layer(key):
    k = jax.random.split(key, 5)
    return {"cross_attn": _init_msdeform(k[0]),
            "norm1": _init_layernorm(D_MODEL),
            "self_attn": {"in_w": _xavier(k[1], (D_MODEL, 3 * D_MODEL), D_MODEL, 3 * D_MODEL),
                          "in_b": jnp.zeros((3 * D_MODEL,), jnp.float32),
                          "out_w": _xavier(k[2], (D_MODEL, D_MODEL), D_MODEL, D_MODEL),
                          "out_b": jnp.zeros((D_MODEL,), jnp.float32)},
            "norm2": _init_layernorm(D_MODEL),
            "lin1": _init_linear(k[3], D_MODEL, D_FC),
            "lin2": _init_linear(k[4], D_FC, D_MODEL),
            "norm3": _init_layernorm(D_MODEL)}


def init_params(key):
    keys = jax.random.split(key, 2 + NUM_ENC_LAYERS + NUM_DEC_LAYERS)
    params = {
        "level_embed": jax.random.normal(keys[0], (N_LEVELS, D_MODEL), jnp.float32),
        "sample": _init_linear(keys[1], D_MODEL, 2),
        "encoder": [_init_encoder_layer(keys[2 + i]) for i in range(NUM_ENC_LAYERS)],
        "decoder": [_init_decoder_layer(keys[2 + NUM_ENC_LAYERS + i])
                    for i in range(NUM_DEC_LAYERS)],
    }
    return params


# ----------------------------- main ------------------------------------------
if __name__ == "__main__":
    key = jax.random.PRNGKey(0)
    k_param, k_src0, k_src1, k_pos0, k_pos1, k_query = jax.random.split(key, 6)

    B = 2
    spatial = [(8, 8), (4, 4)]           # N_LEVELS feature maps
    src_keys = [k_src0, k_src1]
    pos_keys = [k_pos0, k_pos1]

    srcs = tuple(jax.random.normal(src_keys[l], (B, D_MODEL, H, W), jnp.float32)
                 for l, (H, W) in enumerate(spatial))
    pos_embeds = tuple(jax.random.normal(pos_keys[l], (B, D_MODEL, H, W), jnp.float32)
                       for l, (H, W) in enumerate(spatial))
    masks = tuple(jnp.zeros((B, H, W), dtype=bool) for (H, W) in spatial)  # no padding
    query_embed = jax.random.normal(k_query, (N_QUERIES, 2 * D_MODEL), jnp.float32)

    params = init_params(k_param)

    fwd = jax.jit(deformable_transformer_forward)
    dec_hidden, init_ref, inter_ref, _, _ = fwd(params, srcs, masks, pos_embeds,
                                                query_embed)
    jax.block_until_ready(dec_hidden)
    jax.block_until_ready(init_ref)
    jax.block_until_ready(inter_ref)

    assert dec_hidden.shape == (B, N_QUERIES, D_MODEL)
    assert init_ref.shape == (B, N_QUERIES, 2)
    assert bool(jnp.all(jnp.isfinite(dec_hidden)))
    print("KERNEL_OK")
</pallas_src>

<mosaic_0001>
module attributes {stable_mosaic.version = 11 : i64} {
  func.func @_linear_kernel(%arg0: i32, %arg1: memref<160x32xf32, #tpu.memory_space<vmem>>, %arg2: memref<32x48xf32, #tpu.memory_space<vmem>>, %arg3: memref<1x48xf32, #tpu.memory_space<vmem>>, %arg4: memref<160x48xf32, #tpu.memory_space<vmem>>) attributes {dimension_semantics = [#tpu.dimension_semantics<parallel>], iteration_bounds = array<i64: 1>, scalar_prefetch = 0 : i64, scratch_operands = 0 : i64, tpu.core_type = #tpu.core_type<tc>, window_params = [{transform_indices = @transform_0, window_bounds = array<i64: 160, 32>}, {pipeline_mode = #tpu.pipeline_mode<synchronous>, transform_indices = @transform_1, window_bounds = array<i64: 32, 48>}, {pipeline_mode = #tpu.pipeline_mode<synchronous>, transform_indices = @transform_2, window_bounds = array<i64: 1, 48>}, {transform_indices = @transform_3, window_bounds = array<i64: 160, 48>}]} {
    %c0 = arith.constant 0 : index
    %c0_0 = arith.constant 0 : index
    %0 = vector.load %arg1[%c0, %c0_0] : memref<160x32xf32, #tpu.memory_space<vmem>>, vector<160x32xf32>
    %c0_1 = arith.constant 0 : index
    %c0_2 = arith.constant 0 : index
    %1 = vector.load %arg2[%c0_1, %c0_2] : memref<32x48xf32, #tpu.memory_space<vmem>>, vector<32x48xf32>
    %cst = arith.constant dense<0.000000e+00> : vector<160x48xf32>
    %2 = tpu.matmul %0, %1, %cst {dimension_numbers = #tpu.dot_dimension_numbers<[1], [0], [0], [1], [0, 0, 1, 1], [], []>} : vector<160x32xf32>, vector<32x48xf32>, vector<160x48xf32> -> vector<160x48xf32>
    %c0_3 = arith.constant 0 : index
    %c0_4 = arith.constant 0 : index
    %3 = vector.load %arg3[%c0_3, %c0_4] : memref<1x48xf32, #tpu.memory_space<vmem>>, vector<1x48xf32>
    %4 = vector.broadcast %3 : vector<1x48xf32> to vector<160x48xf32>
    %5 = arith.addf %2, %4 : vector<160x48xf32>
    %c0_5 = arith.constant 0 : index
    %c0_6 = arith.constant 0 : index
    %6 = vector.load %arg4[%c0_5, %c0_6] : memref<160x48xf32, #tpu.memory_space<vmem>>, vector<160x48xf32>
    tpu.vector_store %arg4[%c0_5, %c0_6], %5 {strides = array<i32>} : memref<160x48xf32, #tpu.memory_space<vmem>>, vector<160x48xf32>,
    return
  }
  func.func @transform_0(%arg0: i32) -> (i32, i32) {
    %c0_i32 = arith.constant 0 : i32
    %c0_i32_0 = arith.constant 0 : i32
    return %arg0, %c0_i32 : i32, i32
  }
  func.func @transform_1(%arg0: i32) -> (i32, i32) {
    %c0_i32 = arith.constant 0 : i32
    %c0_i32_0 = arith.constant 0 : i32
    %c0_i32_1 = arith.constant 0 : i32
    return %c0_i32, %c0_i32_0 : i32, i32
  }
  func.func @transform_2(%arg0: i32) -> (i32, i32) {
    %c0_i32 = arith.constant 0 : i32
    %c0_i32_0 = arith.constant 0 : i32
    %c0_i32_1 = arith.constant 0 : i32
    return %c0_i32, %c0_i32_0 : i32, i32
  }
  func.func @transform_3(%arg0: i32) -> (i32, i32) {
    %c0_i32 = arith.constant 0 : i32
    %c0_i32_0 = arith.constant 0 : i32
    return %arg0, %c0_i32 : i32, i32
  }
}

module attributes {stable_mosaic.version = 11 : i64} {
  func.func @_linear_kernel(%arg0: i32, %arg1: memref<160x32xf32, #tpu.memory_space<vmem>>, %arg2: memref<32x32xf32, #tpu.memory_space<vmem>>, %arg3: memref<1x32xf32, #tpu.memory_space<vmem>>, %arg4: memref<160x32xf32, #tpu.memory_space<vmem>>) attributes {dimension_semantics = [#tpu.dimension_semantics<parallel>], iteration_bounds = array<i64: 1>, scalar_prefetch = 0 : i64, scratch_operands = 0 : i64, tpu.core_type = #tpu.core_type<tc>, window_params = [{transform_indices = @transform_0, window_bounds = array<i64: 160, 32>}, {pipeline_mode = #tpu.pipeline_mode<synchronous>, transform_indices = @transform_1, window_bounds = array<i64: 32, 32>}, {pipeline_mode = #tpu.pipeline_mode<synchronous>, transform_indices = @transform_2, window_bounds = array<i64: 1, 32>}, {transform_indices = @transform_3, window_bounds = array<i64: 160, 32>}]} {
    %c0 = arith.constant 0 : index
    %c0_0 = arith.constant 0 : index
    %0 = vector.load %arg1[%c0, %c0_0] : memref<160x32xf32, #tpu.memory_space<vmem>>, vector<160x32xf32>
    %c0_1 = arith.constant 0 : index
    %c0_2 = arith.constant 0 : index
    %1 = vector.load %arg2[%c0_1, %c0_2] : memref<32x32xf32, #tpu.memory_space<vmem>>, vector<32x32xf32>
    %cst = arith.constant dense<0.000000e+00> : vector<160x32xf32>
    %2 = tpu.matmul %0, %1, %cst {dimension_numbers = #tpu.dot_dimension_numbers<[1], [0], [0], [1], [0, 0, 1, 1], [], []>} : vector<160x32xf32>, vector<32x32xf32>, vector<160x32xf32> -> vector<160x32xf32>
    %c0_3 = arith.constant 0 : index
    %c0_4 = arith.constant 0 : index
    %3 = vector.load %arg3[%c0_3, %c0_4] : memref<1x32xf32, #tpu.memory_space<vmem>>, vector<1x32xf32>
    %4 = vector.broadcast %3 : vector<1x32xf32> to vector<160x32xf32>
    %5 = arith.addf %2, %4 : vector<160x32xf32>
    %c0_5 = arith.constant 0 : index
    %c0_6 = arith.constant 0 : index
    %6 = vector.load %arg4[%c0_5, %c0_6] : memref<160x32xf32, #tpu.memory_space<vmem>>, vector<160x32xf32>
    tpu.vector_store %arg4[%c0_5, %c0_6], %5 {strides = array<i32>} : memref<160x32xf32, #tpu.memory_space<vmem>>, vector<160x32xf32>,
    return
  }
  func.func @transform_0(%arg0: i32) -> (i32, i32) {
    %c0_i32 = arith.constant 0 : i32
    %c0_i32_0 = arith.constant 0 : i32
    return %arg0, %c0_i32 : i32, i32
  }
  func.func @transform_1(%arg0: i32) -> (i32, i32) {
    %c0_i32 = arith.constant 0 : i32
    %c0_i32_0 = arith.constant 0 : i32
    %c0_i32_1 = arith.constant 0 : i32
    return %c0_i32, %c0_i32_0 : i32, i32
  }
  func.func @transform_2(%arg0: i32) -> (i32, i32) {
    %c0_i32 = arith.constant 0 : i32
    %c0_i32_0 = arith.constant 0 : i32
    %c0_i32_1 = arith.constant 0 : i32
    return %c0_i32, %c0_i32_0 : i32, i32
  }
  func.func @transform_3(%arg0: i32) -> (i32, i32) {
    %c0_i32 = arith.constant 0 : i32
    %c0_i32_0 = arith.constant 0 : i32
    return %arg0, %c0_i32 : i32, i32
  }
}

module attributes {stable_mosaic.version = 11 : i64} {
  func.func @_deform_combine_kernel(%arg0: i32, %arg1: memref<1x4x80x80xf32, #tpu.memory_space<vmem>>, %arg2: memref<1x4x80x8xf32, #tpu.memory_space<vmem>>, %arg3: memref<32x32xf32, #tpu.memory_space<vmem>>, %arg4: memref<1x32xf32, #tpu.memory_space<vmem>>, %arg5: memref<1x80x32xf32, #tpu.memory_space<vmem>>, %arg6: memref<1x32xf32, #tpu.memory_space<vmem>>, %arg7: memref<1x32xf32, #tpu.memory_space<vmem>>, %arg8: memref<1x80x32xf32, #tpu.memory_space<vmem>>) attributes {dimension_semantics = [#tpu.dimension_semantics<parallel>], iteration_bounds = array<i64: 2>, scalar_prefetch = 0 : i64, scratch_operands = 0 : i64, tpu.core_type = #tpu.core_type<tc>, window_params = [{transform_indices = @transform_0, window_bounds = array<i64: 1, 4, 80, 80>}, {transform_indices = @transform_1, window_bounds = array<i64: 1, 4, 80, 8>}, {pipeline_mode = #tpu.pipeline_mode<synchronous>, transform_indices = @transform_2, window_bounds = array<i64: 32, 32>}, {pipeline_mode = #tpu.pipeline_mode<synchronous>, transform_indices = @transform_3, window_bounds = array<i64: 1, 32>}, {transform_indices = @transform_4, window_bounds = array<i64: 1, 80, 32>}, {pipeline_mode = #tpu.pipeline_mode<synchronous>, transform_indices = @transform_5, window_bounds = array<i64: 1, 32>}, {pipeline_mode = #tpu.pipeline_mode<synchronous>, transform_indices = @transform_6, window_bounds = array<i64: 1, 32>}, {transform_indices = @transform_7, window_bounds = array<i64: 1, 80, 32>}]} {
    %c0 = arith.constant 0 : index
    %c0_0 = arith.constant 0 : index
    %c0_1 = arith.constant 0 : index
    %c0_2 = arith.constant 0 : index
    %0 = vector.load %arg1[%c0, %c0_0, %c0_1, %c0_2] : memref<1x4x80x80xf32, #tpu.memory_space<vmem>>, vector<1x4x80x80xf32>
    %1 = vector.shape_cast %0 : vector<1x4x80x80xf32> to vector<4x80x80xf32>
    %c0_3 = arith.constant 0 : index
    %c0_4 = arith.constant 0 : index
    %c0_5 = arith.constant 0 : index
    %c0_6 = arith.constant 0 : index
    %2 = vector.load %arg2[%c0_3, %c0_4, %c0_5, %c0_6] : memref<1x4x80x8xf32, #tpu.memory_space<vmem>>, vector<1x4x80x8xf32>
    %3 = vector.shape_cast %2 : vector<1x4x80x8xf32> to vector<4x80x8xf32>
    %c0_7 = arith.constant 0 : index
    %c0_8 = arith.constant 0 : index
    %4 = vector.load %arg3[%c0_7, %c0_8] : memref<32x32xf32, #tpu.memory_space<vmem>>, vector<32x32xf32>
    %c0_9 = arith.constant 0 : index
    %c0_10 = arith.constant 0 : index
    %c0_11 = arith.constant 0 : index
    %5 = vector.load %arg5[%c0_9, %c0_10, %c0_11] : memref<1x80x32xf32, #tpu.memory_space<vmem>>, vector<1x80x32xf32>
    %6 = vector.shape_cast %5 : vector<1x80x32xf32> to vector<80x32xf32>
    %c0_12 = arith.constant 0 : index
    %c0_13 = arith.constant 0 : index
    %7 = vector.load %arg4[%c0_12, %c0_13] : memref<1x32xf32, #tpu.memory_space<vmem>>, vector<1x32xf32>
    %8 = vector.broadcast %7 : vector<1x32xf32> to vector<80x32xf32>
    %9 = arith.addf %6, %8 : vector<80x32xf32>
    %10 = vector.extract_strided_slice %4 {offsets = [0, 0], sizes = [8, 32], strides = [1, 1]} : vector<32x32xf32> to vector<8x32xf32>
    %11 = vector.extract_strided_slice %3 {offsets = [0, 0, 0], sizes = [1, 80, 8], strides = [1, 1, 1]} : vector<4x80x8xf32> to vector<1x80x8xf32>
    %12 = vector.shape_cast %11 : vector<1x80x8xf32> to vector<80x8xf32>
    %cst = arith.constant dense<0.000000e+00> : vector<80x32xf32>
    %13 = tpu.matmul %12, %10, %cst {dimension_numbers = #tpu.dot_dimension_numbers<[1], [0], [0], [1], [0, 0, 1, 1], [], []>} : vector<80x8xf32>, vector<8x32xf32>, vector<80x32xf32> -> vector<80x32xf32>
    %14 = vector.extract_strided_slice %1 {offsets = [0, 0, 0], sizes = [1, 80, 80], strides = [1, 1, 1]} : vector<4x80x80xf32> to vector<1x80x80xf32>
    %15 = vector.shape_cast %14 : vector<1x80x80xf32> to vector<80x80xf32>
    %cst_14 = arith.constant dense<0.000000e+00> : vector<80x32xf32>
    %16 = tpu.matmul %15, %13, %cst_14 {dimension_numbers = #tpu.dot_dimension_numbers<[1], [0], [0], [1], [0, 0, 1, 1], [], []>} : vector<80x80xf32>, vector<80x32xf32>, vector<80x32xf32> -> vector<80x32xf32>
    %17 = arith.addf %9, %16 : vector<80x32xf32>
    %18 = vector.extract_strided_slice %4 {offsets = [8, 0], sizes = [8, 32], strides = [1, 1]} : vector<32x32xf32> to vector<8x32xf32>
    %19 = vector.extract_strided_slice %3 {offsets = [1, 0, 0], sizes = [1, 80, 8], strides = [1, 1, 1]} : vector<4x80x8xf32> to vector<1x80x8xf32>
    %20 = vector.shape_cast %19 : vector<1x80x8xf32> to vector<80x8xf32>
    %cst_15 = arith.constant dense<0.000000e+00> : vector<80x32xf32>
    %21 = tpu.matmul %20, %18, %cst_15 {dimension_numbers = #tpu.dot_dimension_numbers<[1], [0], [0], [1], [0, 0, 1, 1], [], []>} : vector<80x8xf32>, vector<8x32xf32>, vector<80x32xf32> -> vector<80x32xf32>
    %22 = vector.extract_strided_slice %1 {offsets = [1, 0, 0], sizes = [1, 80, 80], strides = [1, 1, 1]} : vector<4x80x80xf32> to vector<1x80x80xf32>
    %23 = vector.shape_cast %22 : vector<1x80x80xf32> to vector<80x80xf32>
    %cst_16 = arith.constant dense<0.000000e+00> : vector<80x32xf32>
    %24 = tpu.matmul %23, %21, %cst_16 {dimension_numbers = #tpu.dot_dimension_numbers<[1], [0], [0], [1], [0, 0, 1, 1], [], []>} : vector<80x80xf32>, vector<80x32xf32>, vector<80x32xf32> -> vector<80x32xf32>
    %25 = arith.addf %17, %24 : vector<80x32xf32>
    %26 = vector.extract_strided_slice %4 {offsets = [16, 0], sizes = [8, 32], strides = [1, 1]} : vector<32x32xf32> to vector<8x32xf32>
    %27 = vector.extract_strided_slice %3 {offsets = [2, 0, 0], sizes = [1, 80, 8], strides = [1, 1, 1]} : vector<4x80x8xf32> to vector<1x80x8xf32>
    %28 = vector.shape_cast %27 : vector<1x80x8xf32> to vector<80x8xf32>
    %cst_17 = arith.constant dense<0.000000e+00> : vector<80x32xf32>
    %29 = tpu.matmul %28, %26, %cst_17 {dimension_numbers = #tpu.dot_dimension_numbers<[1], [0], [0], [1], [0, 0, 1, 1], [], []>} : vector<80x8xf32>, vector<8x32xf32>, vector<80x32xf32> -> vector<80x32xf32>
    %30 = vector.extract_strided_slice %1 {offsets = [2, 0, 0], sizes = [1, 80, 80], strides = [1, 1, 1]} : vector<4x80x80xf32> to vector<1x80x80xf32>
    %31 = vector.shape_cast %30 : vector<1x80x80xf32> to vector<80x80xf32>
    %cst_18 = arith.constant dense<0.000000e+00> : vector<80x32xf32>
    %32 = tpu.matmul %31, %29, %cst_18 {dimension_numbers = #tpu.dot_dimension_numbers<[1], [0], [0], [1], [0, 0, 1, 1], [], []>} : vector<80x80xf32>, vector<80x32xf32>, vector<80x32xf32> -> vector<80x32xf32>
    %33 = arith.addf %25, %32 : vector<80x32xf32>
    %34 = vector.extract_strided_slice %4 {offsets = [24, 0], sizes = [8, 32], strides = [1, 1]} : vector<32x32xf32> to vector<8x32xf32>
    %35 = vector.extract_strided_slice %3 {offsets = [3, 0, 0], sizes = [1, 80, 8], strides = [1, 1, 1]} : vector<4x80x8xf32> to vector<1x80x8xf32>
    %36 = vector.shape_cast %35 : vector<1x80x8xf32> to vector<80x8xf32>
    %cst_19 = arith.constant dense<0.000000e+00> : vector<80x32xf32>
    %37 = tpu.matmul %36, %34, %cst_19 {dimension_numbers = #tpu.dot_dimension_numbers<[1], [0], [0], [1], [0, 0, 1, 1], [], []>} : vector<80x8xf32>, vector<8x32xf32>, vector<80x32xf32> -> vector<80x32xf32>
    %38 = vector.extract_strided_slice %1 {offsets = [3, 0, 0], sizes = [1, 80, 80], strides = [1, 1, 1]} : vector<4x80x80xf32> to vector<1x80x80xf32>
    %39 = vector.shape_cast %38 : vector<1x80x80xf32> to vector<80x80xf32>
    %cst_20 = arith.constant dense<0.000000e+00> : vector<80x32xf32>
    %40 = tpu.matmul %39, %37, %cst_20 {dimension_numbers = #tpu.dot_dimension_numbers<[1], [0], [0], [1], [0, 0, 1, 1], [], []>} : vector<80x80xf32>, vector<80x32xf32>, vector<80x32xf32> -> vector<80x32xf32>
    %41 = arith.addf %33, %40 : vector<80x32xf32>
    %c0_21 = arith.constant 0 : index
    %c0_22 = arith.constant 0 : index
    %42 = vector.load %arg6[%c0_21, %c0_22] : memref<1x32xf32, #tpu.memory_space<vmem>>, vector<1x32xf32>
    %c0_23 = arith.constant 0 : index
    %c0_24 = arith.constant 0 : index
    %43 = vector.load %arg7[%c0_23, %c0_24] : memref<1x32xf32, #tpu.memory_space<vmem>>, vector<1x32xf32>
    %cst_25 = arith.constant dense<0.000000e+00> : vector<80xf32>
    %44 = vector.multi_reduction <add>, %41, %cst_25 [1] : vector<80x32xf32> to vector<80xf32>
    %45 = vector.shape_cast %44 : vector<80xf32> to vector<80x1xf32>
    %cst_26 = arith.constant 3.200000e+01 : f32
    %46 = vector.broadcast %cst_26 : f32 to vector<80x1xf32>
    %47 = arith.divf %45, %46 : vector<80x1xf32>
    %48 = vector.broadcast %47 : vector<80x1xf32> to vector<80x32xf32>
    %49 = arith.subf %41, %48 : vector<80x32xf32>
    %50 = arith.mulf %49, %49 : vector<80x32xf32>
    %cst_27 = arith.constant dense<0.000000e+00> : vector<80xf32>
    %51 = vector.multi_reduction <add>, %50, %cst_27 [1] : vector<80x32xf32> to vector<80xf32>
    %52 = vector.shape_cast %51 : vector<80xf32> to vector<80x1xf32>
    %cst_28 = arith.constant 3.200000e+01 : f32
    %53 = vector.broadcast %cst_28 : f32 to vector<80x1xf32>
    %54 = arith.divf %52, %53 : vector<80x1xf32>
    %cst_29 = arith.constant 9.99999974E-6 : f32
    %55 = vector.broadcast %cst_29 : f32 to vector<80x1xf32>
    %56 = arith.addf %54, %55 : vector<80x1xf32>
    %57 = math.rsqrt %56 : vector<80x1xf32>
    %58 = vector.broadcast %57 : vector<80x1xf32> to vector<80x32xf32>
    %59 = arith.mulf %49, %58 : vector<80x32xf32>
    %60 = vector.broadcast %42 : vector<1x32xf32> to vector<80x32xf32>
    %61 = arith.mulf %59, %60 : vector<80x32xf32>
    %62 = vector.broadcast %43 : vector<1x32xf32> to vector<80x32xf32>
    %63 = arith.addf %61, %62 : vector<80x32xf32>
    %c0_30 = arith.constant 0 : index
    %c0_31 = arith.constant 0 : index
    %c0_32 = arith.constant 0 : index
    %64 = vector.load %arg8[%c0_30, %c0_31, %c0_32] : memref<1x80x32xf32, #tpu.memory_space<vmem>>, vector<1x80x32xf32>
    %65 = vector.shape_cast %64 : vector<1x80x32xf32> to vector<80x32xf32>
    %66 = vector.shape_cast %63 : vector<80x32xf32> to vector<1x80x32xf32>
    tpu.vector_store %arg8[%c0_30, %c0_31, %c0_32], %66 {strides = array<i32>} : memref<1x80x32xf32, #tpu.memory_space<vmem>>, vector<1x80x32xf32>,
    return
  }
  func.func @transform_0(%arg0: i32) -> (i32, i32, i32, i32) {
    %c0_i32 = arith.constant 0 : i32
    %c0_i32_0 = arith.constant 0 : i32
    %c0_i32_1 = arith.constant 0 : i32
    %c0_i32_2 = arith.constant 0 : i32
    return %arg0, %c0_i32, %c0_i32_0, %c0_i32_1 : i32, i32, i32, i32
  }
  func.func @transform_1(%arg0: i32) -> (i32, i32, i32, i32) {
    %c0_i32 = arith.constant 0 : i32
    %c0_i32_0 = arith.constant 0 : i32
    %c0_i32_1 = arith.constant 0 : i32
    %c0_i32_2 = arith.constant 0 : i32
    return %arg0, %c0_i32, %c0_i32_0, %c0_i32_1 : i32, i32, i32, i32
  }
  func.func @transform_2(%arg0: i32) -> (i32, i32) {
    %c0_i32 = arith.constant 0 : i32
    %c0_i32_0 = arith.constant 0 : i32
    %c0_i32_1 = arith.constant 0 : i32
    return %c0_i32, %c0_i32_0 : i32, i32
  }
  func.func @transform_3(%arg0: i32) -> (i32, i32) {
    %c0_i32 = arith.constant 0 : i32
    %c0_i32_0 = arith.constant 0 : i32
    %c0_i32_1 = arith.constant 0 : i32
    return %c0_i32, %c0_i32_0 : i32, i32
  }
  func.func @transform_4(%arg0: i32) -> (i32, i32, i32) {
    %c0_i32 = arith.constant 0 : i32
    %c0_i32_0 = arith.constant 0 : i32
    %c0_i32_1 = arith.constant 0 : i32
    return %arg0, %c0_i32, %c0_i32_0 : i32, i32, i32
  }
  func.func @transform_5(%arg0: i32) -> (i32, i32) {
    %c0_i32 = arith.constant 0 : i32
    %c0_i32_0 = arith.constant 0 : i32
    %c0_i32_1 = arith.constant 0 : i32
    return %c0_i32, %c0_i32_0 : i32, i32
  }
  func.func @transform_6(%arg0: i32) -> (i32, i32) {
    %c0_i32 = arith.constant 0 : i32
    %c0_i32_0 = arith.constant 0 : i32
    %c0_i32_1 = arith.constant 0 : i32
    return %c0_i32, %c0_i32_0 : i32, i32
  }
  func.func @transform_7(%arg0: i32) -> (i32, i32, i32) {
    %c0_i32 = arith.constant 0 : i32
    %c0_i32_0 = arith.constant 0 : i32
    %c0_i32_1 = arith.constant 0 : i32
    return %arg0, %c0_i32, %c0_i32_0 : i32, i32, i32
  }
}

module attributes {stable_mosaic.version = 11 : i64} {
  func.func @_ffn_ln_kernel(%arg0: i32, %arg1: memref<160x32xf32, #tpu.memory_space<vmem>>, %arg2: memref<32x64xf32, #tpu.memory_space<vmem>>, %arg3: memref<1x64xf32, #tpu.memory_space<vmem>>, %arg4: memref<64x32xf32, #tpu.memory_space<vmem>>, %arg5: memref<1x32xf32, #tpu.memory_space<vmem>>, %arg6: memref<1x32xf32, #tpu.memory_space<vmem>>, %arg7: memref<1x32xf32, #tpu.memory_space<vmem>>, %arg8: memref<160x32xf32, #tpu.memory_space<vmem>>) attributes {dimension_semantics = [#tpu.dimension_semantics<parallel>], iteration_bounds = array<i64: 1>, scalar_prefetch = 0 : i64, scratch_operands = 0 : i64, tpu.core_type = #tpu.core_type<tc>, window_params = [{transform_indices = @transform_0, window_bounds = array<i64: 160, 32>}, {pipeline_mode = #tpu.pipeline_mode<synchronous>, transform_indices = @transform_1, window_bounds = array<i64: 32, 64>}, {pipeline_mode = #tpu.pipeline_mode<synchronous>, transform_indices = @transform_2, window_bounds = array<i64: 1, 64>}, {pipeline_mode = #tpu.pipeline_mode<synchronous>, transform_indices = @transform_3, window_bounds = array<i64: 64, 32>}, {pipeline_mode = #tpu.pipeline_mode<synchronous>, transform_indices = @transform_4, window_bounds = array<i64: 1, 32>}, {pipeline_mode = #tpu.pipeline_mode<synchronous>, transform_indices = @transform_5, window_bounds = array<i64: 1, 32>}, {pipeline_mode = #tpu.pipeline_mode<synchronous>, transform_indices = @transform_6, window_bounds = array<i64: 1, 32>}, {transform_indices = @transform_7, window_bounds = array<i64: 160, 32>}]} {
    %c0 = arith.constant 0 : index
    %c0_0 = arith.constant 0 : index
    %0 = vector.load %arg1[%c0, %c0_0] : memref<160x32xf32, #tpu.memory_space<vmem>>, vector<160x32xf32>
    %c0_1 = arith.constant 0 : index
    %c0_2 = arith.constant 0 : index
    %1 = vector.load %arg2[%c0_1, %c0_2] : memref<32x64xf32, #tpu.memory_space<vmem>>, vector<32x64xf32>
    %cst = arith.constant dense<0.000000e+00> : vector<160x64xf32>
    %2 = tpu.matmul %0, %1, %cst {dimension_numbers = #tpu.dot_dimension_numbers<[1], [0], [0], [1], [0, 0, 1, 1], [], []>} : vector<160x32xf32>, vector<32x64xf32>, vector<160x64xf32> -> vector<160x64xf32>
    %c0_3 = arith.constant 0 : index
    %c0_4 = arith.constant 0 : index
    %3 = vector.load %arg3[%c0_3, %c0_4] : memref<1x64xf32, #tpu.memory_space<vmem>>, vector<1x64xf32>
    %4 = vector.broadcast %3 : vector<1x64xf32> to vector<160x64xf32>
    %5 = arith.addf %2, %4 : vector<160x64xf32>
    %cst_5 = arith.constant 0.000000e+00 : f32
    %6 = vector.broadcast %cst_5 : f32 to vector<160x64xf32>
    %7 = arith.maximumf %5, %6 : vector<160x64xf32>
    %c0_6 = arith.constant 0 : index
    %c0_7 = arith.constant 0 : index
    %8 = vector.load %arg4[%c0_6, %c0_7] : memref<64x32xf32, #tpu.memory_space<vmem>>, vector<64x32xf32>
    %cst_8 = arith.constant dense<0.000000e+00> : vector<160x32xf32>
    %9 = tpu.matmul %7, %8, %cst_8 {dimension_numbers = #tpu.dot_dimension_numbers<[1], [0], [0], [1], [0, 0, 1, 1], [], []>} : vector<160x64xf32>, vector<64x32xf32>, vector<160x32xf32> -> vector<160x32xf32>
    %10 = arith.addf %0, %9 : vector<160x32xf32>
    %c0_9 = arith.constant 0 : index
    %c0_10 = arith.constant 0 : index
    %11 = vector.load %arg5[%c0_9, %c0_10] : memref<1x32xf32, #tpu.memory_space<vmem>>, vector<1x32xf32>
    %12 = vector.broadcast %11 : vector<1x32xf32> to vector<160x32xf32>
    %13 = arith.addf %10, %12 : vector<160x32xf32>
    %c0_11 = arith.constant 0 : index
    %c0_12 = arith.constant 0 : index
    %14 = vector.load %arg6[%c0_11, %c0_12] : memref<1x32xf32, #tpu.memory_space<vmem>>, vector<1x32xf32>
    %c0_13 = arith.constant 0 : index
    %c0_14 = arith.constant 0 : index
    %15 = vector.load %arg7[%c0_13, %c0_14] : memref<1x32xf32, #tpu.memory_space<vmem>>, vector<1x32xf32>
    %cst_15 = arith.constant dense<0.000000e+00> : vector<160xf32>
    %16 = vector.multi_reduction <add>, %13, %cst_15 [1] : vector<160x32xf32> to vector<160xf32>
    %17 = vector.shape_cast %16 : vector<160xf32> to vector<160x1xf32>
    %cst_16 = arith.constant 3.200000e+01 : f32
    %18 = vector.broadcast %cst_16 : f32 to vector<160x1xf32>
    %19 = arith.divf %17, %18 : vector<160x1xf32>
    %20 = vector.broadcast %19 : vector<160x1xf32> to vector<160x32xf32>
    %21 = arith.subf %13, %20 : vector<160x32xf32>
    %22 = arith.mulf %21, %21 : vector<160x32xf32>
    %cst_17 = arith.constant dense<0.000000e+00> : vector<160xf32>
    %23 = vector.multi_reduction <add>, %22, %cst_17 [1] : vector<160x32xf32> to vector<160xf32>
    %24 = vector.shape_cast %23 : vector<160xf32> to vector<160x1xf32>
    %cst_18 = arith.constant 3.200000e+01 : f32
    %25 = vector.broadcast %cst_18 : f32 to vector<160x1xf32>
    %26 = arith.divf %24, %25 : vector<160x1xf32>
    %cst_19 = arith.constant 9.99999974E-6 : f32
    %27 = vector.broadcast %cst_19 : f32 to vector<160x1xf32>
    %28 = arith.addf %26, %27 : vector<160x1xf32>
    %29 = math.rsqrt %28 : vector<160x1xf32>
    %30 = vector.broadcast %29 : vector<160x1xf32> to vector<160x32xf32>
    %31 = arith.mulf %21, %30 : vector<160x32xf32>
    %32 = vector.broadcast %14 : vector<1x32xf32> to vector<160x32xf32>
    %33 = arith.mulf %31, %32 : vector<160x32xf32>
    %34 = vector.broadcast %15 : vector<1x32xf32> to vector<160x32xf32>
    %35 = arith.addf %33, %34 : vector<160x32xf32>
    %c0_20 = arith.constant 0 : index
    %c0_21 = arith.constant 0 : index
    %36 = vector.load %arg8[%c0_20, %c0_21] : memref<160x32xf32, #tpu.memory_space<vmem>>, vector<160x32xf32>
    tpu.vector_store %arg8[%c0_20, %c0_21], %35 {strides = array<i32>} : memref<160x32xf32, #tpu.memory_space<vmem>>, vector<160x32xf32>,
    return
  }
  func.func @transform_0(%arg0: i32) -> (i32, i32) {
    %c0_i32 = arith.constant 0 : i32
    %c0_i32_0 = arith.constant 0 : i32
    return %arg0, %c0_i32 : i32, i32
  }
  func.func @transform_1(%arg0: i32) -> (i32, i32) {
    %c0_i32 = arith.constant 0 : i32
    %c0_i32_0 = arith.constant 0 : i32
    %c0_i32_1 = arith.constant 0 : i32
    return %c0_i32, %c0_i32_0 : i32, i32
  }
  func.func @transform_2(%arg0: i32) -> (i32, i32) {
    %c0_i32 = arith.constant 0 : i32
    %c0_i32_0 = arith.constant 0 : i32
    %c0_i32_1 = arith.constant 0 : i32
    return %c0_i32, %c0_i32_0 : i32, i32
  }
  func.func @transform_3(%arg0: i32) -> (i32, i32) {
    %c0_i32 = arith.constant 0 : i32
    %c0_i32_0 = arith.constant 0 : i32
    %c0_i32_1 = arith.constant 0 : i32
    return %c0_i32, %c0_i32_0 : i32, i32
  }
  func.func @transform_4(%arg0: i32) -> (i32, i32) {
    %c0_i32 = arith.constant 0 : i32
    %c0_i32_0 = arith.constant 0 : i32
    %c0_i32_1 = arith.constant 0 : i32
    return %c0_i32, %c0_i32_0 : i32, i32
  }
  func.func @transform_5(%arg0: i32) -> (i32, i32) {
    %c0_i32 = arith.constant 0 : i32
    %c0_i32_0 = arith.constant 0 : i32
    %c0_i32_1 = arith.constant 0 : i32
    return %c0_i32, %c0_i32_0 : i32, i32
  }
  func.func @transform_6(%arg0: i32) -> (i32, i32) {
    %c0_i32 = arith.constant 0 : i32
    %c0_i32_0 = arith.constant 0 : i32
    %c0_i32_1 = arith.constant 0 : i32
    return %c0_i32, %c0_i32_0 : i32, i32
  }
  func.func @transform_7(%arg0: i32) -> (i32, i32) {
    %c0_i32 = arith.constant 0 : i32
    %c0_i32_0 = arith.constant 0 : i32
    return %arg0, %c0_i32 : i32, i32
  }
}

module attributes {stable_mosaic.version = 11 : i64} {
  func.func @_self_attn_block_kernel(%arg0: i32, %arg1: memref<1x8x32xf32, #tpu.memory_space<vmem>>, %arg2: memref<1x8x32xf32, #tpu.memory_space<vmem>>, %arg3: memref<32x64xf32, #tpu.memory_space<vmem>>, %arg4: memref<1x64xf32, #tpu.memory_space<vmem>>, %arg5: memref<32x32xf32, #tpu.memory_space<vmem>>, %arg6: memref<1x32xf32, #tpu.memory_space<vmem>>, %arg7: memref<32x32xf32, #tpu.memory_space<vmem>>, %arg8: memref<1x32xf32, #tpu.memory_space<vmem>>, %arg9: memref<1x32xf32, #tpu.memory_space<vmem>>, %arg10: memref<1x32xf32, #tpu.memory_space<vmem>>, %arg11: memref<1x8x32xf32, #tpu.memory_space<vmem>>) attributes {dimension_semantics = [#tpu.dimension_semantics<parallel>], iteration_bounds = array<i64: 2>, scalar_prefetch = 0 : i64, scratch_operands = 0 : i64, tpu.core_type = #tpu.core_type<tc>, window_params = [{transform_indices = @transform_0, window_bounds = array<i64: 1, 8, 32>}, {transform_indices = @transform_1, window_bounds = array<i64: 1, 8, 32>}, {pipeline_mode = #tpu.pipeline_mode<synchronous>, transform_indices = @transform_2, window_bounds = array<i64: 32, 64>}, {pipeline_mode = #tpu.pipeline_mode<synchronous>, transform_indices = @transform_3, window_bounds = array<i64: 1, 64>}, {pipeline_mode = #tpu.pipeline_mode<synchronous>, transform_indices = @transform_4, window_bounds = array<i64: 32, 32>}, {pipeline_mode = #tpu.pipeline_mode<synchronous>, transform_indices = @transform_5, window_bounds = array<i64: 1, 32>}, {pipeline_mode = #tpu.pipeline_mode<synchronous>, transform_indices = @transform_6, window_bounds = array<i64: 32, 32>}, {pipeline_mode = #tpu.pipeline_mode<synchronous>, transform_indices = @transform_7, window_bounds = array<i64: 1, 32>}, {pipeline_mode = #tpu.pipeline_mode<synchronous>, transform_indices = @transform_8, window_bounds = array<i64: 1, 32>}, {pipeline_mode = #tpu.pipeline_mode<synchronous>, transform_indices = @transform_9, window_bounds = array<i64: 1, 32>}, {transform_indices = @transform_10, window_bounds = array<i64: 1, 8, 32>}]} {
    %c0 = arith.constant 0 : index
    %c0_0 = arith.constant 0 : index
    %c0_1 = arith.constant 0 : index
    %0 = vector.load %arg1[%c0, %c0_0, %c0_1] : memref<1x8x32xf32, #tpu.memory_space<vmem>>, vector<1x8x32xf32>
    %1 = vector.shape_cast %0 : vector<1x8x32xf32> to vector<8x32xf32>
    %c0_2 = arith.constant 0 : index
    %c0_3 = arith.constant 0 : index
    %c0_4 = arith.constant 0 : index
    %2 = vector.load %arg2[%c0_2, %c0_3, %c0_4] : memref<1x8x32xf32, #tpu.memory_space<vmem>>, vector<1x8x32xf32>
    %3 = vector.shape_cast %2 : vector<1x8x32xf32> to vector<8x32xf32>
    %4 = arith.addf %1, %3 : vector<8x32xf32>
    %c0_5 = arith.constant 0 : index
    %c0_6 = arith.constant 0 : index
    %5 = vector.load %arg3[%c0_5, %c0_6] : memref<32x64xf32, #tpu.memory_space<vmem>>, vector<32x64xf32>
    %cst = arith.constant dense<0.000000e+00> : vector<8x64xf32>
    %6 = tpu.matmul %4, %5, %cst {dimension_numbers = #tpu.dot_dimension_numbers<[1], [0], [0], [1], [0, 0, 1, 1], [], []>} : vector<8x32xf32>, vector<32x64xf32>, vector<8x64xf32> -> vector<8x64xf32>
    %c0_7 = arith.constant 0 : index
    %c0_8 = arith.constant 0 : index
    %7 = vector.load %arg4[%c0_7, %c0_8] : memref<1x64xf32, #tpu.memory_space<vmem>>, vector<1x64xf32>
    %8 = vector.broadcast %7 : vector<1x64xf32> to vector<8x64xf32>
    %9 = arith.addf %6, %8 : vector<8x64xf32>
    %c0_9 = arith.constant 0 : index
    %c0_10 = arith.constant 0 : index
    %10 = vector.load %arg5[%c0_9, %c0_10] : memref<32x32xf32, #tpu.memory_space<vmem>>, vector<32x32xf32>
    %cst_11 = arith.constant dense<0.000000e+00> : vector<8x32xf32>
    %11 = tpu.matmul %1, %10, %cst_11 {dimension_numbers = #tpu.dot_dimension_numbers<[1], [0], [0], [1], [0, 0, 1, 1], [], []>} : vector<8x32xf32>, vector<32x32xf32>, vector<8x32xf32> -> vector<8x32xf32>
    %c0_12 = arith.constant 0 : index
    %c0_13 = arith.constant 0 : index
    %12 = vector.load %arg6[%c0_12, %c0_13] : memref<1x32xf32, #tpu.memory_space<vmem>>, vector<1x32xf32>
    %13 = vector.broadcast %12 : vector<1x32xf32> to vector<8x32xf32>
    %14 = arith.addf %11, %13 : vector<8x32xf32>
    %c0_14 = arith.constant 0 : index
    %c0_15 = arith.constant 0 : index
    %15 = vector.load %arg7[%c0_14, %c0_15] : memref<32x32xf32, #tpu.memory_space<vmem>>, vector<32x32xf32>
    %c0_16 = arith.constant 0 : index
    %c0_17 = arith.constant 0 : index
    %16 = vector.load %arg8[%c0_16, %c0_17] : memref<1x32xf32, #tpu.memory_space<vmem>>, vector<1x32xf32>
    %17 = vector.broadcast %16 : vector<1x32xf32> to vector<8x32xf32>
    %18 = arith.addf %1, %17 : vector<8x32xf32>
    %19 = vector.extract_strided_slice %9 {offsets = [0, 0], sizes = [8, 8], strides = [1, 1]} : vector<8x64xf32> to vector<8x8xf32>
    %20 = vector.extract_strided_slice %9 {offsets = [0, 32], sizes = [8, 8], strides = [1, 1]} : vector<8x64xf32> to vector<8x8xf32>
    %21 = vector.extract_strided_slice %14 {offsets = [0, 0], sizes = [8, 8], strides = [1, 1]} : vector<8x32xf32> to vector<8x8xf32>
    %22 = tpu.transpose %20, [1, 0] : vector<8x8xf32> -> vector<8x8xf32>
    %cst_18 = arith.constant dense<0.000000e+00> : vector<8x8xf32>
    %23 = tpu.matmul %19, %22, %cst_18 {dimension_numbers = #tpu.dot_dimension_numbers<[1], [0], [0], [1], [0, 0, 1, 1], [], []>} : vector<8x8xf32>, vector<8x8xf32>, vector<8x8xf32> -> vector<8x8xf32>
    %cst_19 = arith.constant 0.353553385 : f32
    %24 = vector.broadcast %cst_19 : f32 to vector<8x8xf32>
    %25 = arith.mulf %23, %24 : vector<8x8xf32>
    %cst_20 = arith.constant dense<0xFF800000> : vector<8xf32>
    %26 = vector.multi_reduction <maximumf>, %25, %cst_20 [1] : vector<8x8xf32> to vector<8xf32>
    %27 = vector.shape_cast %26 : vector<8xf32> to vector<8x1xf32>
    %28 = vector.broadcast %27 : vector<8x1xf32> to vector<8x8xf32>
    %29 = arith.subf %25, %28 : vector<8x8xf32>
    %30 = math.exp %29 : vector<8x8xf32>
    %cst_21 = arith.constant dense<0.000000e+00> : vector<8xf32>
    %31 = vector.multi_reduction <add>, %30, %cst_21 [1] : vector<8x8xf32> to vector<8xf32>
    %32 = vector.shape_cast %31 : vector<8xf32> to vector<8x1xf32>
    %33 = vector.broadcast %32 : vector<8x1xf32> to vector<8x8xf32>
    %34 = arith.divf %30, %33 : vector<8x8xf32>
    %cst_22 = arith.constant dense<0.000000e+00> : vector<8x8xf32>
    %35 = tpu.matmul %34, %21, %cst_22 {dimension_numbers = #tpu.dot_dimension_numbers<[1], [0], [0], [1], [0, 0, 1, 1], [], []>} : vector<8x8xf32>, vector<8x8xf32>, vector<8x8xf32> -> vector<8x8xf32>
    %36 = vector.extract_strided_slice %15 {offsets = [0, 0], sizes = [8, 32], strides = [1, 1]} : vector<32x32xf32> to vector<8x32xf32>
    %cst_23 = arith.constant dense<0.000000e+00> : vector<8x32xf32>
    %37 = tpu.matmul %35, %36, %cst_23 {dimension_numbers = #tpu.dot_dimension_numbers<[1], [0], [0], [1], [0, 0, 1, 1], [], []>} : vector<8x8xf32>, vector<8x32xf32>, vector<8x32xf32> -> vector<8x32xf32>
    %38 = arith.addf %18, %37 : vector<8x32xf32>
    %39 = vector.extract_strided_slice %9 {offsets = [0, 8], sizes = [8, 8], strides = [1, 1]} : vector<8x64xf32> to vector<8x8xf32>
    %40 = vector.extract_strided_slice %9 {offsets = [0, 40], sizes = [8, 8], strides = [1, 1]} : vector<8x64xf32> to vector<8x8xf32>
    %41 = vector.extract_strided_slice %14 {offsets = [0, 8], sizes = [8, 8], strides = [1, 1]} : vector<8x32xf32> to vector<8x8xf32>
    %42 = tpu.transpose %40, [1, 0] : vector<8x8xf32> -> vector<8x8xf32>
    %cst_24 = arith.constant dense<0.000000e+00> : vector<8x8xf32>
    %43 = tpu.matmul %39, %42, %cst_24 {dimension_numbers = #tpu.dot_dimension_numbers<[1], [0], [0], [1], [0, 0, 1, 1], [], []>} : vector<8x8xf32>, vector<8x8xf32>, vector<8x8xf32> -> vector<8x8xf32>
    %cst_25 = arith.constant 0.353553385 : f32
    %44 = vector.broadcast %cst_25 : f32 to vector<8x8xf32>
    %45 = arith.mulf %43, %44 : vector<8x8xf32>
    %cst_26 = arith.constant dense<0xFF800000> : vector<8xf32>
    %46 = vector.multi_reduction <maximumf>, %45, %cst_26 [1] : vector<8x8xf32> to vector<8xf32>
    %47 = vector.shape_cast %46 : vector<8xf32> to vector<8x1xf32>
    %48 = vector.broadcast %47 : vector<8x1xf32> to vector<8x8xf32>
    %49 = arith.subf %45, %48 : vector<8x8xf32>
    %50 = math.exp %49 : vector<8x8xf32>
    %cst_27 = arith.constant dense<0.000000e+00> : vector<8xf32>
    %51 = vector.multi_reduction <add>, %50, %cst_27 [1] : vector<8x8xf32> to vector<8xf32>
    %52 = vector.shape_cast %51 : vector<8xf32> to vector<8x1xf32>
    %53 = vector.broadcast %52 : vector<8x1xf32> to vector<8x8xf32>
    %54 = arith.divf %50, %53 : vector<8x8xf32>
    %cst_28 = arith.constant dense<0.000000e+00> : vector<8x8xf32>
    %55 = tpu.matmul %54, %41, %cst_28 {dimension_numbers = #tpu.dot_dimension_numbers<[1], [0], [0], [1], [0, 0, 1, 1], [], []>} : vector<8x8xf32>, vector<8x8xf32>, vector<8x8xf32> -> vector<8x8xf32>
    %56 = vector.extract_strided_slice %15 {offsets = [8, 0], sizes = [8, 32], strides = [1, 1]} : vector<32x32xf32> to vector<8x32xf32>
    %cst_29 = arith.constant dense<0.000000e+00> : vector<8x32xf32>
    %57 = tpu.matmul %55, %56, %cst_29 {dimension_numbers = #tpu.dot_dimension_numbers<[1], [0], [0], [1], [0, 0, 1, 1], [], []>} : vector<8x8xf32>, vector<8x32xf32>, vector<8x32xf32> -> vector<8x32xf32>
    %58 = arith.addf %38, %57 : vector<8x32xf32>
    %59 = vector.extract_strided_slice %9 {offsets = [0, 16], sizes = [8, 8], strides = [1, 1]} : vector<8x64xf32> to vector<8x8xf32>
    %60 = vector.extract_strided_slice %9 {offsets = [0, 48], sizes = [8, 8], strides = [1, 1]} : vector<8x64xf32> to vector<8x8xf32>
    %61 = vector.extract_strided_slice %14 {offsets = [0, 16], sizes = [8, 8], strides = [1, 1]} : vector<8x32xf32> to vector<8x8xf32>
    %62 = tpu.transpose %60, [1, 0] : vector<8x8xf32> -> vector<8x8xf32>
    %cst_30 = arith.constant dense<0.000000e+00> : vector<8x8xf32>
    %63 = tpu.matmul %59, %62, %cst_30 {dimension_numbers = #tpu.dot_dimension_numbers<[1], [0], [0], [1], [0, 0, 1, 1], [], []>} : vector<8x8xf32>, vector<8x8xf32>, vector<8x8xf32> -> vector<8x8xf32>
    %cst_31 = arith.constant 0.353553385 : f32
    %64 = vector.broadcast %cst_31 : f32 to vector<8x8xf32>
    %65 = arith.mulf %63, %64 : vector<8x8xf32>
    %cst_32 = arith.constant dense<0xFF800000> : vector<8xf32>
    %66 = vector.multi_reduction <maximumf>, %65, %cst_32 [1] : vector<8x8xf32> to vector<8xf32>
    %67 = vector.shape_cast %66 : vector<8xf32> to vector<8x1xf32>
    %68 = vector.broadcast %67 : vector<8x1xf32> to vector<8x8xf32>
    %69 = arith.subf %65, %68 : vector<8x8xf32>
    %70 = math.exp %69 : vector<8x8xf32>
    %cst_33 = arith.constant dense<0.000000e+00> : vector<8xf32>
    %71 = vector.multi_reduction <add>, %70, %cst_33 [1] : vector<8x8xf32> to vector<8xf32>
    %72 = vector.shape_cast %71 : vector<8xf32> to vector<8x1xf32>
    %73 = vector.broadcast %72 : vector<8x1xf32> to vector<8x8xf32>
    %74 = arith.divf %70, %73 : vector<8x8xf32>
    %cst_34 = arith.constant dense<0.000000e+00> : vector<8x8xf32>
    %75 = tpu.matmul %74, %61, %cst_34 {dimension_numbers = #tpu.dot_dimension_numbers<[1], [0], [0], [1], [0, 0, 1, 1], [], []>} : vector<8x8xf32>, vector<8x8xf32>, vector<8x8xf32> -> vector<8x8xf32>
    %76 = vector.extract_strided_slice %15 {offsets = [16, 0], sizes = [8, 32], strides = [1, 1]} : vector<32x32xf32> to vector<8x32xf32>
    %cst_35 = arith.constant dense<0.000000e+00> : vector<8x32xf32>
    %77 = tpu.matmul %75, %76, %cst_35 {dimension_numbers = #tpu.dot_dimension_numbers<[1], [0], [0], [1], [0, 0, 1, 1], [], []>} : vector<8x8xf32>, vector<8x32xf32>, vector<8x32xf32> -> vector<8x32xf32>
    %78 = arith.addf %58, %77 : vector<8x32xf32>
    %79 = vector.extract_strided_slice %9 {offsets = [0, 24], sizes = [8, 8], strides = [1, 1]} : vector<8x64xf32> to vector<8x8xf32>
    %80 = vector.extract_strided_slice %9 {offsets = [0, 56], sizes = [8, 8], strides = [1, 1]} : vector<8x64xf32> to vector<8x8xf32>
    %81 = vector.extract_strided_slice %14 {offsets = [0, 24], sizes = [8, 8], strides = [1, 1]} : vector<8x32xf32> to vector<8x8xf32>
    %82 = tpu.transpose %80, [1, 0] : vector<8x8xf32> -> vector<8x8xf32>
    %cst_36 = arith.constant dense<0.000000e+00> : vector<8x8xf32>
    %83 = tpu.matmul %79, %82, %cst_36 {dimension_numbers = #tpu.dot_dimension_numbers<[1], [0], [0], [1], [0, 0, 1, 1], [], []>} : vector<8x8xf32>, vector<8x8xf32>, vector<8x8xf32> -> vector<8x8xf32>
    %cst_37 = arith.constant 0.353553385 : f32
    %84 = vector.broadcast %cst_37 : f32 to vector<8x8xf32>
    %85 = arith.mulf %83, %84 : vector<8x8xf32>
    %cst_38 = arith.constant dense<0xFF800000> : vector<8xf32>
    %86 = vector.multi_reduction <maximumf>, %85, %cst_38 [1] : vector<8x8xf32> to vector<8xf32>
    %87 = vector.shape_cast %86 : vector<8xf32> to vector<8x1xf32>
    %88 = vector.broadcast %87 : vector<8x1xf32> to vector<8x8xf32>
    %89 = arith.subf %85, %88 : vector<8x8xf32>
    %90 = math.exp %89 : vector<8x8xf32>
    %cst_39 = arith.constant dense<0.000000e+00> : vector<8xf32>
    %91 = vector.multi_reduction <add>, %90, %cst_39 [1] : vector<8x8xf32> to vector<8xf32>
    %92 = vector.shape_cast %91 : vector<8xf32> to vector<8x1xf32>
    %93 = vector.broadcast %92 : vector<8x1xf32> to vector<8x8xf32>
    %94 = arith.divf %90, %93 : vector<8x8xf32>
    %cst_40 = arith.constant dense<0.000000e+00> : vector<8x8xf32>
    %95 = tpu.matmul %94, %81, %cst_40 {dimension_numbers = #tpu.dot_dimension_numbers<[1], [0], [0], [1], [0, 0, 1, 1], [], []>} : vector<8x8xf32>, vector<8x8xf32>, vector<8x8xf32> -> vector<8x8xf32>
    %96 = vector.extract_strided_slice %15 {offsets = [24, 0], sizes = [8, 32], strides = [1, 1]} : vector<32x32xf32> to vector<8x32xf32>
    %cst_41 = arith.constant dense<0.000000e+00> : vector<8x32xf32>
    %97 = tpu.matmul %95, %96, %cst_41 {dimension_numbers = #tpu.dot_dimension_numbers<[1], [0], [0], [1], [0, 0, 1, 1], [], []>} : vector<8x8xf32>, vector<8x32xf32>, vector<8x32xf32> -> vector<8x32xf32>
    %98 = arith.addf %78, %97 : vector<8x32xf32>
    %c0_42 = arith.constant 0 : index
    %c0_43 = arith.constant 0 : index
    %99 = vector.load %arg9[%c0_42, %c0_43] : memref<1x32xf32, #tpu.memory_space<vmem>>, vector<1x32xf32>
    %c0_44 = arith.constant 0 : index
    %c0_45 = arith.constant 0 : index
    %100 = vector.load %arg10[%c0_44, %c0_45] : memref<1x32xf32, #tpu.memory_space<vmem>>, vector<1x32xf32>
    %cst_46 = arith.constant dense<0.000000e+00> : vector<8xf32>
    %101 = vector.multi_reduction <add>, %98, %cst_46 [1] : vector<8x32xf32> to vector<8xf32>
    %102 = vector.shape_cast %101 : vector<8xf32> to vector<8x1xf32>
    %cst_47 = arith.constant 3.200000e+01 : f32
    %103 = vector.broadcast %cst_47 : f32 to vector<8x1xf32>
    %104 = arith.divf %102, %103 : vector<8x1xf32>
    %105 = vector.broadcast %104 : vector<8x1xf32> to vector<8x32xf32>
    %106 = arith.subf %98, %105 : vector<8x32xf32>
    %107 = arith.mulf %106, %106 : vector<8x32xf32>
    %cst_48 = arith.constant dense<0.000000e+00> : vector<8xf32>
    %108 = vector.multi_reduction <add>, %107, %cst_48 [1] : vector<8x32xf32> to vector<8xf32>
    %109 = vector.shape_cast %108 : vector<8xf32> to vector<8x1xf32>
    %cst_49 = arith.constant 3.200000e+01 : f32
    %110 = vector.broadcast %cst_49 : f32 to vector<8x1xf32>
    %111 = arith.divf %109, %110 : vector<8x1xf32>
    %cst_50 = arith.constant 9.99999974E-6 : f32
    %112 = vector.broadcast %cst_50 : f32 to vector<8x1xf32>
    %113 = arith.addf %111, %112 : vector<8x1xf32>
    %114 = math.rsqrt %113 : vector<8x1xf32>
    %115 = vector.broadcast %114 : vector<8x1xf32> to vector<8x32xf32>
    %116 = arith.mulf %106, %115 : vector<8x32xf32>
    %117 = vector.broadcast %99 : vector<1x32xf32> to vector<8x32xf32>
    %118 = arith.mulf %116, %117 : vector<8x32xf32>
    %119 = vector.broadcast %100 : vector<1x32xf32> to vector<8x32xf32>
    %120 = arith.addf %118, %119 : vector<8x32xf32>
    %c0_51 = arith.constant 0 : index
    %c0_52 = arith.constant 0 : index
    %c0_53 = arith.constant 0 : index
    %121 = vector.load %arg11[%c0_51, %c0_52, %c0_53] : memref<1x8x32xf32, #tpu.memory_space<vmem>>, vector<1x8x32xf32>
    %122 = vector.shape_cast %121 : vector<1x8x32xf32> to vector<8x32xf32>
    %123 = vector.shape_cast %120 : vector<8x32xf32> to vector<1x8x32xf32>
    tpu.vector_store %arg11[%c0_51, %c0_52, %c0_53], %123 {strides = array<i32>} : memref<1x8x32xf32, #tpu.memory_space<vmem>>, vector<1x8x32xf32>,
    return
  }
  func.func @transform_0(%arg0: i32) -> (i32, i32, i32) {
    %c0_i32 = arith.constant 0 : i32
    %c0_i32_0 = arith.constant 0 : i32
    %c0_i32_1 = arith.constant 0 : i32
    return %arg0, %c0_i32, %c0_i32_0 : i32, i32, i32
  }
  func.func @transform_1(%arg0: i32) -> (i32, i32, i32) {
    %c0_i32 = arith.constant 0 : i32
    %c0_i32_0 = arith.constant 0 : i32
    %c0_i32_1 = arith.constant 0 : i32
    return %arg0, %c0_i32, %c0_i32_0 : i32, i32, i32
  }
  func.func @transform_2(%arg0: i32) -> (i32, i32) {
    %c0_i32 = arith.constant 0 : i32
    %c0_i32_0 = arith.constant 0 : i32
    %c0_i32_1 = arith.constant 0 : i32
    return %c0_i32, %c0_i32_0 : i32, i32
  }
  func.func @transform_3(%arg0: i32) -> (i32, i32) {
    %c0_i32 = arith.constant 0 : i32
    %c0_i32_0 = arith.constant 0 : i32
    %c0_i32_1 = arith.constant 0 : i32
    return %c0_i32, %c0_i32_0 : i32, i32
  }
  func.func @transform_4(%arg0: i32) -> (i32, i32) {
    %c0_i32 = arith.constant 0 : i32
    %c0_i32_0 = arith.constant 0 : i32
    %c0_i32_1 = arith.constant 0 : i32
    return %c0_i32, %c0_i32_0 : i32, i32
  }
  func.func @transform_5(%arg0: i32) -> (i32, i32) {
    %c0_i32 = arith.constant 0 : i32
    %c0_i32_0 = arith.constant 0 : i32
    %c0_i32_1 = arith.constant 0 : i32
    return %c0_i32, %c0_i32_0 : i32, i32
  }
  func.func @transform_6(%arg0: i32) -> (i32, i32) {
    %c0_i32 = arith.constant 0 : i32
    %c0_i32_0 = arith.constant 0 : i32
    %c0_i32_1 = arith.constant 0 : i32
    return %c0_i32, %c0_i32_0 : i32, i32
  }
  func.func @transform_7(%arg0: i32) -> (i32, i32) {
    %c0_i32 = arith.constant 0 : i32
    %c0_i32_0 = arith.constant 0 : i32
    %c0_i32_1 = arith.constant 0 : i32
    return %c0_i32, %c0_i32_0 : i32, i32
  }
  func.func @transform_8(%arg0: i32) -> (i32, i32) {
    %c0_i32 = arith.constant 0 : i32
    %c0_i32_0 = arith.constant 0 : i32
    %c0_i32_1 = arith.constant 0 : i32
    return %c0_i32, %c0_i32_0 : i32, i32
  }
  func.func @transform_9(%arg0: i32) -> (i32, i32) {
    %c0_i32 = arith.constant 0 : i32
    %c0_i32_0 = arith.constant 0 : i32
    %c0_i32_1 = arith.constant 0 : i32
    return %c0_i32, %c0_i32_0 : i32, i32
  }
  func.func @transform_10(%arg0: i32) -> (i32, i32, i32) {
    %c0_i32 = arith.constant 0 : i32
    %c0_i32_0 = arith.constant 0 : i32
    %c0_i32_1 = arith.constant 0 : i32
    return %arg0, %c0_i32, %c0_i32_0 : i32, i32, i32
  }
}

module attributes {stable_mosaic.version = 11 : i64} {
  func.func @_linear_kernel(%arg0: i32, %arg1: memref<16x32xf32, #tpu.memory_space<vmem>>, %arg2: memref<32x48xf32, #tpu.memory_space<vmem>>, %arg3: memref<1x48xf32, #tpu.memory_space<vmem>>, %arg4: memref<16x48xf32, #tpu.memory_space<vmem>>) attributes {dimension_semantics = [#tpu.dimension_semantics<parallel>], iteration_bounds = array<i64: 1>, scalar_prefetch = 0 : i64, scratch_operands = 0 : i64, tpu.core_type = #tpu.core_type<tc>, window_params = [{transform_indices = @transform_0, window_bounds = array<i64: 16, 32>}, {pipeline_mode = #tpu.pipeline_mode<synchronous>, transform_indices = @transform_1, window_bounds = array<i64: 32, 48>}, {pipeline_mode = #tpu.pipeline_mode<synchronous>, transform_indices = @transform_2, window_bounds = array<i64: 1, 48>}, {transform_indices = @transform_3, window_bounds = array<i64: 16, 48>}]} {
    %c0 = arith.constant 0 : index
    %c0_0 = arith.constant 0 : index
    %0 = vector.load %arg1[%c0, %c0_0] : memref<16x32xf32, #tpu.memory_space<vmem>>, vector<16x32xf32>
    %c0_1 = arith.constant 0 : index
    %c0_2 = arith.constant 0 : index
    %1 = vector.load %arg2[%c0_1, %c0_2] : memref<32x48xf32, #tpu.memory_space<vmem>>, vector<32x48xf32>
    %cst = arith.constant dense<0.000000e+00> : vector<16x48xf32>
    %2 = tpu.matmul %0, %1, %cst {dimension_numbers = #tpu.dot_dimension_numbers<[1], [0], [0], [1], [0, 0, 1, 1], [], []>} : vector<16x32xf32>, vector<32x48xf32>, vector<16x48xf32> -> vector<16x48xf32>
    %c0_3 = arith.constant 0 : index
    %c0_4 = arith.constant 0 : index
    %3 = vector.load %arg3[%c0_3, %c0_4] : memref<1x48xf32, #tpu.memory_space<vmem>>, vector<1x48xf32>
    %4 = vector.broadcast %3 : vector<1x48xf32> to vector<16x48xf32>
    %5 = arith.addf %2, %4 : vector<16x48xf32>
    %c0_5 = arith.constant 0 : index
    %c0_6 = arith.constant 0 : index
    %6 = vector.load %arg4[%c0_5, %c0_6] : memref<16x48xf32, #tpu.memory_space<vmem>>, vector<16x48xf32>
    tpu.vector_store %arg4[%c0_5, %c0_6], %5 {strides = array<i32>} : memref<16x48xf32, #tpu.memory_space<vmem>>, vector<16x48xf32>,
    return
  }
  func.func @transform_0(%arg0: i32) -> (i32, i32) {
    %c0_i32 = arith.constant 0 : i32
    %c0_i32_0 = arith.constant 0 : i32
    return %arg0, %c0_i32 : i32, i32
  }
  func.func @transform_1(%arg0: i32) -> (i32, i32) {
    %c0_i32 = arith.constant 0 : i32
    %c0_i32_0 = arith.constant 0 : i32
    %c0_i32_1 = arith.constant 0 : i32
    return %c0_i32, %c0_i32_0 : i32, i32
  }
  func.func @transform_2(%arg0: i32) -> (i32, i32) {
    %c0_i32 = arith.constant 0 : i32
    %c0_i32_0 = arith.constant 0 : i32
    %c0_i32_1 = arith.constant 0 : i32
    return %c0_i32, %c0_i32_0 : i32, i32
  }
  func.func @transform_3(%arg0: i32) -> (i32, i32) {
    %c0_i32 = arith.constant 0 : i32
    %c0_i32_0 = arith.constant 0 : i32
    return %arg0, %c0_i32 : i32, i32
  }
}

module attributes {stable_mosaic.version = 11 : i64} {
  func.func @_deform_combine_kernel(%arg0: i32, %arg1: memref<1x4x8x80xf32, #tpu.memory_space<vmem>>, %arg2: memref<1x4x80x8xf32, #tpu.memory_space<vmem>>, %arg3: memref<32x32xf32, #tpu.memory_space<vmem>>, %arg4: memref<1x32xf32, #tpu.memory_space<vmem>>, %arg5: memref<1x8x32xf32, #tpu.memory_space<vmem>>, %arg6: memref<1x32xf32, #tpu.memory_space<vmem>>, %arg7: memref<1x32xf32, #tpu.memory_space<vmem>>, %arg8: memref<1x8x32xf32, #tpu.memory_space<vmem>>) attributes {dimension_semantics = [#tpu.dimension_semantics<parallel>], iteration_bounds = array<i64: 2>, scalar_prefetch = 0 : i64, scratch_operands = 0 : i64, tpu.core_type = #tpu.core_type<tc>, window_params = [{transform_indices = @transform_0, window_bounds = array<i64: 1, 4, 8, 80>}, {transform_indices = @transform_1, window_bounds = array<i64: 1, 4, 80, 8>}, {pipeline_mode = #tpu.pipeline_mode<synchronous>, transform_indices = @transform_2, window_bounds = array<i64: 32, 32>}, {pipeline_mode = #tpu.pipeline_mode<synchronous>, transform_indices = @transform_3, window_bounds = array<i64: 1, 32>}, {transform_indices = @transform_4, window_bounds = array<i64: 1, 8, 32>}, {pipeline_mode = #tpu.pipeline_mode<synchronous>, transform_indices = @transform_5, window_bounds = array<i64: 1, 32>}, {pipeline_mode = #tpu.pipeline_mode<synchronous>, transform_indices = @transform_6, window_bounds = array<i64: 1, 32>}, {transform_indices = @transform_7, window_bounds = array<i64: 1, 8, 32>}]} {
    %c0 = arith.constant 0 : index
    %c0_0 = arith.constant 0 : index
    %c0_1 = arith.constant 0 : index
    %c0_2 = arith.constant 0 : index
    %0 = vector.load %arg1[%c0, %c0_0, %c0_1, %c0_2] : memref<1x4x8x80xf32, #tpu.memory_space<vmem>>, vector<1x4x8x80xf32>
    %1 = vector.shape_cast %0 : vector<1x4x8x80xf32> to vector<4x8x80xf32>
    %c0_3 = arith.constant 0 : index
    %c0_4 = arith.constant 0 : index
    %c0_5 = arith.constant 0 : index
    %c0_6 = arith.constant 0 : index
    %2 = vector.load %arg2[%c0_3, %c0_4, %c0_5, %c0_6] : memref<1x4x80x8xf32, #tpu.memory_space<vmem>>, vector<1x4x80x8xf32>
    %3 = vector.shape_cast %2 : vector<1x4x80x8xf32> to vector<4x80x8xf32>
    %c0_7 = arith.constant 0 : index
    %c0_8 = arith.constant 0 : index
    %4 = vector.load %arg3[%c0_7, %c0_8] : memref<32x32xf32, #tpu.memory_space<vmem>>, vector<32x32xf32>
    %c0_9 = arith.constant 0 : index
    %c0_10 = arith.constant 0 : index
    %c0_11 = arith.constant 0 : index
    %5 = vector.load %arg5[%c0_9, %c0_10, %c0_11] : memref<1x8x32xf32, #tpu.memory_space<vmem>>, vector<1x8x32xf32>
    %6 = vector.shape_cast %5 : vector<1x8x32xf32> to vector<8x32xf32>
    %c0_12 = arith.constant 0 : index
    %c0_13 = arith.constant 0 : index
    %7 = vector.load %arg4[%c0_12, %c0_13] : memref<1x32xf32, #tpu.memory_space<vmem>>, vector<1x32xf32>
    %8 = vector.broadcast %7 : vector<1x32xf32> to vector<8x32xf32>
    %9 = arith.addf %6, %8 : vector<8x32xf32>
    %10 = vector.extract_strided_slice %4 {offsets = [0, 0], sizes = [8, 32], strides = [1, 1]} : vector<32x32xf32> to vector<8x32xf32>
    %11 = vector.extract_strided_slice %3 {offsets = [0, 0, 0], sizes = [1, 80, 8], strides = [1, 1, 1]} : vector<4x80x8xf32> to vector<1x80x8xf32>
    %12 = vector.shape_cast %11 : vector<1x80x8xf32> to vector<80x8xf32>
    %cst = arith.constant dense<0.000000e+00> : vector<80x32xf32>
    %13 = tpu.matmul %12, %10, %cst {dimension_numbers = #tpu.dot_dimension_numbers<[1], [0], [0], [1], [0, 0, 1, 1], [], []>} : vector<80x8xf32>, vector<8x32xf32>, vector<80x32xf32> -> vector<80x32xf32>
    %14 = vector.extract_strided_slice %1 {offsets = [0, 0, 0], sizes = [1, 8, 80], strides = [1, 1, 1]} : vector<4x8x80xf32> to vector<1x8x80xf32>
    %15 = vector.shape_cast %14 : vector<1x8x80xf32> to vector<8x80xf32>
    %cst_14 = arith.constant dense<0.000000e+00> : vector<8x32xf32>
    %16 = tpu.matmul %15, %13, %cst_14 {dimension_numbers = #tpu.dot_dimension_numbers<[1], [0], [0], [1], [0, 0, 1, 1], [], []>} : vector<8x80xf32>, vector<80x32xf32>, vector<8x32xf32> -> vector<8x32xf32>
    %17 = arith.addf %9, %16 : vector<8x32xf32>
    %18 = vector.extract_strided_slice %4 {offsets = [8, 0], sizes = [8, 32], strides = [1, 1]} : vector<32x32xf32> to vector<8x32xf32>
    %19 = vector.extract_strided_slice %3 {offsets = [1, 0, 0], sizes = [1, 80, 8], strides = [1, 1, 1]} : vector<4x80x8xf32> to vector<1x80x8xf32>
    %20 = vector.shape_cast %19 : vector<1x80x8xf32> to vector<80x8xf32>
    %cst_15 = arith.constant dense<0.000000e+00> : vector<80x32xf32>
    %21 = tpu.matmul %20, %18, %cst_15 {dimension_numbers = #tpu.dot_dimension_numbers<[1], [0], [0], [1], [0, 0, 1, 1], [], []>} : vector<80x8xf32>, vector<8x32xf32>, vector<80x32xf32> -> vector<80x32xf32>
    %22 = vector.extract_strided_slice %1 {offsets = [1, 0, 0], sizes = [1, 8, 80], strides = [1, 1, 1]} : vector<4x8x80xf32> to vector<1x8x80xf32>
    %23 = vector.shape_cast %22 : vector<1x8x80xf32> to vector<8x80xf32>
    %cst_16 = arith.constant dense<0.000000e+00> : vector<8x32xf32>
    %24 = tpu.matmul %23, %21, %cst_16 {dimension_numbers = #tpu.dot_dimension_numbers<[1], [0], [0], [1], [0, 0, 1, 1], [], []>} : vector<8x80xf32>, vector<80x32xf32>, vector<8x32xf32> -> vector<8x32xf32>
    %25 = arith.addf %17, %24 : vector<8x32xf32>
    %26 = vector.extract_strided_slice %4 {offsets = [16, 0], sizes = [8, 32], strides = [1, 1]} : vector<32x32xf32> to vector<8x32xf32>
    %27 = vector.extract_strided_slice %3 {offsets = [2, 0, 0], sizes = [1, 80, 8], strides = [1, 1, 1]} : vector<4x80x8xf32> to vector<1x80x8xf32>
    %28 = vector.shape_cast %27 : vector<1x80x8xf32> to vector<80x8xf32>
    %cst_17 = arith.constant dense<0.000000e+00> : vector<80x32xf32>
    %29 = tpu.matmul %28, %26, %cst_17 {dimension_numbers = #tpu.dot_dimension_numbers<[1], [0], [0], [1], [0, 0, 1, 1], [], []>} : vector<80x8xf32>, vector<8x32xf32>, vector<80x32xf32> -> vector<80x32xf32>
    %30 = vector.extract_strided_slice %1 {offsets = [2, 0, 0], sizes = [1, 8, 80], strides = [1, 1, 1]} : vector<4x8x80xf32> to vector<1x8x80xf32>
    %31 = vector.shape_cast %30 : vector<1x8x80xf32> to vector<8x80xf32>
    %cst_18 = arith.constant dense<0.000000e+00> : vector<8x32xf32>
    %32 = tpu.matmul %31, %29, %cst_18 {dimension_numbers = #tpu.dot_dimension_numbers<[1], [0], [0], [1], [0, 0, 1, 1], [], []>} : vector<8x80xf32>, vector<80x32xf32>, vector<8x32xf32> -> vector<8x32xf32>
    %33 = arith.addf %25, %32 : vector<8x32xf32>
    %34 = vector.extract_strided_slice %4 {offsets = [24, 0], sizes = [8, 32], strides = [1, 1]} : vector<32x32xf32> to vector<8x32xf32>
    %35 = vector.extract_strided_slice %3 {offsets = [3, 0, 0], sizes = [1, 80, 8], strides = [1, 1, 1]} : vector<4x80x8xf32> to vector<1x80x8xf32>
    %36 = vector.shape_cast %35 : vector<1x80x8xf32> to vector<80x8xf32>
    %cst_19 = arith.constant dense<0.000000e+00> : vector<80x32xf32>
    %37 = tpu.matmul %36, %34, %cst_19 {dimension_numbers = #tpu.dot_dimension_numbers<[1], [0], [0], [1], [0, 0, 1, 1], [], []>} : vector<80x8xf32>, vector<8x32xf32>, vector<80x32xf32> -> vector<80x32xf32>
    %38 = vector.extract_strided_slice %1 {offsets = [3, 0, 0], sizes = [1, 8, 80], strides = [1, 1, 1]} : vector<4x8x80xf32> to vector<1x8x80xf32>
    %39 = vector.shape_cast %38 : vector<1x8x80xf32> to vector<8x80xf32>
    %cst_20 = arith.constant dense<0.000000e+00> : vector<8x32xf32>
    %40 = tpu.matmul %39, %37, %cst_20 {dimension_numbers = #tpu.dot_dimension_numbers<[1], [0], [0], [1], [0, 0, 1, 1], [], []>} : vector<8x80xf32>, vector<80x32xf32>, vector<8x32xf32> -> vector<8x32xf32>
    %41 = arith.addf %33, %40 : vector<8x32xf32>
    %c0_21 = arith.constant 0 : index
    %c0_22 = arith.constant 0 : index
    %42 = vector.load %arg6[%c0_21, %c0_22] : memref<1x32xf32, #tpu.memory_space<vmem>>, vector<1x32xf32>
    %c0_23 = arith.constant 0 : index
    %c0_24 = arith.constant 0 : index
    %43 = vector.load %arg7[%c0_23, %c0_24] : memref<1x32xf32, #tpu.memory_space<vmem>>, vector<1x32xf32>
    %cst_25 = arith.constant dense<0.000000e+00> : vector<8xf32>
    %44 = vector.multi_reduction <add>, %41, %cst_25 [1] : vector<8x32xf32> to vector<8xf32>
    %45 = vector.shape_cast %44 : vector<8xf32> to vector<8x1xf32>
    %cst_26 = arith.constant 3.200000e+01 : f32
    %46 = vector.broadcast %cst_26 : f32 to vector<8x1xf32>
    %47 = arith.divf %45, %46 : vector<8x1xf32>
    %48 = vector.broadcast %47 : vector<8x1xf32> to vector<8x32xf32>
    %49 = arith.subf %41, %48 : vector<8x32xf32>
    %50 = arith.mulf %49, %49 : vector<8x32xf32>
    %cst_27 = arith.constant dense<0.000000e+00> : vector<8xf32>
    %51 = vector.multi_reduction <add>, %50, %cst_27 [1] : vector<8x32xf32> to vector<8xf32>
    %52 = vector.shape_cast %51 : vector<8xf32> to vector<8x1xf32>
    %cst_28 = arith.constant 3.200000e+01 : f32
    %53 = vector.broadcast %cst_28 : f32 to vector<8x1xf32>
    %54 = arith.divf %52, %53 : vector<8x1xf32>
    %cst_29 = arith.constant 9.99999974E-6 : f32
    %55 = vector.broadcast %cst_29 : f32 to vector<8x1xf32>
    %56 = arith.addf %54, %55 : vector<8x1xf32>
    %57 = math.rsqrt %56 : vector<8x1xf32>
    %58 = vector.broadcast %57 : vector<8x1xf32> to vector<8x32xf32>
    %59 = arith.mulf %49, %58 : vector<8x32xf32>
    %60 = vector.broadcast %42 : vector<1x32xf32> to vector<8x32xf32>
    %61 = arith.mulf %59, %60 : vector<8x32xf32>
    %62 = vector.broadcast %43 : vector<1x32xf32> to vector<8x32xf32>
    %63 = arith.addf %61, %62 : vector<8x32xf32>
    %c0_30 = arith.constant 0 : index
    %c0_31 = arith.constant 0 : index
    %c0_32 = arith.constant 0 : index
    %64 = vector.load %arg8[%c0_30, %c0_31, %c0_32] : memref<1x8x32xf32, #tpu.memory_space<vmem>>, vector<1x8x32xf32>
    %65 = vector.shape_cast %64 : vector<1x8x32xf32> to vector<8x32xf32>
    %66 = vector.shape_cast %63 : vector<8x32xf32> to vector<1x8x32xf32>
    tpu.vector_store %arg8[%c0_30, %c0_31, %c0_32], %66 {strides = array<i32>} : memref<1x8x32xf32, #tpu.memory_space<vmem>>, vector<1x8x32xf32>,
    return
  }
  func.func @transform_0(%arg0: i32) -> (i32, i32, i32, i32) {
    %c0_i32 = arith.constant 0 : i32
    %c0_i32_0 = arith.constant 0 : i32
    %c0_i32_1 = arith.constant 0 : i32
    %c0_i32_2 = arith.constant 0 : i32
    return %arg0, %c0_i32, %c0_i32_0, %c0_i32_1 : i32, i32, i32, i32
  }
  func.func @transform_1(%arg0: i32) -> (i32, i32, i32, i32) {
    %c0_i32 = arith.constant 0 : i32
    %c0_i32_0 = arith.constant 0 : i32
    %c0_i32_1 = arith.constant 0 : i32
    %c0_i32_2 = arith.constant 0 : i32
    return %arg0, %c0_i32, %c0_i32_0, %c0_i32_1 : i32, i32, i32, i32
  }
  func.func @transform_2(%arg0: i32) -> (i32, i32) {
    %c0_i32 = arith.constant 0 : i32
    %c0_i32_0 = arith.constant 0 : i32
    %c0_i32_1 = arith.constant 0 : i32
    return %c0_i32, %c0_i32_0 : i32, i32
  }
  func.func @transform_3(%arg0: i32) -> (i32, i32) {
    %c0_i32 = arith.constant 0 : i32
    %c0_i32_0 = arith.constant 0 : i32
    %c0_i32_1 = arith.constant 0 : i32
    return %c0_i32, %c0_i32_0 : i32, i32
  }
  func.func @transform_4(%arg0: i32) -> (i32, i32, i32) {
    %c0_i32 = arith.constant 0 : i32
    %c0_i32_0 = arith.constant 0 : i32
    %c0_i32_1 = arith.constant 0 : i32
    return %arg0, %c0_i32, %c0_i32_0 : i32, i32, i32
  }
  func.func @transform_5(%arg0: i32) -> (i32, i32) {
    %c0_i32 = arith.constant 0 : i32
    %c0_i32_0 = arith.constant 0 : i32
    %c0_i32_1 = arith.constant 0 : i32
    return %c0_i32, %c0_i32_0 : i32, i32
  }
  func.func @transform_6(%arg0: i32) -> (i32, i32) {
    %c0_i32 = arith.constant 0 : i32
    %c0_i32_0 = arith.constant 0 : i32
    %c0_i32_1 = arith.constant 0 : i32
    return %c0_i32, %c0_i32_0 : i32, i32
  }
  func.func @transform_7(%arg0: i32) -> (i32, i32, i32) {
    %c0_i32 = arith.constant 0 : i32
    %c0_i32_0 = arith.constant 0 : i32
    %c0_i32_1 = arith.constant 0 : i32
    return %arg0, %c0_i32, %c0_i32_0 : i32, i32, i32
  }
}

module attributes {stable_mosaic.version = 11 : i64} {
  func.func @_ffn_ln_kernel(%arg0: i32, %arg1: memref<16x32xf32, #tpu.memory_space<vmem>>, %arg2: memref<32x64xf32, #tpu.memory_space<vmem>>, %arg3: memref<1x64xf32, #tpu.memory_space<vmem>>, %arg4: memref<64x32xf32, #tpu.memory_space<vmem>>, %arg5: memref<1x32xf32, #tpu.memory_space<vmem>>, %arg6: memref<1x32xf32, #tpu.memory_space<vmem>>, %arg7: memref<1x32xf32, #tpu.memory_space<vmem>>, %arg8: memref<16x32xf32, #tpu.memory_space<vmem>>) attributes {dimension_semantics = [#tpu.dimension_semantics<parallel>], iteration_bounds = array<i64: 1>, scalar_prefetch = 0 : i64, scratch_operands = 0 : i64, tpu.core_type = #tpu.core_type<tc>, window_params = [{transform_indices = @transform_0, window_bounds = array<i64: 16, 32>}, {pipeline_mode = #tpu.pipeline_mode<synchronous>, transform_indices = @transform_1, window_bounds = array<i64: 32, 64>}, {pipeline_mode = #tpu.pipeline_mode<synchronous>, transform_indices = @transform_2, window_bounds = array<i64: 1, 64>}, {pipeline_mode = #tpu.pipeline_mode<synchronous>, transform_indices = @transform_3, window_bounds = array<i64: 64, 32>}, {pipeline_mode = #tpu.pipeline_mode<synchronous>, transform_indices = @transform_4, window_bounds = array<i64: 1, 32>}, {pipeline_mode = #tpu.pipeline_mode<synchronous>, transform_indices = @transform_5, window_bounds = array<i64: 1, 32>}, {pipeline_mode = #tpu.pipeline_mode<synchronous>, transform_indices = @transform_6, window_bounds = array<i64: 1, 32>}, {transform_indices = @transform_7, window_bounds = array<i64: 16, 32>}]} {
    %c0 = arith.constant 0 : index
    %c0_0 = arith.constant 0 : index
    %0 = vector.load %arg1[%c0, %c0_0] : memref<16x32xf32, #tpu.memory_space<vmem>>, vector<16x32xf32>
    %c0_1 = arith.constant 0 : index
    %c0_2 = arith.constant 0 : index
    %1 = vector.load %arg2[%c0_1, %c0_2] : memref<32x64xf32, #tpu.memory_space<vmem>>, vector<32x64xf32>
    %cst = arith.constant dense<0.000000e+00> : vector<16x64xf32>
    %2 = tpu.matmul %0, %1, %cst {dimension_numbers = #tpu.dot_dimension_numbers<[1], [0], [0], [1], [0, 0, 1, 1], [], []>} : vector<16x32xf32>, vector<32x64xf32>, vector<16x64xf32> -> vector<16x64xf32>
    %c0_3 = arith.constant 0 : index
    %c0_4 = arith.constant 0 : index
    %3 = vector.load %arg3[%c0_3, %c0_4] : memref<1x64xf32, #tpu.memory_space<vmem>>, vector<1x64xf32>
    %4 = vector.broadcast %3 : vector<1x64xf32> to vector<16x64xf32>
    %5 = arith.addf %2, %4 : vector<16x64xf32>
    %cst_5 = arith.constant 0.000000e+00 : f32
    %6 = vector.broadcast %cst_5 : f32 to vector<16x64xf32>
    %7 = arith.maximumf %5, %6 : vector<16x64xf32>
    %c0_6 = arith.constant 0 : index
    %c0_7 = arith.constant 0 : index
    %8 = vector.load %arg4[%c0_6, %c0_7] : memref<64x32xf32, #tpu.memory_space<vmem>>, vector<64x32xf32>
    %cst_8 = arith.constant dense<0.000000e+00> : vector<16x32xf32>
    %9 = tpu.matmul %7, %8, %cst_8 {dimension_numbers = #tpu.dot_dimension_numbers<[1], [0], [0], [1], [0, 0, 1, 1], [], []>} : vector<16x64xf32>, vector<64x32xf32>, vector<16x32xf32> -> vector<16x32xf32>
    %10 = arith.addf %0, %9 : vector<16x32xf32>
    %c0_9 = arith.constant 0 : index
    %c0_10 = arith.constant 0 : index
    %11 = vector.load %arg5[%c0_9, %c0_10] : memref<1x32xf32, #tpu.memory_space<vmem>>, vector<1x32xf32>
    %12 = vector.broadcast %11 : vector<1x32xf32> to vector<16x32xf32>
    %13 = arith.addf %10, %12 : vector<16x32xf32>
    %c0_11 = arith.constant 0 : index
    %c0_12 = arith.constant 0 : index
    %14 = vector.load %arg6[%c0_11, %c0_12] : memref<1x32xf32, #tpu.memory_space<vmem>>, vector<1x32xf32>
    %c0_13 = arith.constant 0 : index
    %c0_14 = arith.constant 0 : index
    %15 = vector.load %arg7[%c0_13, %c0_14] : memref<1x32xf32, #tpu.memory_space<vmem>>, vector<1x32xf32>
    %cst_15 = arith.constant dense<0.000000e+00> : vector<16xf32>
    %16 = vector.multi_reduction <add>, %13, %cst_15 [1] : vector<16x32xf32> to vector<16xf32>
    %17 = vector.shape_cast %16 : vector<16xf32> to vector<16x1xf32>
    %cst_16 = arith.constant 3.200000e+01 : f32
    %18 = vector.broadcast %cst_16 : f32 to vector<16x1xf32>
    %19 = arith.divf %17, %18 : vector<16x1xf32>
    %20 = vector.broadcast %19 : vector<16x1xf32> to vector<16x32xf32>
    %21 = arith.subf %13, %20 : vector<16x32xf32>
    %22 = arith.mulf %21, %21 : vector<16x32xf32>
    %cst_17 = arith.constant dense<0.000000e+00> : vector<16xf32>
    %23 = vector.multi_reduction <add>, %22, %cst_17 [1] : vector<16x32xf32> to vector<16xf32>
    %24 = vector.shape_cast %23 : vector<16xf32> to vector<16x1xf32>
    %cst_18 = arith.constant 3.200000e+01 : f32
    %25 = vector.broadcast %cst_18 : f32 to vector<16x1xf32>
    %26 = arith.divf %24, %25 : vector<16x1xf32>
    %cst_19 = arith.constant 9.99999974E-6 : f32
    %27 = vector.broadcast %cst_19 : f32 to vector<16x1xf32>
    %28 = arith.addf %26, %27 : vector<16x1xf32>
    %29 = math.rsqrt %28 : vector<16x1xf32>
    %30 = vector.broadcast %29 : vector<16x1xf32> to vector<16x32xf32>
    %31 = arith.mulf %21, %30 : vector<16x32xf32>
    %32 = vector.broadcast %14 : vector<1x32xf32> to vector<16x32xf32>
    %33 = arith.mulf %31, %32 : vector<16x32xf32>
    %34 = vector.broadcast %15 : vector<1x32xf32> to vector<16x32xf32>
    %35 = arith.addf %33, %34 : vector<16x32xf32>
    %c0_20 = arith.constant 0 : index
    %c0_21 = arith.constant 0 : index
    %36 = vector.load %arg8[%c0_20, %c0_21] : memref<16x32xf32, #tpu.memory_space<vmem>>, vector<16x32xf32>
    tpu.vector_store %arg8[%c0_20, %c0_21], %35 {strides = array<i32>} : memref<16x32xf32, #tpu.memory_space<vmem>>, vector<16x32xf32>,
    return
  }
  func.func @transform_0(%arg0: i32) -> (i32, i32) {
    %c0_i32 = arith.constant 0 : i32
    %c0_i32_0 = arith.constant 0 : i32
    return %arg0, %c0_i32 : i32, i32
  }
  func.func @transform_1(%arg0: i32) -> (i32, i32) {
    %c0_i32 = arith.constant 0 : i32
    %c0_i32_0 = arith.constant 0 : i32
    %c0_i32_1 = arith.constant 0 : i32
    return %c0_i32, %c0_i32_0 : i32, i32
  }
  func.func @transform_2(%arg0: i32) -> (i32, i32) {
    %c0_i32 = arith.constant 0 : i32
    %c0_i32_0 = arith.constant 0 : i32
    %c0_i32_1 = arith.constant 0 : i32
    return %c0_i32, %c0_i32_0 : i32, i32
  }
  func.func @transform_3(%arg0: i32) -> (i32, i32) {
    %c0_i32 = arith.constant 0 : i32
    %c0_i32_0 = arith.constant 0 : i32
    %c0_i32_1 = arith.constant 0 : i32
    return %c0_i32, %c0_i32_0 : i32, i32
  }
  func.func @transform_4(%arg0: i32) -> (i32, i32) {
    %c0_i32 = arith.constant 0 : i32
    %c0_i32_0 = arith.constant 0 : i32
    %c0_i32_1 = arith.constant 0 : i32
    return %c0_i32, %c0_i32_0 : i32, i32
  }
  func.func @transform_5(%arg0: i32) -> (i32, i32) {
    %c0_i32 = arith.constant 0 : i32
    %c0_i32_0 = arith.constant 0 : i32
    %c0_i32_1 = arith.constant 0 : i32
    return %c0_i32, %c0_i32_0 : i32, i32
  }
  func.func @transform_6(%arg0: i32) -> (i32, i32) {
    %c0_i32 = arith.constant 0 : i32
    %c0_i32_0 = arith.constant 0 : i32
    %c0_i32_1 = arith.constant 0 : i32
    return %c0_i32, %c0_i32_0 : i32, i32
  }
  func.func @transform_7(%arg0: i32) -> (i32, i32) {
    %c0_i32 = arith.constant 0 : i32
    %c0_i32_0 = arith.constant 0 : i32
    return %arg0, %c0_i32 : i32, i32
  }
}

module attributes {stable_mosaic.version = 11 : i64} {
  func.func @_ffn_ln_kernel(%arg0: i32, %arg1: memref<16x32xf32, #tpu.memory_space<vmem>>, %arg2: memref<32x64xf32, #tpu.memory_space<vmem>>, %arg3: memref<1x64xf32, #tpu.memory_space<vmem>>, %arg4: memref<64x32xf32, #tpu.memory_space<vmem>>, %arg5: memref<1x32xf32, #tpu.memory_space<vmem>>, %arg6: memref<1x32xf32, #tpu.memory_space<vmem>>, %arg7: memref<1x32xf32, #tpu.memory_space<vmem>>, %arg8: memref<16x32xf32, #tpu.memory_space<vmem>>) attributes {dimension_semantics = [#tpu.dimension_semantics<parallel>], iteration_bounds = array<i64: 1>, scalar_prefetch = 0 : i64, scratch_operands = 0 : i64, tpu.core_type = #tpu.core_type<tc>, window_params = [{transform_indices = @transform_0, window_bounds = array<i64: 16, 32>}, {pipeline_mode = #tpu.pipeline_mode<synchronous>, transform_indices = @transform_1, window_bounds = array<i64: 32, 64>}, {pipeline_mode = #tpu.pipeline_mode<synchronous>, transform_indices = @transform_2, window_bounds = array<i64: 1, 64>}, {pipeline_mode = #tpu.pipeline_mode<synchronous>, transform_indices = @transform_3, window_bounds = array<i64: 64, 32>}, {pipeline_mode = #tpu.pipeline_mode<synchronous>, transform_indices = @transform_4, window_bounds = array<i64: 1, 32>}, {pipeline_mode = #tpu.pipeline_mode<synchronous>, transform_indices = @transform_5, window_bounds = array<i64: 1, 32>}, {pipeline_mode = #tpu.pipeline_mode<synchronous>, transform_indices = @transform_6, window_bounds = array<i64: 1, 32>}, {transform_indices = @transform_7, window_bounds = array<i64: 16, 32>}]} {
    %c0 = arith.constant 0 : index
    %c0_0 = arith.constant 0 : index
    %0 = vector.load %arg1[%c0, %c0_0] : memref<16x32xf32, #tpu.memory_space<vmem>>, vector<16x32xf32>
    %c0_1 = arith.constant 0 : index
    %c0_2 = arith.constant 0 : index
    %1 = vector.load %arg2[%c0_1, %c0_2] : memref<32x64xf32, #tpu.memory_space<vmem>>, vector<32x64xf32>
    %cst = arith.constant dense<0.000000e+00> : vector<16x64xf32>
    %2 = tpu.matmul %0, %1, %cst {dimension_numbers = #tpu.dot_dimension_numbers<[1], [0], [0], [1], [0, 0, 1, 1], [], []>} : vector<16x32xf32>, vector<32x64xf32>, vector<16x64xf32> -> vector<16x64xf32>
    %c0_3 = arith.constant 0 : index
    %c0_4 = arith.constant 0 : index
    %3 = vector.load %arg3[%c0_3, %c0_4] : memref<1x64xf32, #tpu.memory_space<vmem>>, vector<1x64xf32>
    %4 = vector.broadcast %3 : vector<1x64xf32> to vector<16x64xf32>
    %5 = arith.addf %2, %4 : vector<16x64xf32>
    %cst_5 = arith.constant 0.000000e+00 : f32
    %6 = vector.broadcast %cst_5 : f32 to vector<16x64xf32>
    %7 = arith.maximumf %5, %6 : vector<16x64xf32>
    %c0_6 = arith.constant 0 : index
    %c0_7 = arith.constant 0 : index
    %8 = vector.load %arg4[%c0_6, %c0_7] : memref<64x32xf32, #tpu.memory_space<vmem>>, vector<64x32xf32>
    %cst_8 = arith.constant dense<0.000000e+00> : vector<16x32xf32>
    %9 = tpu.matmul %7, %8, %cst_8 {dimension_numbers = #tpu.dot_dimension_numbers<[1], [0], [0], [1], [0, 0, 1, 1], [], []>} : vector<16x64xf32>, vector<64x32xf32>, vector<16x32xf32> -> vector<16x32xf32>
    %10 = arith.addf %0, %9 : vector<16x32xf32>
    %c0_9 = arith.constant 0 : index
    %c0_10 = arith.constant 0 : index
    %11 = vector.load %arg5[%c0_9, %c0_10] : memref<1x32xf32, #tpu.memory_space<vmem>>, vector<1x32xf32>
    %12 = vector.broadcast %11 : vector<1x32xf32> to vector<16x32xf32>
    %13 = arith.addf %10, %12 : vector<16x32xf32>
    %c0_11 = arith.constant 0 : index
    %c0_12 = arith.constant 0 : index
    %14 = vector.load %arg6[%c0_11, %c0_12] : memref<1x32xf32, #tpu.memory_space<vmem>>, vector<1x32xf32>
    %c0_13 = arith.constant 0 : index
    %c0_14 = arith.constant 0 : index
    %15 = vector.load %arg7[%c0_13, %c0_14] : memref<1x32xf32, #tpu.memory_space<vmem>>, vector<1x32xf32>
    %cst_15 = arith.constant dense<0.000000e+00> : vector<16xf32>
    %16 = vector.multi_reduction <add>, %13, %cst_15 [1] : vector<16x32xf32> to vector<16xf32>
    %17 = vector.shape_cast %16 : vector<16xf32> to vector<16x1xf32>
    %cst_16 = arith.constant 3.200000e+01 : f32
    %18 = vector.broadcast %cst_16 : f32 to vector<16x1xf32>
    %19 = arith.divf %17, %18 : vector<16x1xf32>
    %20 = vector.broadcast %19 : vector<16x1xf32> to vector<16x32xf32>
    %21 = arith.subf %13, %20 : vector<16x32xf32>
    %22 = arith.mulf %21, %21 : vector<16x32xf32>
    %cst_17 = arith.constant dense<0.000000e+00> : vector<16xf32>
    %23 = vector.multi_reduction <add>, %22, %cst_17 [1] : vector<16x32xf32> to vector<16xf32>
    %24 = vector.shape_cast %23 : vector<16xf32> to vector<16x1xf32>
    %cst_18 = arith.constant 3.200000e+01 : f32
    %25 = vector.broadcast %cst_18 : f32 to vector<16x1xf32>
    %26 = arith.divf %24, %25 : vector<16x1xf32>
    %cst_19 = arith.constant 9.99999974E-6 : f32
    %27 = vector.broadcast %cst_19 : f32 to vector<16x1xf32>
    %28 = arith.addf %26, %27 : vector<16x1xf32>
    %29 = math.rsqrt %28 : vector<16x1xf32>
    %30 = vector.broadcast %29 : vector<16x1xf32> to vector<16x32xf32>
    %31 = arith.mulf %21, %30 : vector<16x32xf32>
    %32 = vector.broadcast %14 : vector<1x32xf32> to vector<16x32xf32>
    %33 = arith.mulf %31, %32 : vector<16x32xf32>
    %34 = vector.broadcast %15 : vector<1x32xf32> to vector<16x32xf32>
    %35 = arith.addf %33, %34 : vector<16x32xf32>
    %c0_20 = arith.constant 0 : index
    %c0_21 = arith.constant 0 : index
    %36 = vector.load %arg8[%c0_20, %c0_21] : memref<16x32xf32, #tpu.memory_space<vmem>>, vector<16x32xf32>
    tpu.vector_store %arg8[%c0_20, %c0_21], %35 {strides = array<i32>} : memref<16x32xf32, #tpu.memory_space<vmem>>, vector<16x32xf32>,
    return
  }
  func.func @transform_0(%arg0: i32) -> (i32, i32) {
    %c0_i32 = arith.constant 0 : i32
    %c0_i32_0 = arith.constant 0 : i32
    return %arg0, %c0_i32 : i32, i32
  }
  func.func @transform_1(%arg0: i32) -> (i32, i32) {
    %c0_i32 = arith.constant 0 : i32
    %c0_i32_0 = arith.constant 0 : i32
    %c0_i32_1 = arith.constant 0 : i32
    return %c0_i32, %c0_i32_0 : i32, i32
  }
  func.func @transform_2(%arg0: i32) -> (i32, i32) {
    %c0_i32 = arith.constant 0 : i32
    %c0_i32_0 = arith.constant 0 : i32
    %c0_i32_1 = arith.constant 0 : i32
    return %c0_i32, %c0_i32_0 : i32, i32
  }
  func.func @transform_3(%arg0: i32) -> (i32, i32) {
    %c0_i32 = arith.constant 0 : i32
    %c0_i32_0 = arith.constant 0 : i32
    %c0_i32_1 = arith.constant 0 : i32
    return %c0_i32, %c0_i32_0 : i32, i32
  }
  func.func @transform_4(%arg0: i32) -> (i32, i32) {
    %c0_i32 = arith.constant 0 : i32
    %c0_i32_0 = arith.constant 0 : i32
    %c0_i32_1 = arith.constant 0 : i32
    return %c0_i32, %c0_i32_0 : i32, i32
  }
  func.func @transform_5(%arg0: i32) -> (i32, i32) {
    %c0_i32 = arith.constant 0 : i32
    %c0_i32_0 = arith.constant 0 : i32
    %c0_i32_1 = arith.constant 0 : i32
    return %c0_i32, %c0_i32_0 : i32, i32
  }
  func.func @transform_6(%arg0: i32) -> (i32, i32) {
    %c0_i32 = arith.constant 0 : i32
    %c0_i32_0 = arith.constant 0 : i32
    %c0_i32_1 = arith.constant 0 : i32
    return %c0_i32, %c0_i32_0 : i32, i32
  }
  func.func @transform_7(%arg0: i32) -> (i32, i32) {
    %c0_i32 = arith.constant 0 : i32
    %c0_i32_0 = arith.constant 0 : i32
    return %arg0, %c0_i32 : i32, i32
  }
}

</mosaic_0001>

<bundles_post_ra>
// kernel: deformable_transformer_forward.19
= control target key start
LH: loop header
LB: loop body
LE: loop exit
PB: predicated region body
PF: predicated region fallthrough
CT: control target
= control target key end

     0   :  { %vm45_vm0 = vcmask 261120   ;;  %vm271_vm1 = vcmask 392192   ;;  %s586_s1 = inlined_call_operand.vmem [shape: f32[32,48], index: 1, kind: input, shape index: {}]   ;;  %s587_s0 = inlined_call_operand.vmem [shape: f32[160,32], index: 0, kind: input, shape index: {}]   ;;  %s588_s2 = inlined_call_operand.vmem [shape: f32[1,48], index: 2, kind: input, shape index: {}]   ;;  %s589_s3 = inlined_call_operand.vmem [shape: f32[160,48], index: 3, kind: output, shape index: {}]  }
   0x1   :  { %v34_v0 = vld [vmem:[%s586_s1] sm:$0xff]  ;;  %v35_v1 = vld [vmem:[%s586_s1 + $0x8] sm:$0xff]  ;;  %v36_v2 = vld [vmem:[%s586_s1 + $0x10] sm:$0xff] }
   0x2   :  { %v379_v3 = vpack.c.bf16 %v35_v1, %v34_v0  ;;  %v37_v4 = vld [vmem:[%s586_s1 + $0x18] sm:$0xff]  ;;  %v14_v5 = vld [vmem:[%s587_s0] sm:$0xff]  ;;  %v24_v6 = vld [vmem:[%s587_s0 + $0x50] sm:$0xff] }
   0x3   :  { %v383_v7 = vpack.c.bf16 %v37_v4, %v36_v2  ;;  %349 = vmatprep.mubr.msk.f32.mxu0 %vm45_vm0, %v14_v5  ;;  %364 = vmatprep.mubr.msk.f32.mxu1 %vm45_vm0, %v24_v6  ;;  %v15_v8 = vld [vmem:[%s587_s0 + $0x8] sm:$0xff]  ;;  %v25_v9 = vld [vmem:[%s587_s0 + $0x58] sm:$0xff]  ;;  %v16_v10 = vld [vmem:[%s587_s0 + $0x10] sm:$0xff] }
   0x4   :  { %380 = vmatprep.subr.bf16.mxu0 %v379_v3  ;;  %387 = vmatprep.subr.bf16.mxu1 %v379_v3  ;;  %v26_v11 = vld [vmem:[%s587_s0 + $0x60] sm:$0xff]  ;;  %v17_v12 = vld [vmem:[%s587_s0 + $0x18] sm:$0xff]  ;;  %v27_v13 = vld [vmem:[%s587_s0 + $0x68] sm:$0xff] }
   0x5   :  { %382 = vmatpush3.bf16.msra.mxu0 %v379_v3  ;;  %389 = vmatpush3.bf16.msra.mxu1 %v379_v3  ;;  %v18_v14 = vld [vmem:[%s587_s0 + $0x20] sm:$0xff]  ;;  %v28_v15 = vld [vmem:[%s587_s0 + $0x70] sm:$0xff]  ;;  %v19_v16 = vld [vmem:[%s587_s0 + $0x28] sm:$0xff] }
   0x6   :  { %384 = vmatprep.subr.bf16.mxu0 %v383_v7  ;;  %388 = vmatprep.subr.bf16.mxu1 %v383_v7  ;;  %v29_v17 = vld [vmem:[%s587_s0 + $0x78] sm:$0xff]  ;;  %v20_v18 = vld [vmem:[%s587_s0 + $0x30] sm:$0xff]  ;;  %v30_v19 = vld [vmem:[%s587_s0 + $0x80] sm:$0xff] }
   0x7   :  { %v21_v20 = vld [vmem:[%s587_s0 + $0x38] sm:$0xff]  ;;  %v31_v21 = vld [vmem:[%s587_s0 + $0x88] sm:$0xff]  ;;  %v22_v22 = vld [vmem:[%s587_s0 + $0x40] sm:$0xff] }
   0x8   :  { %v32_v23 = vld [vmem:[%s587_s0 + $0x90] sm:$0xff]  ;;  %v23_v24 = vld [vmem:[%s587_s0 + $0x48] sm:$0xff]  ;;  %v33_v25 = vld [vmem:[%s587_s0 + $0x98] sm:$0xff] }
   0x9   :  { %386 = vmatpush3.bf16.msra.mxu0 %v383_v7  ;;  %390 = vmatpush3.bf16.msra.mxu1 %v383_v7  ;;  %v296_v26 = vld [vmem:[%s588_s2] ss:$0 sm:$0xff] }
   0xc   :  { %350 = vmatmul.mubr.msk.f32.vlgmr.msra.gmra.mrb[0].mxu0 %vm45_vm0, %v15_v8  ;;  %365 = vmatmul.mubr.msk.f32.vlgmr.msra.gmra.mrb[0].mxu1 %vm45_vm0, %v25_v9 }
   0xd   :  { %352 = vmatprep.mubr.msk.f32.mxu0 %vm45_vm0, %v16_v10  ;;  %367 = vmatprep.mubr.msk.f32.mxu1 %vm45_vm0, %v26_v11 }
  0x10   :  { %353 = vmatmul.mubr.msk.f32.gmra.mrb[2].mxu0 %vm45_vm0, %v17_v12  ;;  %368 = vmatmul.mubr.msk.f32.gmra.mrb[2].mxu1 %vm45_vm0, %v27_v13 }
  0x11   :  { %355 = vmatprep.mubr.msk.f32.mxu0 %vm45_vm0, %v18_v14  ;;  %370 = vmatprep.mubr.msk.f32.mxu1 %vm45_vm0, %v28_v15 }
  0x14   :  { %356 = vmatmul.mubr.msk.f32.gmra.mrb[4].mxu0 %vm45_vm0, %v19_v16  ;;  %371 = vmatmul.mubr.msk.f32.gmra.mrb[4].mxu1 %vm45_vm0, %v29_v17 }
  0x15   :  { %358 = vmatprep.mubr.msk.f32.mxu0 %vm45_vm0, %v20_v18  ;;  %373 = vmatprep.mubr.msk.f32.mxu1 %vm45_vm0, %v30_v19 }
  0x18   :  { %359 = vmatmul.mubr.msk.f32.gmra.mrb[6].mxu0 %vm45_vm0, %v21_v20  ;;  %374 = vmatmul.mubr.msk.f32.gmra.mrb[6].mxu1 %vm45_vm0, %v31_v21 }
  0x19   :  { %361 = vmatprep.mubr.msk.f32.mxu0 %vm45_vm0, %v22_v22  ;;  %376 = vmatprep.mubr.msk.f32.mxu1 %vm45_vm0, %v32_v23 }
  0x1c   :  { %362 = vmatmul.mubr.msk.f32.gmra.mrb[8].mxu0 %vm45_vm0, %v23_v24  ;;  %377 = vmatmul.mubr.msk.f32.gmra.mrb[8].mxu1 %vm45_vm0, %v33_v25 }
  0xdf   :  { %v351_v27 = vpop.f32.mrb[0].mxu0  ;;  %v366_v28 = vpop.f32.mrb[0].mxu1 }
  0xe0   :  { %v178_v29 = vadd.f32 %v351_v27, %v296_v26  ;;  %v228_v30 = vadd.f32 %v366_v28, %v296_v26  ;;  %v172_v31 = vpop.f32.mrb[1].mxu0  ;;  %v222_v32 = vpop.f32.mrb[1].mxu1 }
  0xe1   :  { %v173_v33 = vadd.f32 %v296_v26, %v172_v31  ;;  %v223_v34 = vadd.f32 %v296_v26, %v222_v32 }
  0xe2   :  { %273 = vst.msk [vmem:[%s589_s3 + $0x8] sm:$0xff] %vm271_vm1, %v178_v29  ;;  %283 = vst.msk [vmem:[%s589_s3 + $0x58] sm:$0xff] %vm271_vm1, %v228_v30 }
  0xe3   :  { %272 = vst.msk [vmem:[%s589_s3] sm:$0xff] %vm271_vm1, %v173_v33  ;;  %282 = vst.msk [vmem:[%s589_s3 + $0x50] sm:$0xff] %vm271_vm1, %v223_v34  ;;  %v354_v35 = vpop.f32.mrb[2].mxu0  ;;  %v369_v36 = vpop.f32.mrb[2].mxu1 }
  0xe4   :  { %v188_v37 = vadd.f32 %v354_v35, %v296_v26  ;;  %v238_v38 = vadd.f32 %v369_v36, %v296_v26  ;;  %v182_v39 = vpop.f32.mrb[3].mxu0  ;;  %v232_v40 = vpop.f32.mrb[3].mxu1 }
  0xe5   :  { %v183_v41 = vadd.f32 %v296_v26, %v182_v39  ;;  %v233_v42 = vadd.f32 %v296_v26, %v232_v40 }
  0xe6   :  { %275 = vst.msk [vmem:[%s589_s3 + $0x18] sm:$0xff] %vm271_vm1, %v188_v37  ;;  %285 = vst.msk [vmem:[%s589_s3 + $0x68] sm:$0xff] %vm271_vm1, %v238_v38 }
  0xe7   :  { %274 = vst.msk [vmem:[%s589_s3 + $0x10] sm:$0xff] %vm271_vm1, %v183_v41  ;;  %284 = vst.msk [vmem:[%s589_s3 + $0x60] sm:$0xff] %vm271_vm1, %v233_v42  ;;  %v357_v43 = vpop.f32.mrb[4].mxu0  ;;  %v372_v44 = vpop.f32.mrb[4].mxu1 }
  0xe8   :  { %v198_v45 = vadd.f32 %v357_v43, %v296_v26  ;;  %v248_v46 = vadd.f32 %v372_v44, %v296_v26  ;;  %v192_v47 = vpop.f32.mrb[5].mxu0  ;;  %v242_v48 = vpop.f32.mrb[5].mxu1 }
  0xe9   :  { %v193_v49 = vadd.f32 %v296_v26, %v192_v47  ;;  %v243_v50 = vadd.f32 %v296_v26, %v242_v48 }
  0xea   :  { %277 = vst.msk [vmem:[%s589_s3 + $0x28] sm:$0xff] %vm271_vm1, %v198_v45  ;;  %287 = vst.msk [vmem:[%s589_s3 + $0x78] sm:$0xff] %vm271_vm1, %v248_v46 }
  0xeb   :  { %276 = vst.msk [vmem:[%s589_s3 + $0x20] sm:$0xff] %vm271_vm1, %v193_v49  ;;  %286 = vst.msk [vmem:[%s589_s3 + $0x70] sm:$0xff] %vm271_vm1, %v243_v50  ;;  %v360_v51 = vpop.f32.mrb[6].mxu0  ;;  %v375_v52 = vpop.f32.mrb[6].mxu1 }
  0xec   :  { %v208_v53 = vadd.f32 %v360_v51, %v296_v26  ;;  %v258_v54 = vadd.f32 %v375_v52, %v296_v26  ;;  %v202_v55 = vpop.f32.mrb[7].mxu0  ;;  %v252_v56 = vpop.f32.mrb[7].mxu1 }
  0xed   :  { %v203_v57 = vadd.f32 %v296_v26, %v202_v55  ;;  %v253_v58 = vadd.f32 %v296_v26, %v252_v56 }
  0xee   :  { %279 = vst.msk [vmem:[%s589_s3 + $0x38] sm:$0xff] %vm271_vm1, %v208_v53  ;;  %289 = vst.msk [vmem:[%s589_s3 + $0x88] sm:$0xff] %vm271_vm1, %v258_v54 }
  0xef   :  { %278 = vst.msk [vmem:[%s589_s3 + $0x30] sm:$0xff] %vm271_vm1, %v203_v57  ;;  %288 = vst.msk [vmem:[%s589_s3 + $0x80] sm:$0xff] %vm271_vm1, %v253_v58  ;;  %v363_v59 = vpop.f32.mrb[8].mxu0  ;;  %v378_v60 = vpop.f32.mrb[8].mxu1 }
  0xf0   :  { %v218_v61 = vadd.f32 %v363_v59, %v296_v26  ;;  %v268_v62 = vadd.f32 %v378_v60, %v296_v26  ;;  %v212_v63 = vpop.f32.mrb[9].mxu0  ;;  %v262_v0 = vpop.f32.mrb[9].mxu1 }
  0xf1   :  { %v213_v1 = vadd.f32 %v296_v26, %v212_v63  ;;  %v263_v2 = vadd.f32 %v296_v26, %v262_v0 }
  0xf2   :  { %281 = vst.msk [vmem:[%s589_s3 + $0x48] sm:$0xff] %vm271_vm1, %v218_v61  ;;  %291 = vst.msk [vmem:[%s589_s3 + $0x98] sm:$0xff] %vm271_vm1, %v268_v62 }
  0xf3   :  { %280 = vst.msk [vmem:[%s589_s3 + $0x40] sm:$0xff] %vm271_vm1, %v213_v1  ;;  %290 = vst.msk [vmem:[%s589_s3 + $0x90] sm:$0xff] %vm271_vm1, %v263_v2 }

// kernel: deformable_transformer_forward.18
= control target key start
LH: loop header
LB: loop body
LE: loop exit
PB: predicated region body
PF: predicated region fallthrough
CT: control target
= control target key end

     0   :  { %vm45_vm0 = vcmask 261120   ;;  %s585_s1 = inlined_call_operand.vmem [shape: f32[32,32], index: 1, kind: input, shape index: {}]   ;;  %s586_s0 = inlined_call_operand.vmem [shape: f32[160,32], index: 0, kind: input, shape index: {}]   ;;  %s587_s2 = inlined_call_operand.vmem [shape: f32[1,32], index: 2, kind: input, shape index: {}]   ;;  %s588_s3 = inlined_call_operand.vmem [shape: f32[160,32], index: 3, kind: output, shape index: {}]  }
   0x1   :  { %v34_v0 = vld [vmem:[%s585_s1] sm:$0xff]  ;;  %v35_v1 = vld [vmem:[%s585_s1 + $0x8] sm:$0xff]  ;;  %v36_v2 = vld [vmem:[%s585_s1 + $0x10] sm:$0xff] }
   0x2   :  { %v378_v3 = vpack.c.bf16 %v35_v1, %v34_v0  ;;  %v37_v4 = vld [vmem:[%s585_s1 + $0x18] sm:$0xff]  ;;  %v14_v5 = vld [vmem:[%s586_s0] sm:$0xff]  ;;  %v24_v6 = vld [vmem:[%s586_s0 + $0x50] sm:$0xff] }
   0x3   :  { %v382_v7 = vpack.c.bf16 %v37_v4, %v36_v2  ;;  %348 = vmatprep.mubr.msk.f32.mxu0 %vm45_vm0, %v14_v5  ;;  %363 = vmatprep.mubr.msk.f32.mxu1 %vm45_vm0, %v24_v6  ;;  %v15_v8 = vld [vmem:[%s586_s0 + $0x8] sm:$0xff]  ;;  %v25_v9 = vld [vmem:[%s586_s0 + $0x58] sm:$0xff]  ;;  %v16_v10 = vld [vmem:[%s586_s0 + $0x10] sm:$0xff] }
   0x4   :  { %379 = vmatprep.subr.bf16.mxu0 %v378_v3  ;;  %386 = vmatprep.subr.bf16.mxu1 %v378_v3  ;;  %v26_v11 = vld [vmem:[%s586_s0 + $0x60] sm:$0xff]  ;;  %v17_v12 = vld [vmem:[%s586_s0 + $0x18] sm:$0xff]  ;;  %v27_v13 = vld [vmem:[%s586_s0 + $0x68] sm:$0xff] }
   0x5   :  { %381 = vmatpush3.bf16.msra.mxu0 %v378_v3  ;;  %388 = vmatpush3.bf16.msra.mxu1 %v378_v3  ;;  %v18_v14 = vld [vmem:[%s586_s0 + $0x20] sm:$0xff]  ;;  %v28_v15 = vld [vmem:[%s586_s0 + $0x70] sm:$0xff]  ;;  %v19_v16 = vld [vmem:[%s586_s0 + $0x28] sm:$0xff] }
   0x6   :  { %383 = vmatprep.subr.bf16.mxu0 %v382_v7  ;;  %387 = vmatprep.subr.bf16.mxu1 %v382_v7  ;;  %v29_v17 = vld [vmem:[%s586_s0 + $0x78] sm:$0xff]  ;;  %v20_v18 = vld [vmem:[%s586_s0 + $0x30] sm:$0xff]  ;;  %v30_v19 = vld [vmem:[%s586_s0 + $0x80] sm:$0xff] }
   0x7   :  { %v21_v20 = vld [vmem:[%s586_s0 + $0x38] sm:$0xff]  ;;  %v31_v21 = vld [vmem:[%s586_s0 + $0x88] sm:$0xff]  ;;  %v22_v22 = vld [vmem:[%s586_s0 + $0x40] sm:$0xff] }
   0x8   :  { %v32_v23 = vld [vmem:[%s586_s0 + $0x90] sm:$0xff]  ;;  %v23_v24 = vld [vmem:[%s586_s0 + $0x48] sm:$0xff]  ;;  %v33_v25 = vld [vmem:[%s586_s0 + $0x98] sm:$0xff] }
   0x9   :  { %385 = vmatpush3.bf16.msra.mxu0 %v382_v7  ;;  %389 = vmatpush3.bf16.msra.mxu1 %v382_v7  ;;  %v295_v26 = vld [vmem:[%s587_s2] ss:$0 sm:$0xff] }
   0xc   :  { %349 = vmatmul.mubr.msk.f32.vlgmr.msra.gmra.mrb[0].mxu0 %vm45_vm0, %v15_v8  ;;  %364 = vmatmul.mubr.msk.f32.vlgmr.msra.gmra.mrb[0].mxu1 %vm45_vm0, %v25_v9 }
   0xd   :  { %351 = vmatprep.mubr.msk.f32.mxu0 %vm45_vm0, %v16_v10  ;;  %366 = vmatprep.mubr.msk.f32.mxu1 %vm45_vm0, %v26_v11 }
  0x10   :  { %352 = vmatmul.mubr.msk.f32.gmra.mrb[2].mxu0 %vm45_vm0, %v17_v12  ;;  %367 = vmatmul.mubr.msk.f32.gmra.mrb[2].mxu1 %vm45_vm0, %v27_v13 }
  0x11   :  { %354 = vmatprep.mubr.msk.f32.mxu0 %vm45_vm0, %v18_v14  ;;  %369 = vmatprep.mubr.msk.f32.mxu1 %vm45_vm0, %v28_v15 }
  0x14   :  { %355 = vmatmul.mubr.msk.f32.gmra.mrb[4].mxu0 %vm45_vm0, %v19_v16  ;;  %370 = vmatmul.mubr.msk.f32.gmra.mrb[4].mxu1 %vm45_vm0, %v29_v17 }
  0x15   :  { %357 = vmatprep.mubr.msk.f32.mxu0 %vm45_vm0, %v20_v18  ;;  %372 = vmatprep.mubr.msk.f32.mxu1 %vm45_vm0, %v30_v19 }
  0x18   :  { %358 = vmatmul.mubr.msk.f32.gmra.mrb[6].mxu0 %vm45_vm0, %v21_v20  ;;  %373 = vmatmul.mubr.msk.f32.gmra.mrb[6].mxu1 %vm45_vm0, %v31_v21 }
  0x19   :  { %360 = vmatprep.mubr.msk.f32.mxu0 %vm45_vm0, %v22_v22  ;;  %375 = vmatprep.mubr.msk.f32.mxu1 %vm45_vm0, %v32_v23 }
  0x1c   :  { %361 = vmatmul.mubr.msk.f32.gmra.mrb[8].mxu0 %vm45_vm0, %v23_v24  ;;  %376 = vmatmul.mubr.msk.f32.gmra.mrb[8].mxu1 %vm45_vm0, %v33_v25 }
  0xdf   :  { %v350_v27 = vpop.f32.mrb[0].mxu0  ;;  %v365_v28 = vpop.f32.mrb[0].mxu1 }
  0xe0   :  { %v178_v29 = vadd.f32 %v350_v27, %v295_v26  ;;  %v228_v30 = vadd.f32 %v365_v28, %v295_v26  ;;  %v172_v31 = vpop.f32.mrb[1].mxu0  ;;  %v222_v32 = vpop.f32.mrb[1].mxu1 }
  0xe1   :  { %v173_v33 = vadd.f32 %v295_v26, %v172_v31  ;;  %v223_v34 = vadd.f32 %v295_v26, %v222_v32 }
  0xe2   :  { %272 = vst.msk [vmem:[%s588_s3 + $0x8] sm:$0xff] %vm45_vm0, %v178_v29  ;;  %282 = vst.msk [vmem:[%s588_s3 + $0x58] sm:$0xff] %vm45_vm0, %v228_v30 }
  0xe3   :  { %271 = vst.msk [vmem:[%s588_s3] sm:$0xff] %vm45_vm0, %v173_v33  ;;  %281 = vst.msk [vmem:[%s588_s3 + $0x50] sm:$0xff] %vm45_vm0, %v223_v34  ;;  %v353_v35 = vpop.f32.mrb[2].mxu0  ;;  %v368_v36 = vpop.f32.mrb[2].mxu1 }
  0xe4   :  { %v188_v37 = vadd.f32 %v353_v35, %v295_v26  ;;  %v238_v38 = vadd.f32 %v368_v36, %v295_v26  ;;  %v182_v39 = vpop.f32.mrb[3].mxu0  ;;  %v232_v40 = vpop.f32.mrb[3].mxu1 }
  0xe5   :  { %v183_v41 = vadd.f32 %v295_v26, %v182_v39  ;;  %v233_v42 = vadd.f32 %v295_v26, %v232_v40 }
  0xe6   :  { %274 = vst.msk [vmem:[%s588_s3 + $0x18] sm:$0xff] %vm45_vm0, %v188_v37  ;;  %284 = vst.msk [vmem:[%s588_s3 + $0x68] sm:$0xff] %vm45_vm0, %v238_v38 }
  0xe7   :  { %273 = vst.msk [vmem:[%s588_s3 + $0x10] sm:$0xff] %vm45_vm0, %v183_v41  ;;  %283 = vst.msk [vmem:[%s588_s3 + $0x60] sm:$0xff] %vm45_vm0, %v233_v42  ;;  %v356_v43 = vpop.f32.mrb[4].mxu0  ;;  %v371_v44 = vpop.f32.mrb[4].mxu1 }
  0xe8   :  { %v198_v45 = vadd.f32 %v356_v43, %v295_v26  ;;  %v248_v46 = vadd.f32 %v371_v44, %v295_v26  ;;  %v192_v47 = vpop.f32.mrb[5].mxu0  ;;  %v242_v48 = vpop.f32.mrb[5].mxu1 }
  0xe9   :  { %v193_v49 = vadd.f32 %v295_v26, %v192_v47  ;;  %v243_v50 = vadd.f32 %v295_v26, %v242_v48 }
  0xea   :  { %276 = vst.msk [vmem:[%s588_s3 + $0x28] sm:$0xff] %vm45_vm0, %v198_v45  ;;  %286 = vst.msk [vmem:[%s588_s3 + $0x78] sm:$0xff] %vm45_vm0, %v248_v46 }
  0xeb   :  { %275 = vst.msk [vmem:[%s588_s3 + $0x20] sm:$0xff] %vm45_vm0, %v193_v49  ;;  %285 = vst.msk [vmem:[%s588_s3 + $0x70] sm:$0xff] %vm45_vm0, %v243_v50  ;;  %v359_v51 = vpop.f32.mrb[6].mxu0  ;;  %v374_v52 = vpop.f32.mrb[6].mxu1 }
  0xec   :  { %v208_v53 = vadd.f32 %v359_v51, %v295_v26  ;;  %v258_v54 = vadd.f32 %v374_v52, %v295_v26  ;;  %v202_v55 = vpop.f32.mrb[7].mxu0  ;;  %v252_v56 = vpop.f32.mrb[7].mxu1 }
  0xed   :  { %v203_v57 = vadd.f32 %v295_v26, %v202_v55  ;;  %v253_v58 = vadd.f32 %v295_v26, %v252_v56 }
  0xee   :  { %278 = vst.msk [vmem:[%s588_s3 + $0x38] sm:$0xff] %vm45_vm0, %v208_v53  ;;  %288 = vst.msk [vmem:[%s588_s3 + $0x88] sm:$0xff] %vm45_vm0, %v258_v54 }
  0xef   :  { %277 = vst.msk [vmem:[%s588_s3 + $0x30] sm:$0xff] %vm45_vm0, %v203_v57  ;;  %287 = vst.msk [vmem:[%s588_s3 + $0x80] sm:$0xff] %vm45_vm0, %v253_v58  ;;  %v362_v59 = vpop.f32.mrb[8].mxu0  ;;  %v377_v60 = vpop.f32.mrb[8].mxu1 }
  0xf0   :  { %v218_v61 = vadd.f32 %v362_v59, %v295_v26  ;;  %v268_v62 = vadd.f32 %v377_v60, %v295_v26  ;;  %v212_v63 = vpop.f32.mrb[9].mxu0  ;;  %v262_v0 = vpop.f32.mrb[9].mxu1 }
  0xf1   :  { %v213_v1 = vadd.f32 %v295_v26, %v212_v63  ;;  %v263_v2 = vadd.f32 %v295_v26, %v262_v0 }
  0xf2   :  { %280 = vst.msk [vmem:[%s588_s3 + $0x48] sm:$0xff] %vm45_vm0, %v218_v61  ;;  %290 = vst.msk [vmem:[%s588_s3 + $0x98] sm:$0xff] %vm45_vm0, %v268_v62 }
  0xf3   :  { %279 = vst.msk [vmem:[%s588_s3 + $0x40] sm:$0xff] %vm45_vm0, %v213_v1  ;;  %289 = vst.msk [vmem:[%s588_s3 + $0x90] sm:$0xff] %vm45_vm0, %v263_v2 }

// kernel: deformable_transformer_forward.21
= control target key start
LH: loop header
LB: loop body
LE: loop exit
PB: predicated region body
PF: predicated region fallthrough
CT: control target
= control target key end

     0   :  { %vm57_vm0 = vcmask 261120   ;;  %vm311_vm1 = vcmask 523264   ;;  %s1831_s1 = inlined_call_operand.vmem [shape: f32[32,64], index: 1, kind: input, shape index: {}]   ;;  %s1832_s0 = inlined_call_operand.vmem [shape: f32[160,32], index: 0, kind: input, shape index: {}]   ;;  %s1833_s3 = inlined_call_operand.vmem [shape: f32[64,32], index: 3, kind: input, shape index: {}]   ;;  %s1834_s2 = inlined_call_operand.vmem [shape: f32[1,64], index: 2, kind: input, shape index: {}]   ;;  %s1835_s4 = inlined_call_operand.vmem [shape: f32[1,32], index: 4, kind: input, shape index: {}]   ;;  %s1836_s5 = inlined_call_operand.vmem [shape: f32[1,32], index: 5, kind: input, shape index: {}]   ;;  %s1837_s6 = inlined_call_operand.vmem [shape: f32[1,32], index: 6, kind: input, shape index: {}]   ;;  %s1838_s7 = inlined_call_operand.vmem [shape: f32[160,32], index: 7, kind: output, shape index: {}]  }
   0x1   :  { %v46_v0 = vld [vmem:[%s1831_s1] sm:$0xff]  ;;  %v47_v1 = vld [vmem:[%s1831_s1 + $0x8] sm:$0xff]  ;;  %v48_v2 = vld [vmem:[%s1831_s1 + $0x10] sm:$0xff] }
   0x2   :  { %v1103_v3 = vpack.c.bf16 %v47_v1, %v46_v0  ;;  %v49_v4 = vld [vmem:[%s1831_s1 + $0x18] sm:$0xff]  ;;  %v1230_v5 = vld [vmem:[%s1832_s0] sm:$0xff]  ;;  %v1237_v7 = vld [vmem:[%s1832_s0 + $0x8] sm:$0xff] }
   0x3   :  { %v1107_v6 = vpack.c.bf16 %v49_v4, %v48_v2  ;;  %1027 = vmatprep.mubr.msk.f32.mxu0 %vm57_vm0, %v1230_v5  ;;  %v303_v8 = vld [vmem:[%s1833_s3] sm:$0xff]  ;;  %v304_v9 = vld [vmem:[%s1833_s3 + $0x8] sm:$0xff]  ;;  %v305_v10 = vld [vmem:[%s1833_s3 + $0x10] sm:$0xff] }
   0x4   :  { %1104 = vmatprep.subr.bf16.mxu0 %v1103_v3  ;;  %v1251_v11 = vld [vmem:[%s1832_s0 + $0x10] sm:$0xff]  ;;  %v1111_v12 = vpack.c.bf16 %v304_v9, %v303_v8  ;;  %v306_v13 = vld [vmem:[%s1833_s3 + $0x18] sm:$0xff]  ;;  %v307_v15 = vld [vmem:[%s1833_s3 + $0x20] sm:$0xff] }
   0x5   :  { %1106 = vmatpush3.bf16.msra.mxu0 %v1103_v3  ;;  %v1115_v14 = vpack.c.bf16 %v306_v13, %v305_v10  ;;  %v308_v16 = vld [vmem:[%s1833_s3 + $0x28] sm:$0xff]  ;;  %v1269_v17 = vld [vmem:[%s1832_s0 + $0x18] sm:$0xff]  ;;  %v1274_v18 = vld [vmem:[%s1832_s0 + $0x20] sm:$0xff] }
   0x6   :  { %1108 = vmatprep.subr.bf16.mxu0 %v1107_v6  ;;  %v1119_v19 = vpack.c.bf16 %v308_v16, %v307_v15  ;;  %1127 = vmatprep.subr.bf16.mxu1 %v1111_v12  ;;  %v309_v20 = vld [vmem:[%s1833_s3 + $0x30] sm:$0xff]  ;;  %v310_v21 = vld [vmem:[%s1833_s3 + $0x38] sm:$0xff]  ;;  %v1289_v22 = vld [vmem:[%s1832_s0 + $0x28] sm:$0xff] }
   0x7   :  { %1131 = vmatpush3.bf16.msra.mxu1 %v1111_v12  ;;  %v1294_v23 = vld [vmem:[%s1832_s0 + $0x30] sm:$0xff]  ;;  %v1123_v24 = vpack.c.bf16 %v310_v21, %v309_v20  ;;  %v1303_v25 = vld [vmem:[%s1832_s0 + $0x38] sm:$0xff]  ;;  %v1308_v26 = vld [vmem:[%s1832_s0 + $0x40] sm:$0xff] }
   0x8   :  { %1128 = vmatprep.subr.bf16.mxu1 %v1115_v14  ;;  %v1317_v27 = vld [vmem:[%s1832_s0 + $0x48] sm:$0xff]  ;;  %v1322_v28 = vld [vmem:[%s1832_s0 + $0x50] sm:$0xff]  ;;  %v1331_v29 = vld [vmem:[%s1832_s0 + $0x58] sm:$0xff] }
   0x9   :  { %1110 = vmatpush3.bf16.msra.mxu0 %v1107_v6  ;;  %v1336_v30 = vld [vmem:[%s1832_s0 + $0x60] sm:$0xff]  ;;  %v1345_v31 = vld [vmem:[%s1832_s0 + $0x68] sm:$0xff]  ;;  %v1350_v32 = vld [vmem:[%s1832_s0 + $0x70] sm:$0xff] }
   0xa   :  { %1112 = vmatprep.subr.bf16.mxu0 %v1111_v12  ;;  %v1359_v33 = vld [vmem:[%s1832_s0 + $0x78] sm:$0xff]  ;;  %v1364_v34 = vld [vmem:[%s1832_s0 + $0x80] sm:$0xff]  ;;  %v1373_v35 = vld [vmem:[%s1832_s0 + $0x88] sm:$0xff] }
   0xb   :  { %1132 = vmatpush3.bf16.msra.mxu1 %v1115_v14  ;;  %v1378_v36 = vld [vmem:[%s1832_s0 + $0x90] sm:$0xff]  ;;  %v1387_v37 = vld [vmem:[%s1832_s0 + $0x98] sm:$0xff]  ;;  %v1394_v38 = vld [vmem:[%s1834_s2] ss:$0 sm:$0xff] }
   0xc   :  { %1028 = vmatmul.mubr.msk.f32.vlgmr.msra.gmra.mrb[0].mxu0 %vm57_vm0, %v1237_v7  ;;  %1129 = vmatprep.subr.bf16.mxu1 %v1119_v19 }
   0xd   :  { %1030 = vmatprep.mubr.msk.f32.mxu0 %vm57_vm0, %v1251_v11  ;;  %1114 = vmatpush3.bf16.msra.mxu0 %v1111_v12 }
   0xe   :  { %1116 = vmatprep.subr.bf16.mxu0 %v1115_v14 }
   0xf   :  { %1133 = vmatpush3.bf16.msra.mxu1 %v1119_v19 }
  0x10   :  { %1031 = vmatmul.mubr.msk.f32.gmra.mrb[2].mxu0 %vm57_vm0, %v1269_v17  ;;  %1130 = vmatprep.subr.bf16.mxu1 %v1123_v24 }
  0x11   :  { %1033 = vmatprep.mubr.msk.f32.mxu0 %vm57_vm0, %v1274_v18  ;;  %1118 = vmatpush3.bf16.msra.mxu0 %v1115_v14 }
  0x12   :  { %1120 = vmatprep.subr.bf16.mxu0 %v1119_v19 }
  0x13   :  { %1134 = vmatpush3.bf16.msra.mxu1 %v1123_v24 }
  0x14   :  { %1034 = vmatmul.mubr.msk.f32.gmra.mrb[4].mxu0 %vm57_vm0, %v1289_v22 }
  0x15   :  { %1036 = vmatprep.mubr.msk.f32.mxu0 %vm57_vm0, %v1294_v23  ;;  %1122 = vmatpush3.bf16.msra.mxu0 %v1119_v19 }
  0x16   :  { %1124 = vmatprep.subr.bf16.mxu0 %v1123_v24 }
  0x18   :  { %1037 = vmatmul.mubr.msk.f32.gmra.mrb[6].mxu0 %vm57_vm0, %v1303_v25 }
  0x19   :  { %1039 = vmatprep.mubr.msk.f32.mxu0 %vm57_vm0, %v1308_v26  ;;  %1126 = vmatpush3.bf16.msra.mxu0 %v1123_v24 }
  0x1c   :  { %1040 = vmatmul.mubr.msk.f32.gmra.mrb[8].mxu0 %vm57_vm0, %v1317_v27 }
  0x1d   :  { %1042 = vmatprep.mubr.msk.f32.mxu0 %vm57_vm0, %v1322_v28 }
  0x20   :  { %1043 = vmatmul.mubr.msk.f32.gmra.mrb[10].mxu0 %vm57_vm0, %v1331_v29 }
  0x21   :  { %1045 = vmatprep.mubr.msk.f32.mxu0 %vm57_vm0, %v1336_v30 }
  0x24   :  { %1046 = vmatmul.mubr.msk.f32.gmra.mrb[12].mxu0 %vm57_vm0, %v1345_v31 }
  0x25   :  { %1048 = vmatprep.mubr.msk.f32.mxu0 %vm57_vm0, %v1350_v32 }
  0x28   :  { %1049 = vmatmul.mubr.msk.f32.gmra.mrb[14].mxu0 %vm57_vm0, %v1359_v33 }
  0x29   :  { %1051 = vmatprep.mubr.msk.f32.mxu0 %vm57_vm0, %v1364_v34 }
  0x2c   :  { %1052 = vmatmul.mubr.msk.f32.gmra.mrb[16].mxu0 %vm57_vm0, %v1373_v35 }
  0x2d   :  { %1054 = vmatprep.mubr.msk.f32.mxu0 %vm57_vm0, %v1378_v36 }
  0x30   :  { %1055 = vmatmul.mubr.msk.f32.gmra.mrb[18].mxu0 %vm57_vm0, %v1387_v37 }
  0xdf   :  { %v1029_v39 = vpop.f32.mrb[0].mxu0 }
  0xe0   :  { %v190_v40 = vadd.f32 %v1029_v39, %v1394_v38  ;;  %v184_v41 = vpop.f32.mrb[1].mxu0 }
  0xe1   :  { %v185_v42 = vadd.f32 %v1394_v38, %v184_v41 }
  0xe2   :  { %v284_v45 = vmax.f32 %v190_v40, 0.0 }
  0xe3   :  { %v283_v43 = vmax.f32 %v185_v42, 0.0  ;;  %v1032_v44 = vpop.f32.mrb[2].mxu0 }
  0xe4   :  { %v200_v46 = vadd.f32 %v1032_v44, %v1394_v38  ;;  %v194_v47 = vpop.f32.mrb[3].mxu0 }
  0xe5   :  { %v195_v48 = vadd.f32 %v1394_v38, %v194_v47  ;;  %1073 = vmatprep.mubr.msk.f32.mxu0 %vm311_vm1, %v283_v43 }
  0xe6   :  { %1074 = vmatmul.mubr.msk.f32.vlgmr.msra.gmra.mrb[20].mxu0 %vm311_vm1, %v284_v45  ;;  %v286_v51 = vmax.f32 %v200_v46, 0.0 }
  0xe7   :  { %v285_v49 = vmax.f32 %v195_v48, 0.0  ;;  %v1035_v50 = vpop.f32.mrb[4].mxu0 }
  0xe8   :  { %v210_v52 = vadd.f32 %v1035_v50, %v1394_v38  ;;  %v204_v53 = vpop.f32.mrb[5].mxu0 }
  0xe9   :  { %v205_v54 = vadd.f32 %v1394_v38, %v204_v53  ;;  %1076 = vmatprep.mubr.msk.f32.mxu1 %vm311_vm1, %v285_v49 }
  0xea   :  { %v288_v55 = vmax.f32 %v210_v52, 0.0  ;;  %1077 = vmatmul.mubr.msk.f32.vlgmr.msra.gmra.mrb[0].mxu1 %vm311_vm1, %v286_v51 }
  0xeb   :  { %v287_v56 = vmax.f32 %v205_v54, 0.0  ;;  %v1038_v57 = vpop.f32.mrb[6].mxu0 }
  0xec   :  { %v220_v58 = vadd.f32 %v1038_v57, %v1394_v38  ;;  %v214_v59 = vpop.f32.mrb[7].mxu0  ;;  %v1439_v57 = vld [vmem:[%s1835_s4] ss:$0 sm:$0xff] }
  0xed   :  { %v215_v60 = vadd.f32 %v1394_v38, %v214_v59  ;;  %1079 = vmatprep.mubr.msk.f32.mxu1 %vm311_vm1, %v287_v56 }
  0xee   :  { %v290_v61 = vmax.f32 %v220_v58, 0.0  ;;  %1080 = vmatmul.mubr.msk.f32.gmra.mrb[2].mxu1 %vm311_vm1, %v288_v55 }
  0xef   :  { %v289_v62 = vmax.f32 %v215_v60, 0.0  ;;  %v1041_v63 = vpop.f32.mrb[8].mxu0 }
  0xf0   :  { %v230_v0 = vadd.f32 %v1041_v63, %v1394_v38  ;;  %v224_v1 = vpop.f32.mrb[9].mxu0 }
  0xf1   :  { %v225_v2 = vadd.f32 %v1394_v38, %v224_v1  ;;  %1082 = vmatprep.mubr.msk.f32.mxu1 %vm311_vm1, %v289_v62 }
  0xf2   :  { %v292_v3 = vmax.f32 %v230_v0, 0.0  ;;  %1083 = vmatmul.mubr.msk.f32.gmra.mrb[4].mxu1 %vm311_vm1, %v290_v61 }
  0xf3   :  { %v291_v4 = vmax.f32 %v225_v2, 0.0  ;;  %v1044_v6 = vpop.f32.mrb[10].mxu0 }
  0xf4   :  { %v240_v8 = vadd.f32 %v1044_v6, %v1394_v38  ;;  %v234_v9 = vpop.f32.mrb[11].mxu0 }
  0xf5   :  { %v235_v10 = vadd.f32 %v1394_v38, %v234_v9  ;;  %1085 = vmatprep.mubr.msk.f32.mxu1 %vm311_vm1, %v291_v4 }
  0xf6   :  { %v294_v12 = vmax.f32 %v240_v8, 0.0  ;;  %1086 = vmatmul.mubr.msk.f32.gmra.mrb[6].mxu1 %vm311_vm1, %v292_v3 }
  0xf7   :  { %v293_v13 = vmax.f32 %v235_v10, 0.0  ;;  %v1047_v14 = vpop.f32.mrb[12].mxu0 }
  0xf8   :  { %v250_v15 = vadd.f32 %v1047_v14, %v1394_v38  ;;  %v244_v16 = vpop.f32.mrb[13].mxu0 }
  0xf9   :  { %v245_v19 = vadd.f32 %v1394_v38, %v244_v16  ;;  %1088 = vmatprep.mubr.msk.f32.mxu1 %vm311_vm1, %v293_v13 }
  0xfa   :  { %v296_v20 = vmax.f32 %v250_v15, 0.0  ;;  %1089 = vmatmul.mubr.msk.f32.gmra.mrb[8].mxu1 %vm311_vm1, %v294_v12 }
  0xfb   :  { %v295_v21 = vmax.f32 %v245_v19, 0.0  ;;  %v1050_v24 = vpop.f32.mrb[14].mxu0 }
  0xfc   :  { %v260_v39 = vadd.f32 %v1050_v24, %v1394_v38  ;;  %v254_v40 = vpop.f32.mrb[15].mxu0 }
  0xfd   :  { %v255_v41 = vadd.f32 %v1394_v38, %v254_v40  ;;  %1091 = vmatprep.mubr.msk.f32.mxu1 %vm311_vm1, %v295_v21 }
  0xfe   :  { %v298_v42 = vmax.f32 %v260_v39, 0.0  ;;  %1092 = vmatmul.mubr.msk.f32.gmra.mrb[10].mxu1 %vm311_vm1, %v296_v20 }
  0xff   :  { %v297_v43 = vmax.f32 %v255_v41, 0.0  ;;  %v1053_v44 = vpop.f32.mrb[16].mxu0 }
 0x100   :  { %v270_v45 = vadd.f32 %v1053_v44, %v1394_v38  ;;  %v264_v46 = vpop.f32.mrb[17].mxu0 }
 0x101   :  { %v265_v47 = vadd.f32 %v1394_v38, %v264_v46  ;;  %1094 = vmatprep.mubr.msk.f32.mxu1 %vm311_vm1, %v297_v43 }
 0x102   :  { %v300_v48 = vmax.f32 %v270_v45, 0.0  ;;  %1095 = vmatmul.mubr.msk.f32.gmra.mrb[12].mxu1 %vm311_vm1, %v298_v42 }
 0x103   :  { %v299_v49 = vmax.f32 %v265_v47, 0.0  ;;  %v1056_v50 = vpop.f32.mrb[18].mxu0 }
 0x104   :  { %v280_v51 = vadd.f32 %v1056_v50, %v1394_v38  ;;  %v274_v52 = vpop.f32.mrb[19].mxu0 }
 0x105   :  { %v275_v53 = vadd.f32 %v1394_v38, %v274_v52  ;;  %1097 = vmatprep.mubr.msk.f32.mxu1 %vm311_vm1, %v299_v49 }
 0x106   :  { %v302_v54 = vmax.f32 %v280_v51, 0.0  ;;  %1098 = vmatmul.mubr.msk.f32.gmra.mrb[14].mxu1 %vm311_vm1, %v300_v48 }
 0x107   :  { %v301_v55 = vmax.f32 %v275_v53, 0.0 }
 0x109   :  { %1100 = vmatprep.mubr.msk.f32.mxu1 %vm311_vm1, %v301_v55 }
 0x10a   :  { %1101 = vmatmul.mubr.msk.f32.gmra.mrb[16].mxu1 %vm311_vm1, %v302_v54 }
 0x1b9   :  { %v1075_v56 = vpop.f32.mrb[20].mxu0 }
 0x1ba   :  { %v538_v58 = vadd.f32 %v1075_v56, %v1237_v7  ;;  %v438_v59 = vpop.f32.mrb[21].mxu0 }
 0x1bb   :  { %v537_v38 = vadd.f32 %v438_v59, %v1230_v5 }
 0x1bc   :  { %v1444_v60 = vadd.f32 %v1439_v57, %v538_v58 }
 0x1bd   :  { %v1078_v61 = vpop.f32.mrb[0].mxu1  ;;  %v1450_v1 = vadd.f32 %v1439_v57, %v537_v38 }
 0x1be   :  { %v540_v62 = vadd.f32 %v1078_v61, %v1269_v17  ;;  %v448_v63 = vpop.f32.mrb[1].mxu1  ;;  %v589_v0 = vsel %vm57_vm0, %v1444_v60, 0.0 }
 0x1bf   :  { %v539_v2 = vadd.f32 %v448_v63, %v1251_v11  ;;  %590 = vadd.xlane.f32.xlu0 %v589_v0  ;;  %v586_v6 = vsel %vm57_vm0, %v1450_v1, 0.0 }
 0x1c0   :  { %v1454_v7 = vadd.f32 %v1439_v57, %v540_v62 }
 0x1c1   :  { %v1081_v5 = vpop.f32.mrb[2].mxu1  ;;  %v1462_v8 = vadd.f32 %v1439_v57, %v539_v2 }
 0x1c2   :  { %v542_v3 = vadd.f32 %v1081_v5, %v1289_v22  ;;  %v458_v4 = vpop.f32.mrb[3].mxu1  ;;  %v595_v17 = vsel %vm57_vm0, %v1454_v7, 0.0 }
 0x1c3   :  { %v541_v9 = vadd.f32 %v458_v4, %v1274_v18  ;;  %596 = vadd.xlane.f32.xlu1 %v595_v17  ;;  %587 = vadd.xlane.f32.xlu0 %v586_v6  ;;  %v592_v13 = vsel %vm57_vm0, %v1462_v8, 0.0 }
 0x1c4   :  { %v1472_v14 = vadd.f32 %v1439_v57, %v542_v3 }
 0x1c5   :  { %v1084_v11 = vpop.f32.mrb[4].mxu1  ;;  %v1466_v10 = vadd.f32 %v1439_v57, %v541_v9 }
 0x1c6   :  { %v544_v22 = vadd.f32 %v1084_v11, %v1303_v25  ;;  %v468_v12 = vpop.f32.mrb[5].mxu1  ;;  %v601_v21 = vsel %vm57_vm0, %v1472_v14, 0.0 }
 0x1c7   :  { %v543_v15 = vadd.f32 %v468_v12, %v1294_v23  ;;  %593 = vadd.xlane.f32.xlu1 %v592_v13  ;;  %v598_v18 = vsel %vm57_vm0, %v1466_v10, 0.0 }
 0x1c8   :  { %599 = vadd.xlane.f32.xlu0 %v598_v18  ;;  %v1484_v24 = vadd.f32 %v1439_v57, %v544_v22 }
 0x1c9   :  { %v1087_v16 = vpop.f32.mrb[6].mxu1  ;;  %v1478_v19 = vadd.f32 %v1439_v57, %v543_v15 }
 0x1ca   :  { %v546_v25 = vadd.f32 %v1087_v16, %v1317_v27  ;;  %v478_v20 = vpop.f32.mrb[7].mxu1  ;;  %v607_v43 = vsel %vm57_vm0, %v1484_v24, 0.0 }
 0x1cb   :  { %v545_v23 = vadd.f32 %v478_v20, %v1308_v26  ;;  %602 = vadd.xlane.f32.xlu1 %v601_v21  ;;  %v604_v39 = vsel %vm57_vm0, %v1478_v19, 0.0 }
 0x1cc   :  { %605 = vadd.xlane.f32.xlu0 %v604_v39  ;;  %v1496_v44 = vadd.f32 %v1439_v57, %v546_v25 }
 0x1cd   :  { %v1090_v40 = vpop.f32.mrb[8].mxu1  ;;  %v1490_v41 = vadd.f32 %v1439_v57, %v545_v23 }
 0x1ce   :  { %v548_v27 = vadd.f32 %v1090_v40, %v1331_v29  ;;  %v488_v42 = vpop.f32.mrb[9].mxu1  ;;  %v613_v49 = vsel %vm57_vm0, %v1496_v44, 0.0 }
 0x1cf   :  { %v547_v26 = vadd.f32 %v488_v42, %v1322_v28  ;;  %608 = vadd.xlane.f32.xlu1 %v607_v43  ;;  %v610_v45 = vsel %vm57_vm0, %v1490_v41, 0.0 }
 0x1d0   :  { %611 = vadd.xlane.f32.xlu0 %v610_v45  ;;  %v1508_v50 = vadd.f32 %v1439_v57, %v548_v27 }
 0x1d1   :  { %v1093_v46 = vpop.f32.mrb[10].mxu1  ;;  %v1502_v47 = vadd.f32 %v1439_v57, %v547_v26 }
 0x1d2   :  { %v550_v29 = vadd.f32 %v1093_v46, %v1345_v31  ;;  %v498_v48 = vpop.f32.mrb[11].mxu1  ;;  %v619_v55 = vsel %vm57_vm0, %v1508_v50, 0.0 }
 0x1d3   :  { %v549_v28 = vadd.f32 %v498_v48, %v1336_v30  ;;  %614 = vadd.xlane.f32.xlu1 %v613_v49  ;;  %v616_v51 = vsel %vm57_vm0, %v1502_v47, 0.0 }
 0x1d4   :  { %617 = vadd.xlane.f32.xlu0 %v616_v51  ;;  %v1520_v56 = vadd.f32 %v1439_v57, %v550_v29 }
 0x1d5   :  { %v1096_v52 = vpop.f32.mrb[12].mxu1  ;;  %v1514_v53 = vadd.f32 %v1439_v57, %v549_v28 }
 0x1d6   :  { %v552_v31 = vadd.f32 %v1096_v52, %v1359_v33  ;;  %v508_v54 = vpop.f32.mrb[13].mxu1  ;;  %v625_v62 = vsel %vm57_vm0, %v1520_v56, 0.0 }
 0x1d7   :  { %v551_v30 = vadd.f32 %v508_v54, %v1350_v32  ;;  %620 = vadd.xlane.f32.xlu1 %v619_v55  ;;  %v622_v58 = vsel %vm57_vm0, %v1514_v53, 0.0 }
 0x1d8   :  { %623 = vadd.xlane.f32.xlu0 %v622_v58  ;;  %v1532_v63 = vadd.f32 %v1439_v57, %v552_v31 }
 0x1d9   :  { %v1099_v59 = vpop.f32.mrb[14].mxu1  ;;  %v1526_v38 = vadd.f32 %v1439_v57, %v551_v30 }
 0x1da   :  { %v554_v33 = vadd.f32 %v1099_v59, %v1373_v35  ;;  %v518_v61 = vpop.f32.mrb[15].mxu1  ;;  %v631_v4 = vsel %vm57_vm0, %v1532_v63, 0.0 }
 0x1db   :  { %v553_v32 = vadd.f32 %v518_v61, %v1364_v34  ;;  %626 = vadd.xlane.f32.xlu1 %v625_v62  ;;  %v628_v0 = vsel %vm57_vm0, %v1526_v38, 0.0 }
 0x1dc   :  { %629 = vadd.xlane.f32.xlu0 %v628_v0  ;;  %v1544_v17 = vadd.f32 %v1439_v57, %v554_v33 }
 0x1dd   :  { %v1102_v2 = vpop.f32.mrb[16].mxu1  ;;  %v1538_v5 = vadd.f32 %v1439_v57, %v553_v32 }
 0x1de   :  { %v556_v35 = vadd.f32 %v1102_v2, %v1387_v37  ;;  %v528_v3 = vpop.f32.mrb[17].mxu1  ;;  %v637_v37 = vsel %vm57_vm0, %v1544_v17, 0.0 }
 0x1df   :  { %v555_v34 = vadd.f32 %v528_v3, %v1378_v36  ;;  %632 = vadd.xlane.f32.xlu1 %v631_v4  ;;  %v634_v6 = vsel %vm57_vm0, %v1538_v5, 0.0 }
 0x1e0   :  { %635 = vadd.xlane.f32.xlu0 %v634_v6  ;;  %v1555_v11 = vadd.f32 %v1439_v57, %v556_v35 }
 0x1e1   :  { %v1550_v9 = vadd.f32 %v1439_v57, %v555_v34 }
 0x1e2   :  { %v643_v36 = vsel %vm57_vm0, %v1555_v11, 0.0 }
 0x1e3   :  { %638 = vadd.xlane.f32.xlu1 %v637_v37  ;;  %v640_v22 = vsel %vm57_vm0, %v1550_v9, 0.0 }
 0x1e4   :  { %641 = vadd.xlane.f32.xlu0 %v640_v22 }
 0x1e7   :  { %644 = vadd.xlane.f32.xlu1 %v643_v36 }
 0x24c   :  { %v591_v12 = vpop.xlane.xlu0 %590 }
 0x24d   :  { %v648_v13 = vmul.f32 0.03125, %v591_v12 }
 0x24f   :  { %v1562_v15 = vsub.f32 %v1444_v60, %v648_v13 }
 0x250   :  { %v597_v18 = vpop.xlane.xlu1 %596  ;;  %v588_v16 = vpop.xlane.xlu0 %587 }
 0x251   :  { %v650_v25 = vmul.f32 0.03125, %v597_v18  ;;  %v647_v20 = vmul.f32 0.03125, %v588_v16  ;;  %v688_v57 = vmul.f32 %v1562_v15, %v1562_v15 }
 0x253   :  { %v1567_v21 = vsub.f32 %v1454_v7, %v650_v25  ;;  %v1570_v23 = vsub.f32 %v1450_v1, %v647_v20  ;;  %v710_v39 = vsel %vm57_vm0, %v688_v57, 0.0 }
 0x254   :  { %v594_v40 = vpop.xlane.xlu1 %593  ;;  %711 = vadd.xlane.f32.xlu1 %v710_v39 }
 0x255   :  { %v649_v27 = vmul.f32 0.03125, %v594_v40  ;;  %v600_v60 = vpop.xlane.xlu0 %599  ;;  %v690_v42 = vmul.f32 %v1567_v21, %v1567_v21  ;;  %v687_v43 = vmul.f32 %v1570_v23, %v1570_v23 }
 0x256   :  { %v651_v26 = vmul.f32 0.03125, %v600_v60 }
 0x257   :  { %v1578_v45 = vsub.f32 %v1462_v8, %v649_v27  ;;  %v716_v7 = vsel %vm57_vm0, %v690_v42, 0.0  ;;  %v707_v1 = vsel %vm57_vm0, %v687_v43, 0.0 }
 0x258   :  { %v1583_v46 = vsub.f32 %v1466_v10, %v651_v26  ;;  %v603_v29 = vpop.xlane.xlu1 %602  ;;  %717 = vadd.xlane.f32.xlu1 %v716_v7  ;;  %708 = vadd.xlane.f32.xlu0 %v707_v1 }
 0x259   :  { %v652_v48 = vmul.f32 0.03125, %v603_v29  ;;  %v606_v49 = vpop.xlane.xlu0 %605  ;;  %v689_v28 = vmul.f32 %v1578_v45, %v1578_v45 }
 0x25a   :  { %v653_v51 = vmul.f32 0.03125, %v606_v49  ;;  %v691_v31 = vmul.f32 %v1583_v46, %v1583_v46 }
 0x25b   :  { %v1588_v52 = vsub.f32 %v1472_v14, %v652_v48  ;;  %v713_v8 = vsel %vm57_vm0, %v689_v28, 0.0 }
 0x25c   :  { %v1594_v10 = vsub.f32 %v1478_v19, %v653_v51  ;;  %v609_v54 = vpop.xlane.xlu1 %608  ;;  %714 = vadd.xlane.f32.xlu0 %v713_v8  ;;  %v719_v61 = vsel %vm57_vm0, %v691_v31, 0.0 }
 0x25d   :  { %v654_v55 = vmul.f32 0.03125, %v609_v54  ;;  %v612_v30 = vpop.xlane.xlu0 %611  ;;  %v692_v58 = vmul.f32 %v1588_v52, %v1588_v52 }
 0x25e   :  { %v655_v59 = vmul.f32 0.03125, %v612_v30  ;;  %v693_v62 = vmul.f32 %v1594_v10, %v1594_v10 }
 0x25f   :  { %v1599_v33 = vsub.f32 %v1484_v24, %v654_v55  ;;  %v722_v14 = vsel %vm57_vm0, %v692_v58, 0.0 }
 0x260   :  { %v1606_v19 = vsub.f32 %v1490_v41, %v655_v59  ;;  %v615_v32 = vpop.xlane.xlu1 %614  ;;  %723 = vadd.xlane.f32.xlu1 %v722_v14  ;;  %720 = vadd.xlane.f32.xlu0 %v719_v61  ;;  %v725_v34 = vsel %vm57_vm0, %v693_v62, 0.0 }
 0x261   :  { %v656_v0 = vmul.f32 0.03125, %v615_v32  ;;  %v618_v2 = vpop.xlane.xlu0 %617  ;;  %v694_v35 = vmul.f32 %v1599_v33, %v1599_v33 }
 0x262   :  { %v657_v24 = vmul.f32 0.03125, %v618_v2  ;;  %v695_v41 = vmul.f32 %v1606_v19, %v1606_v19 }
 0x263   :  { %v1611_v3 = vsub.f32 %v1496_v44, %v656_v0  ;;  %v728_v4 = vsel %vm57_vm0, %v694_v35, 0.0 }
 0x264   :  { %v1618_v6 = vsub.f32 %v1502_v47, %v657_v24  ;;  %v621_v37 = vpop.xlane.xlu1 %620  ;;  %729 = vadd.xlane.f32.xlu1 %v728_v4  ;;  %726 = vadd.xlane.f32.xlu0 %v725_v34  ;;  %v731_v16 = vsel %vm57_vm0, %v695_v41, 0.0 }
 0x265   :  { %v658_v22 = vmul.f32 0.03125, %v621_v37  ;;  %v624_v36 = vpop.xlane.xlu0 %623  ;;  %v696_v12 = vmul.f32 %v1611_v3, %v1611_v3 }
 0x266   :  { %v659_v44 = vmul.f32 0.03125, %v624_v36  ;;  %v697_v47 = vmul.f32 %v1618_v6, %v1618_v6 }
 0x267   :  { %v1623_v13 = vsub.f32 %v1508_v50, %v658_v22  ;;  %v734_v18 = vsel %vm57_vm0, %v696_v12, 0.0 }
 0x268   :  { %v1630_v25 = vsub.f32 %v1514_v53, %v659_v44  ;;  %v627_v20 = vpop.xlane.xlu1 %626  ;;  %735 = vadd.xlane.f32.xlu1 %v734_v18  ;;  %732 = vadd.xlane.f32.xlu0 %v731_v16  ;;  %v737_v42 = vsel %vm57_vm0, %v697_v47, 0.0 }
 0x269   :  { %v660_v57 = vmul.f32 0.03125, %v627_v20  ;;  %v630_v39 = vpop.xlane.xlu0 %629  ;;  %v698_v40 = vmul.f32 %v1623_v13, %v1623_v13 }
 0x26a   :  { %v661_v50 = vmul.f32 0.03125, %v630_v39  ;;  %v699_v53 = vmul.f32 %v1630_v25, %v1630_v25 }
 0x26b   :  { %v1635_v27 = vsub.f32 %v1520_v56, %v660_v57  ;;  %v740_v60 = vsel %vm57_vm0, %v698_v40, 0.0 }
 0x26c   :  { %v1642_v43 = vsub.f32 %v1526_v38, %v661_v50  ;;  %v633_v26 = vpop.xlane.xlu1 %632  ;;  %741 = vadd.xlane.f32.xlu1 %v740_v60  ;;  %738 = vadd.xlane.f32.xlu0 %v737_v42  ;;  %v743_v28 = vsel %vm57_vm0, %v699_v53, 0.0  ;;  %v1684_v42 = vld [vmem:[%s1836_s5] ss:$0 sm:$0xff] }
 0x26d   :  { %v662_v7 = vmul.f32 0.03125, %v633_v26  ;;  %v636_v1 = vpop.xlane.xlu0 %635  ;;  %v700_v29 = vmul.f32 %v1635_v27, %v1635_v27 }
 0x26e   :  { %v663_v56 = vmul.f32 0.03125, %v636_v1  ;;  %v701_v38 = vmul.f32 %v1642_v43, %v1642_v43 }
 0x26f   :  { %v1647_v48 = vsub.f32 %v1532_v63, %v662_v7  ;;  %v746_v49 = vsel %vm57_vm0, %v700_v29, 0.0 }
 0x270   :  { %v1654_v51 = vsub.f32 %v1538_v5, %v663_v56  ;;  %v639_v8 = vpop.xlane.xlu1 %638  ;;  %747 = vadd.xlane.f32.xlu1 %v746_v49  ;;  %744 = vadd.xlane.f32.xlu0 %v743_v28  ;;  %v749_v59 = vsel %vm57_vm0, %v701_v38, 0.0  ;;  %v1690_v56 = vld [vmem:[%s1837_s6] ss:$0 sm:$0xff] }
 0x271   :  { %v664_v31 = vmul.f32 0.03125, %v639_v8  ;;  %v642_v54 = vpop.xlane.xlu0 %641  ;;  %v702_v55 = vmul.f32 %v1647_v48, %v1647_v48 }
 0x272   :  { %v665_v63 = vmul.f32 0.03125, %v642_v54  ;;  %v703_v5 = vmul.f32 %v1654_v51, %v1654_v51 }
 0x273   :  { %v1659_v30 = vsub.f32 %v1544_v17, %v664_v31  ;;  %v752_v58 = vsel %vm57_vm0, %v702_v55, 0.0 }
 0x274   :  { %v1666_v14 = vsub.f32 %v1550_v9, %v665_v63  ;;  %v645_v61 = vpop.xlane.xlu1 %644  ;;  %753 = vadd.xlane.f32.xlu1 %v752_v58  ;;  %750 = vadd.xlane.f32.xlu0 %v749_v59  ;;  %v755_v2 = vsel %vm57_vm0, %v703_v5, 0.0 }
 0x275   :  { %v666_v62 = vmul.f32 0.03125, %v645_v61  ;;  %v704_v32 = vmul.f32 %v1659_v30, %v1659_v30 }
 0x276   :  { %v705_v35 = vmul.f32 %v1666_v14, %v1666_v14 }
 0x277   :  { %v1671_v17 = vsub.f32 %v1555_v11, %v666_v62  ;;  %v758_v0 = vsel %vm57_vm0, %v704_v32, 0.0 }
 0x278   :  { %759 = vadd.xlane.f32.xlu1 %v758_v0  ;;  %756 = vadd.xlane.f32.xlu0 %v755_v2  ;;  %v761_v4 = vsel %vm57_vm0, %v705_v35, 0.0 }
 0x279   :  { %v706_v9 = vmul.f32 %v1671_v17, %v1671_v17 }
 0x27b   :  { %v764_v24 = vsel %vm57_vm0, %v706_v9, 0.0 }
 0x27c   :  { %765 = vadd.xlane.f32.xlu1 %v764_v24  ;;  %762 = vadd.xlane.f32.xlu0 %v761_v4 }
 0x2e1   :  { %v712_v11 = vpop.xlane.xlu1 %711 }
 0x2e2   :  { %v768_v34 = vmul.f32 0.03125, %v712_v11 }
 0x2e4   :  { %v788_v41 = vadd.f32 1e-05, %v768_v34 }
 0x2e5   :  { %v718_v37 = vpop.xlane.xlu1 %717  ;;  %v709_v22 = vpop.xlane.xlu0 %708 }
 0x2e6   :  { %1135 = vrsqrt.f32 %v788_v41  ;;  %v770_v36 = vmul.f32 0.03125, %v718_v37  ;;  %v767_v12 = vmul.f32 0.03125, %v709_v22 }
 0x2e8   :  { %v790_v44 = vadd.f32 1e-05, %v770_v36  ;;  %v787_v18 = vadd.f32 1e-05, %v767_v12 }
 0x2e9   :  { %v715_v16 = vpop.xlane.xlu0 %714 }
 0x2ea   :  { %1137 = vrsqrt.f32 %v790_v44  ;;  %v769_v47 = vmul.f32 0.03125, %v715_v16 }
 0x2eb   :  { %1139 = vrsqrt.f32 %v787_v18 }
 0x2ec   :  { %v789_v20 = vadd.f32 1e-05, %v769_v47 }
 0x2ed   :  { %v724_v57 = vpop.xlane.xlu1 %723  ;;  %v721_v39 = vpop.xlane.xlu0 %720 }
 0x2ee   :  { %1141 = vrsqrt.f32 %v789_v20  ;;  %v772_v40 = vmul.f32 0.03125, %v724_v57  ;;  %v771_v50 = vmul.f32 0.03125, %v721_v39 }
 0x2f0   :  { %v1136_v60 = vpop.eup %1135  ;;  %v792_v53 = vadd.f32 1e-05, %v772_v40  ;;  %v791_v26 = vadd.f32 1e-05, %v771_v50 }
 0x2f1   :  { %v828_v7 = vmul.f32 %v1136_v60, %v1562_v15  ;;  %v730_v1 = vpop.xlane.xlu1 %729  ;;  %v727_v29 = vpop.xlane.xlu0 %726 }
 0x2f2   :  { %1143 = vrsqrt.f32 %v792_v53  ;;  %v774_v49 = vmul.f32 0.03125, %v730_v1  ;;  %v773_v28 = vmul.f32 0.03125, %v727_v29 }
 0x2f3   :  { %v854_v38 = vmul.f32 %v1684_v42, %v828_v7  ;;  %1145 = vrsqrt.f32 %v791_v26 }
 0x2f4   :  { %v1138_v8 = vpop.eup %1137  ;;  %v794_v31 = vadd.f32 1e-05, %v774_v49  ;;  %v793_v54 = vadd.f32 1e-05, %v773_v28 }
 0x2f5   :  { %v1140_v55 = vpop.eup %1139  ;;  %v880_v63 = vadd.f32 %v1690_v56, %v854_v38  ;;  %v830_v15 = vmul.f32 %v1138_v8, %v1567_v21  ;;  %v736_v58 = vpop.xlane.xlu1 %735 }
 0x2f6   :  { %v733_v59 = vpop.xlane.xlu0 %732  ;;  %v827_v5 = vmul.f32 %v1140_v55, %v1570_v23  ;;  %1147 = vrsqrt.f32 %v794_v31  ;;  %v776_v61 = vmul.f32 0.03125, %v736_v58 }
 0x2f7   :  { %v775_v62 = vmul.f32 0.03125, %v733_v59  ;;  %900 = vst.msk [vmem:[%s1838_s7 + $0x8] sm:$0xff] %vm57_vm0, %v880_v63  ;;  %v856_v32 = vmul.f32 %v1684_v42, %v830_v15  ;;  %1149 = vrsqrt.f32 %v793_v54 }
 0x2f8   :  { %v1142_v0 = vpop.eup %1141  ;;  %v853_v2 = vmul.f32 %v1684_v42, %v827_v5  ;;  %v796_v35 = vadd.f32 1e-05, %v776_v61 }
 0x2f9   :  { %v795_v21 = vadd.f32 1e-05, %v775_v62  ;;  %v882_v9 = vadd.f32 %v1690_v56, %v856_v32  ;;  %v829_v23 = vmul.f32 %v1142_v0, %v1578_v45  ;;  %v742_v24 = vpop.xlane.xlu1 %741 }
 0x2fa   :  { %v739_v4 = vpop.xlane.xlu0 %738  ;;  %v879_v11 = vadd.f32 %v1690_v56, %v853_v2  ;;  %1151 = vrsqrt.f32 %v796_v35  ;;  %v778_v34 = vmul.f32 0.03125, %v742_v24 }
 0x2fb   :  { %v777_v41 = vmul.f32 0.03125, %v739_v4  ;;  %902 = vst.msk [vmem:[%s1838_s7 + $0x18] sm:$0xff] %vm57_vm0, %v882_v9  ;;  %v855_v37 = vmul.f32 %v1684_v42, %v829_v23  ;;  %1153 = vrsqrt.f32 %v795_v21 }
 0x2fc   :  { %v1144_v22 = vpop.eup %1143  ;;  %899 = vst.msk [vmem:[%s1838_s7] sm:$0xff] %vm57_vm0, %v879_v11  ;;  %v798_v45 = vadd.f32 1e-05, %v778_v34 }
 0x2fd   :  { %v797_v36 = vadd.f32 1e-05, %v777_v41  ;;  %v1146_v12 = vpop.eup %1145  ;;  %v881_v44 = vadd.f32 %v1690_v56, %v855_v37  ;;  %v832_v18 = vmul.f32 %v1144_v22, %v1588_v52  ;;  %v748_v16 = vpop.xlane.xlu1 %747 }
 0x2fe   :  { %v745_v47 = vpop.xlane.xlu0 %744  ;;  %v831_v20 = vmul.f32 %v1146_v12, %v1583_v46  ;;  %1155 = vrsqrt.f32 %v798_v45  ;;  %v780_v57 = vmul.f32 0.03125, %v748_v16 }
 0x2ff   :  { %v779_v39 = vmul.f32 0.03125, %v745_v47  ;;  %901 = vst.msk [vmem:[%s1838_s7 + $0x10] sm:$0xff] %vm57_vm0, %v881_v44  ;;  %v858_v40 = vmul.f32 %v1684_v42, %v832_v18  ;;  %1157 = vrsqrt.f32 %v797_v36 }
 0x300   :  { %v1148_v50 = vpop.eup %1147  ;;  %v857_v60 = vmul.f32 %v1684_v42, %v831_v20  ;;  %v800_v53 = vadd.f32 1e-05, %v780_v57 }
 0x301   :  { %v799_v52 = vadd.f32 1e-05, %v779_v39  ;;  %v1150_v26 = vpop.eup %1149  ;;  %v884_v7 = vadd.f32 %v1690_v56, %v858_v40  ;;  %v834_v46 = vmul.f32 %v1148_v50, %v1599_v33  ;;  %v754_v1 = vpop.xlane.xlu1 %753 }
 0x302   :  { %v751_v29 = vpop.xlane.xlu0 %750  ;;  %v883_v49 = vadd.f32 %v1690_v56, %v857_v60  ;;  %v833_v28 = vmul.f32 %v1150_v26, %v1594_v10  ;;  %1159 = vrsqrt.f32 %v800_v53  ;;  %v782_v38 = vmul.f32 0.03125, %v754_v1 }
 0x303   :  { %904 = vst.msk [vmem:[%s1838_s7 + $0x28] sm:$0xff] %vm57_vm0, %v884_v7  ;;  %v860_v8 = vmul.f32 %v1684_v42, %v834_v46  ;;  %1161 = vrsqrt.f32 %v799_v52  ;;  %v781_v31 = vmul.f32 0.03125, %v751_v29 }
 0x304   :  { %v1152_v54 = vpop.eup %1151  ;;  %903 = vst.msk [vmem:[%s1838_s7 + $0x20] sm:$0xff] %vm57_vm0, %v883_v49  ;;  %v859_v33 = vmul.f32 %v1684_v42, %v833_v28  ;;  %v802_v10 = vadd.f32 1e-05, %v782_v38 }
 0x305   :  { %v1154_v55 = vpop.eup %1153  ;;  %v886_v63 = vadd.f32 %v1690_v56, %v860_v8  ;;  %v836_v15 = vmul.f32 %v1152_v54, %v1611_v3  ;;  %v801_v58 = vadd.f32 1e-05, %v781_v31  ;;  %v760_v59 = vpop.xlane.xlu1 %759 }
 0x306   :  { %v757_v5 = vpop.xlane.xlu0 %756  ;;  %v885_v61 = vadd.f32 %v1690_v56, %v859_v33  ;;  %v835_v62 = vmul.f32 %v1154_v55, %v1606_v19  ;;  %1163 = vrsqrt.f32 %v802_v10  ;;  %v784_v32 = vmul.f32 0.03125, %v760_v59 }
 0x307   :  { %906 = vst.msk [vmem:[%s1838_s7 + $0x38] sm:$0xff] %vm57_vm0, %v886_v63  ;;  %v862_v0 = vmul.f32 %v1684_v42, %v836_v15  ;;  %1165 = vrsqrt.f32 %v801_v58  ;;  %v783_v2 = vmul.f32 0.03125, %v757_v5 }
 0x308   :  { %v1156_v35 = vpop.eup %1155  ;;  %905 = vst.msk [vmem:[%s1838_s7 + $0x30] sm:$0xff] %vm57_vm0, %v885_v61  ;;  %v861_v3 = vmul.f32 %v1684_v42, %v835_v62  ;;  %v804_v19 = vadd.f32 1e-05, %v784_v32 }
 0x309   :  { %v1158_v21 = vpop.eup %1157  ;;  %v888_v9 = vadd.f32 %v1690_v56, %v862_v0  ;;  %v838_v23 = vmul.f32 %v1156_v35, %v1623_v13  ;;  %v803_v24 = vadd.f32 1e-05, %v783_v2  ;;  %v766_v4 = vpop.xlane.xlu1 %765 }
 0x30a   :  { %v763_v11 = vpop.xlane.xlu0 %762  ;;  %v887_v34 = vadd.f32 %v1690_v56, %v861_v3  ;;  %v837_v41 = vmul.f32 %v1158_v21, %v1618_v6  ;;  %1167 = vrsqrt.f32 %v804_v19  ;;  %v786_v37 = vmul.f32 0.03125, %v766_v4 }
 0x30b   :  { %908 = vst.msk [vmem:[%s1838_s7 + $0x48] sm:$0xff] %vm57_vm0, %v888_v9  ;;  %v864_v22 = vmul.f32 %v1684_v42, %v838_v23  ;;  %1169 = vrsqrt.f32 %v803_v24  ;;  %v785_v45 = vmul.f32 0.03125, %v763_v11 }
 0x30c   :  { %v1160_v36 = vpop.eup %1159  ;;  %907 = vst.msk [vmem:[%s1838_s7 + $0x40] sm:$0xff] %vm57_vm0, %v887_v34  ;;  %v863_v13 = vmul.f32 %v1684_v42, %v837_v41  ;;  %v806_v6 = vadd.f32 1e-05, %v786_v37 }
 0x30d   :  { %v1162_v12 = vpop.eup %1161  ;;  %v890_v44 = vadd.f32 %v1690_v56, %v864_v22  ;;  %v840_v18 = vmul.f32 %v1160_v36, %v1635_v27  ;;  %v805_v16 = vadd.f32 1e-05, %v785_v45 }
 0x30e   :  { %v889_v47 = vadd.f32 %v1690_v56, %v863_v13  ;;  %v839_v20 = vmul.f32 %v1162_v12, %v1630_v25  ;;  %1171 = vrsqrt.f32 %v806_v6 }
 0x30f   :  { %910 = vst.msk [vmem:[%s1838_s7 + $0x58] sm:$0xff] %vm57_vm0, %v890_v44  ;;  %v866_v57 = vmul.f32 %v1684_v42, %v840_v18  ;;  %1173 = vrsqrt.f32 %v805_v16 }
 0x310   :  { %v1164_v39 = vpop.eup %1163  ;;  %909 = vst.msk [vmem:[%s1838_s7 + $0x50] sm:$0xff] %vm57_vm0, %v889_v47  ;;  %v865_v27 = vmul.f32 %v1684_v42, %v839_v20 }
 0x311   :  { %v1166_v40 = vpop.eup %1165  ;;  %v892_v25 = vadd.f32 %v1690_v56, %v866_v57  ;;  %v842_v50 = vmul.f32 %v1164_v39, %v1647_v48 }
 0x312   :  { %v891_v60 = vadd.f32 %v1690_v56, %v865_v27  ;;  %v841_v53 = vmul.f32 %v1166_v40, %v1642_v43 }
 0x313   :  { %912 = vst.msk [vmem:[%s1838_s7 + $0x68] sm:$0xff] %vm57_vm0, %v892_v25  ;;  %v868_v52 = vmul.f32 %v1684_v42, %v842_v50 }
 0x314   :  { %v1168_v26 = vpop.eup %1167  ;;  %911 = vst.msk [vmem:[%s1838_s7 + $0x60] sm:$0xff] %vm57_vm0, %v891_v60  ;;  %v867_v7 = vmul.f32 %v1684_v42, %v841_v53 }
 0x315   :  { %v1170_v48 = vpop.eup %1169  ;;  %v894_v46 = vadd.f32 %v1690_v56, %v868_v52  ;;  %v844_v43 = vmul.f32 %v1168_v26, %v1659_v30 }
 0x316   :  { %v893_v1 = vadd.f32 %v1690_v56, %v867_v7  ;;  %v843_v29 = vmul.f32 %v1170_v48, %v1654_v51 }
 0x317   :  { %914 = vst.msk [vmem:[%s1838_s7 + $0x78] sm:$0xff] %vm57_vm0, %v894_v46  ;;  %v870_v49 = vmul.f32 %v1684_v42, %v844_v43 }
 0x318   :  { %v1172_v28 = vpop.eup %1171  ;;  %913 = vst.msk [vmem:[%s1838_s7 + $0x70] sm:$0xff] %vm57_vm0, %v893_v1  ;;  %v869_v38 = vmul.f32 %v1684_v42, %v843_v29 }
 0x319   :  { %v1174_v30 = vpop.eup %1173  ;;  %v896_v8 = vadd.f32 %v1690_v56, %v870_v49  ;;  %v846_v51 = vmul.f32 %v1172_v28, %v1671_v17 }
 0x31a   :  { %v895_v31 = vadd.f32 %v1690_v56, %v869_v38  ;;  %v845_v54 = vmul.f32 %v1174_v30, %v1666_v14 }
 0x31b   :  { %916 = vst.msk [vmem:[%s1838_s7 + $0x88] sm:$0xff] %vm57_vm0, %v896_v8  ;;  %v872_v33 = vmul.f32 %v1684_v42, %v846_v51 }
 0x31c   :  { %915 = vst.msk [vmem:[%s1838_s7 + $0x80] sm:$0xff] %vm57_vm0, %v895_v31  ;;  %v871_v10 = vmul.f32 %v1684_v42, %v845_v54 }
 0x31d   :  { %v898_v17 = vadd.f32 %v1690_v56, %v872_v33 }
 0x31e   :  { %v897_v55 = vadd.f32 %v1690_v56, %v871_v10 }
 0x31f   :  { %918 = vst.msk [vmem:[%s1838_s7 + $0x98] sm:$0xff] %vm57_vm0, %v898_v17 }
 0x320   :  { %917 = vst.msk [vmem:[%s1838_s7 + $0x90] sm:$0xff] %vm57_vm0, %v897_v55 }

// kernel: deformable_transformer_forward.20
= control target key start
LH: loop header
LB: loop body
LE: loop exit
PB: predicated region body
PF: predicated region fallthrough
CT: control target
= control target key end

     0   :  { %s2521_s24 = smov 0   ;;  %s2861_s0 = inlined_call_operand.vmem [shape: f32[2,4,80,80], index: 0, kind: input, shape index: {}]   ;;  %s2862_s1 = inlined_call_operand.vmem [shape: f32[2,4,80,8], index: 1, kind: input, shape index: {}]   ;;  %s2863_s2 = inlined_call_operand.vmem [shape: f32[32,32], index: 2, kind: input, shape index: {}]   ;;  %s2864_s3 = inlined_call_operand.vmem [shape: f32[1,32], index: 3, kind: input, shape index: {}]   ;;  %s2865_s4 = inlined_call_operand.vmem [shape: f32[2,80,32], index: 4, kind: input, shape index: {}]   ;;  %s2866_s5 = inlined_call_operand.vmem [shape: f32[1,32], index: 5, kind: input, shape index: {}]   ;;  %s2867_s6 = inlined_call_operand.vmem [shape: f32[1,32], index: 6, kind: input, shape index: {}]   ;;  %s2868_s7 = inlined_call_operand.vmem [shape: f32[2,80,32], index: 7, kind: output, shape index: {}]  }
   0x1 LB: > { %s1887_s25 = sadd.s32 4294967295, %s2479_s24   ;;  %p1891_p0 = scmp.ge.s32.totalorder %s2479_s24, 1  ;;  %s2479_s24 = sphi %s2521_s24, %s17_s24  }
   0x2   : > { %p257_p1 = scmp.lt.s32.totalorder %s2479_s24, 3 }
   0x4   : > { %p258_p2 = pnand %p1891_p0, %p257_p1 }
   0x5   : > { %v399_v0 = vld [vmem:[%s2863_s2] sm:$0xff] (!%p258_p2)  ;;  %p299_p3 = scmp.lt.s32.totalorder (!%p258_p2), %s1887_s25, 1  ;;  %v400_v1 = vld [vmem:[%s2863_s2 + $0x8] sm:$0xff] (!%p258_p2)  ;;  %vm430_vm0 = vcmask (!%p258_p2), 64512   ;;  %v401_v5 = vld [vmem:[%s2863_s2 + $0x10] sm:$0xff] (!%p258_p2)  ;;  %vm576_vm1 = vcmask (!%p258_p2), 654336  }
   0x6   : > { %261 = sbr.rel (%p258_p2) target bundleno = 863 (0x35f), region = 48  ;;  %2105 = vmatprep.subr.mxu0 (!%p258_p2), %v399_v0  ;;  %v402_v16 = vld [vmem:[%s2863_s2 + $0x18] sm:$0xff] (!%p258_p2)  ;;  %vm1634_vm2 = vcmask (!%p258_p2), 261120  }
   0x7   : > { %2106 = vmatpush3.msra.mxu0 (!%p258_p2), %v399_v0 }
   0x8   : > { %2157 = vmatprep.subr.mxu0 (!%p258_p2), %v400_v1 }
   0xd   : > { %s2870_s25 = smov (!%p299_p3, %s1887_s25), 1 }
   0xe   : > { %s2443_s30 = smul.u32 320, %s2870_s25 }
   0xf   : > { %s2444_s18 = smul.u32 80, %s2870_s25 }
  0x10   : > { %s2543_s10 = scalar_lea.vmem %s2862_s1, %s2443_s30  ;;  %s2636_s17 = scalar_lea.vmem %s2861_s0, %s2443_s30 }
  0x11   : > { %v359_v2 = vld [vmem:[%s2543_s10] sm:$0xff]  ;;  %v360_v3 = vld [vmem:[%s2543_s10 + $0x8] sm:$0xff]  ;;  %v361_v4 = vld [vmem:[%s2543_s10 + $0x10] sm:$0xff]  ;;  %s2724_s21 = scalar_lea.vmem %s2865_s4, %s2444_s18  ;;  %s2818_s9 = scalar_lea.vmem %s2868_s7, %s2444_s18 }
  0x12   : > { %2107 = vmatprep.mubr.msk.f32.mxu0 %vm430_vm0, %v359_v2  ;;  %v362_v6 = vld [vmem:[%s2543_s10 + $0x18] sm:$0xff]  ;;  %v363_v7 = vld [vmem:[%s2543_s10 + $0x20] sm:$0xff]  ;;  %v364_v8 = vld [vmem:[%s2543_s10 + $0x28] sm:$0xff] }
  0x13   : > { %2108 = vmatmul.mubr.msk.f32.vlgmr.msra.gmra.mrb[0].mxu0 %vm430_vm0, %v360_v3  ;;  %v365_v9 = vld [vmem:[%s2543_s10 + $0x30] sm:$0xff]  ;;  %v366_v10 = vld [vmem:[%s2543_s10 + $0x38] sm:$0xff]  ;;  %v367_v11 = vld [vmem:[%s2543_s10 + $0x40] sm:$0xff] }
  0x14   : > { %2158 = vmatpush3.msra.mxu0 %v400_v1  ;;  %2110 = vmatprep.mubr.msk.f32.mxu0 %vm430_vm0, %v361_v4  ;;  %v368_v12 = vld [vmem:[%s2543_s10 + $0x48] sm:$0xff]  ;;  %v369_v13 = vld [vmem:[%s2543_s10 + $0x50] sm:$0xff]  ;;  %v370_v14 = vld [vmem:[%s2543_s10 + $0x58] sm:$0xff] }
  0x15   : > { %2209 = vmatprep.subr.mxu0 %v401_v5  ;;  %v371_v15 = vld [vmem:[%s2543_s10 + $0x60] sm:$0xff]  ;;  %v372_v17 = vld [vmem:[%s2543_s10 + $0x68] sm:$0xff]  ;;  %v373_v18 = vld [vmem:[%s2543_s10 + $0x70] sm:$0xff] }
  0x16   : > { %v374_v19 = vld [vmem:[%s2543_s10 + $0x78] sm:$0xff]  ;;  %v375_v20 = vld [vmem:[%s2543_s10 + $0x80] sm:$0xff]  ;;  %v376_v21 = vld [vmem:[%s2543_s10 + $0x88] sm:$0xff] }
  0x17   : > { %2111 = vmatmul.mubr.msk.f32.gmra.mrb[2].mxu0 %vm430_vm0, %v362_v6  ;;  %v377_v22 = vld [vmem:[%s2543_s10 + $0x90] sm:$0xff]  ;;  %v378_v23 = vld [vmem:[%s2543_s10 + $0x98] sm:$0xff]  ;;  %v379_v24 = vld [vmem:[%s2543_s10 + $0xa0] sm:$0xff] }
  0x18   : > { %2113 = vmatprep.mubr.msk.f32.mxu0 %vm430_vm0, %v363_v7  ;;  %v380_v25 = vld [vmem:[%s2543_s10 + $0xa8] sm:$0xff]  ;;  %v381_v26 = vld [vmem:[%s2543_s10 + $0xb0] sm:$0xff]  ;;  %v382_v27 = vld [vmem:[%s2543_s10 + $0xb8] sm:$0xff] }
  0x19   : > { %v383_v28 = vld [vmem:[%s2543_s10 + $0xc0] sm:$0xff]  ;;  %v384_v29 = vld [vmem:[%s2543_s10 + $0xc8] sm:$0xff]  ;;  %v385_v30 = vld [vmem:[%s2543_s10 + $0xd0] sm:$0xff] }
  0x1a   : > { %v386_v31 = vld [vmem:[%s2543_s10 + $0xd8] sm:$0xff]  ;;  %v387_v32 = vld [vmem:[%s2543_s10 + $0xe0] sm:$0xff]  ;;  %v388_v33 = vld [vmem:[%s2543_s10 + $0xe8] sm:$0xff] }
  0x1b   : > { %2114 = vmatmul.mubr.msk.f32.gmra.mrb[4].mxu0 %vm430_vm0, %v364_v8  ;;  %v389_v34 = vld [vmem:[%s2543_s10 + $0xf0] sm:$0xff]  ;;  %v390_v35 = vld [vmem:[%s2543_s10 + $0xf8] sm:$0xff]  ;;  %v391_v36 = vld [vmem:[%s2543_s10 + $0x100] sm:$0xff] }
  0x1c   : > { %2116 = vmatprep.mubr.msk.f32.mxu0 %vm430_vm0, %v365_v9  ;;  %v392_v37 = vld [vmem:[%s2543_s10 + $0x108] sm:$0xff]  ;;  %v393_v38 = vld [vmem:[%s2543_s10 + $0x110] sm:$0xff]  ;;  %v394_v39 = vld [vmem:[%s2543_s10 + $0x118] sm:$0xff] }
  0x1d   : > { %v395_v40 = vld [vmem:[%s2543_s10 + $0x120] sm:$0xff]  ;;  %v396_v41 = vld [vmem:[%s2543_s10 + $0x128] sm:$0xff]  ;;  %v397_v42 = vld [vmem:[%s2543_s10 + $0x130] sm:$0xff] }
  0x1e   : > { %v398_v43 = vld [vmem:[%s2543_s10 + $0x138] sm:$0xff]  ;;  %v319_v44 = vld [vmem:[%s2636_s17] sm:$0xff]  ;;  %v349_v45 = vld [vmem:[%s2636_s17 + $0xf0] sm:$0xff] }
  0x1f   : > { %2117 = vmatmul.mubr.msk.f32.gmra.mrb[6].mxu0 %vm430_vm0, %v366_v10  ;;  %2142 = vmatprep.mubr.msk.f32.mxu1 %vm576_vm1, %v319_v44  ;;  %v320_v63 = vld [vmem:[%s2636_s17 + $0x8] sm:$0xff]  ;;  %v321_v1 = vld [vmem:[%s2636_s17 + $0x10] sm:$0xff]  ;;  %v322_v4 = vld [vmem:[%s2636_s17 + $0x18] sm:$0xff] }
  0x20   : > { %2119 = vmatprep.mubr.msk.f32.mxu0 %vm430_vm0, %v367_v11  ;;  %v323_v6 = vld [vmem:[%s2636_s17 + $0x20] sm:$0xff]  ;;  %v324_v9 = vld [vmem:[%s2636_s17 + $0x28] sm:$0xff]  ;;  %v325_v11 = vld [vmem:[%s2636_s17 + $0x30] sm:$0xff] }
  0x21   : > { %v338_v44 = vld [vmem:[%s2636_s17 + $0x98] sm:$0xff] }
  0x23   : > { %2120 = vmatmul.mubr.msk.f32.gmra.mrb[8].mxu0 %vm430_vm0, %v368_v12 }
  0x24   : > { %2159 = vmatprep.mubr.msk.f32.mxu0 %vm430_vm0, %v369_v13 }
  0x27   : > { %2160 = vmatmul.mubr.msk.f32.vlgmr.msra.gmra.mrb[10].mxu0 %vm430_vm0, %v370_v14  ;;  %v326_v14 = vld [vmem:[%s2636_s17 + $0x38] sm:$0xff] }
  0x28   : > { %2210 = vmatpush3.msra.mxu0 %v401_v5  ;;  %2162 = vmatprep.mubr.msk.f32.mxu0 %vm430_vm0, %v371_v15 }
  0x29   : > { %2261 = vmatprep.subr.mxu0 %v402_v16 }
  0x2b   : > { %2163 = vmatmul.mubr.msk.f32.gmra.mrb[12].mxu0 %vm430_vm0, %v372_v17 }
  0x2c   : > { %2165 = vmatprep.mubr.msk.f32.mxu0 %vm430_vm0, %v373_v18 }
  0x2f   : > { %2166 = vmatmul.mubr.msk.f32.gmra.mrb[14].mxu0 %vm430_vm0, %v374_v19  ;;  %v328_v19 = vld [vmem:[%s2636_s17 + $0x48] sm:$0xff] }
  0x30   : > { %2168 = vmatprep.mubr.msk.f32.mxu0 %vm430_vm0, %v375_v20 }
  0x33   : > { %2169 = vmatmul.mubr.msk.f32.gmra.mrb[16].mxu0 %vm430_vm0, %v376_v21  ;;  %v329_v21 = vld [vmem:[%s2636_s17 + $0x50] sm:$0xff] }
  0x34   : > { %2171 = vmatprep.mubr.msk.f32.mxu0 %vm430_vm0, %v377_v22 }
  0x37   : > { %2172 = vmatmul.mubr.msk.f32.gmra.mrb[18].mxu0 %vm430_vm0, %v378_v23 }
  0x38   : > { %2211 = vmatprep.mubr.msk.f32.mxu0 %vm430_vm0, %v379_v24  ;;  %v330_v24 = vld [vmem:[%s2636_s17 + $0x58] sm:$0xff] }
  0x3b   : > { %2212 = vmatmul.mubr.msk.f32.vlgmr.msra.gmra.mrb[20].mxu0 %vm430_vm0, %v380_v25 }
  0x3c   : > { %2262 = vmatpush3.msra.mxu0 %v402_v16  ;;  %2214 = vmatprep.mubr.msk.f32.mxu0 %vm430_vm0, %v381_v26  ;;  %v327_v16 = vld [vmem:[%s2636_s17 + $0x40] sm:$0xff] }
  0x3d   : > { %v331_v26 = vld [vmem:[%s2636_s17 + $0x60] sm:$0xff] }
  0x3f   : > { %2215 = vmatmul.mubr.msk.f32.gmra.mrb[22].mxu0 %vm430_vm0, %v382_v27 }
  0x40   : > { %2217 = vmatprep.mubr.msk.f32.mxu0 %vm430_vm0, %v383_v28 }
  0x43   : > { %2218 = vmatmul.mubr.msk.f32.gmra.mrb[24].mxu0 %vm430_vm0, %v384_v29  ;;  %v332_v29 = vld [vmem:[%s2636_s17 + $0x68] sm:$0xff] }
  0x44   : > { %2220 = vmatprep.mubr.msk.f32.mxu0 %vm430_vm0, %v385_v30 }
  0x47   : > { %2221 = vmatmul.mubr.msk.f32.gmra.mrb[26].mxu0 %vm430_vm0, %v386_v31  ;;  %v333_v31 = vld [vmem:[%s2636_s17 + $0x70] sm:$0xff] }
  0x48   : > { %2223 = vmatprep.mubr.msk.f32.mxu0 %vm430_vm0, %v387_v32 }
  0x4b   : > { %2224 = vmatmul.mubr.msk.f32.gmra.mrb[28].mxu0 %vm430_vm0, %v388_v33 }
  0x4c   : > { %2263 = vmatprep.mubr.msk.f32.mxu0 %vm430_vm0, %v389_v34  ;;  %v334_v34 = vld [vmem:[%s2636_s17 + $0x78] sm:$0xff] }
  0x4f   : > { %2264 = vmatmul.mubr.msk.f32.vlgmr.msra.gmra.mrb[30].mxu0 %vm430_vm0, %v390_v35 }
  0x50   : > { %2266 = vmatprep.mubr.msk.f32.mxu0 %vm430_vm0, %v391_v36  ;;  %v335_v36 = vld [vmem:[%s2636_s17 + $0x80] sm:$0xff] }
  0x53   : > { %2267 = vmatmul.mubr.msk.f32.gmra.mrb[32].mxu0 %vm430_vm0, %v392_v37 }
  0x54   : > { %2269 = vmatprep.mubr.msk.f32.mxu0 %vm430_vm0, %v393_v38 }
  0x57   : > { %2270 = vmatmul.mubr.msk.f32.gmra.mrb[34].mxu0 %vm430_vm0, %v394_v39  ;;  %v336_v39 = vld [vmem:[%s2636_s17 + $0x88] sm:$0xff] }
  0x58   : > { %2272 = vmatprep.mubr.msk.f32.mxu0 %vm430_vm0, %v395_v40 }
  0x5b   : > { %2273 = vmatmul.mubr.msk.f32.gmra.mrb[36].mxu0 %vm430_vm0, %v396_v41  ;;  %v337_v41 = vld [vmem:[%s2636_s17 + $0x90] sm:$0xff] }
  0x5c   : > { %2275 = vmatprep.mubr.msk.f32.mxu0 %vm430_vm0, %v397_v42 }
  0x5f   : > { %2276 = vmatmul.mubr.msk.f32.gmra.mrb[38].mxu0 %vm430_vm0, %v398_v43 }
  0x60   : > { %2298 = vmatprep.mubr.msk.f32.mxu0 %vm576_vm1, %v349_v45 }
  0xe6   : > { %v2109_v46 = vpop.f32.mrb[0].mxu0 }
  0xe7   : > { %v527_v47 = vpop.f32.mrb[1].mxu0 }
  0xe8   : > { %v2313_v48 = vpack.c.bf16 %v2109_v46, %v527_v47  ;;  %v339_v46 = vld [vmem:[%s2636_s17 + $0xa0] sm:$0xff] }
  0xea   : > { %v2112_v49 = vpop.f32.mrb[2].mxu0  ;;  %2314 = vmatprep.subr.bf16.mxu1 %v2313_v48 }
  0xeb   : > { %v537_v50 = vpop.f32.mrb[3].mxu0  ;;  %2316 = vmatpush3.bf16.msra.mxu1 %v2313_v48 }
  0xec   : > { %v2317_v51 = vpack.c.bf16 %v2112_v49, %v537_v50  ;;  %v340_v49 = vld [vmem:[%s2636_s17 + $0xa8] sm:$0xff] }
  0xee   : > { %v2115_v52 = vpop.f32.mrb[4].mxu0  ;;  %2318 = vmatprep.subr.bf16.mxu1 %v2317_v51 }
  0xef   : > { %v547_v53 = vpop.f32.mrb[5].mxu0  ;;  %2320 = vmatpush3.bf16.msra.mxu1 %v2317_v51  ;;  %v341_v51 = vld [vmem:[%s2636_s17 + $0xb0] sm:$0xff] }
  0xf0   : > { %v2321_v54 = vpack.c.bf16 %v2115_v52, %v547_v53 }
  0xf2   : > { %v2118_v55 = vpop.f32.mrb[6].mxu0  ;;  %2322 = vmatprep.subr.bf16.mxu1 %v2321_v54 }
  0xf3   : > { %v557_v56 = vpop.f32.mrb[7].mxu0  ;;  %2324 = vmatpush3.bf16.msra.mxu1 %v2321_v54  ;;  %v342_v54 = vld [vmem:[%s2636_s17 + $0xb8] sm:$0xff] }
  0xf4   : > { %v2325_v57 = vpack.c.bf16 %v2118_v55, %v557_v56  ;;  %v343_v56 = vld [vmem:[%s2636_s17 + $0xc0] sm:$0xff] }
  0xf6   : > { %v2121_v58 = vpop.f32.mrb[8].mxu0  ;;  %2326 = vmatprep.subr.bf16.mxu1 %v2325_v57 }
  0xf7   : > { %v567_v59 = vpop.f32.mrb[9].mxu0  ;;  %2328 = vmatpush3.bf16.msra.mxu1 %v2325_v57 }
  0xf8   : > { %v2329_v60 = vpack.c.bf16 %v2121_v58, %v567_v59  ;;  %v344_v59 = vld [vmem:[%s2636_s17 + $0xc8] sm:$0xff] }
  0xfa   : > { %2330 = vmatprep.subr.bf16.mxu1 %v2329_v60  ;;  %v2161_v61 = vpop.f32.mrb[10].mxu0 }
  0xfb   : > { %2332 = vmatpush3.bf16.msra.mxu1 %v2329_v60  ;;  %v828_v62 = vpop.f32.mrb[11].mxu0 }
  0xfc   : > { %v2333_v0 = vpack.c.bf16 %v2161_v61, %v828_v62  ;;  %v345_v61 = vld [vmem:[%s2636_s17 + $0xd0] sm:$0xff] }
  0xfe   : > { %2143 = vmatmul.mubr.msk.f32.vlgmr.msra.gmra.mrb[0].mxu1 %vm576_vm1, %v320_v63  ;;  %v2164_v2 = vpop.f32.mrb[12].mxu0  ;;  %2334 = vmatprep.subr.bf16.mxu1 %v2333_v0 }
  0xff   : > { %v838_v3 = vpop.f32.mrb[13].mxu0  ;;  %2336 = vmatpush3.bf16.msra.mxu1 %v2333_v0  ;;  %2145 = vmatprep.mubr.msk.f32.mxu1 %vm576_vm1, %v321_v1  ;;  %v346_v0 = vld [vmem:[%s2636_s17 + $0xd8] sm:$0xff] }
 0x100   : > { %v2337_v5 = vpack.c.bf16 %v2164_v2, %v838_v3  ;;  %v347_v2 = vld [vmem:[%s2636_s17 + $0xe0] sm:$0xff] }
 0x102   : > { %2146 = vmatmul.mubr.msk.f32.gmra.mrb[2].mxu1 %vm576_vm1, %v322_v4  ;;  %v2167_v7 = vpop.f32.mrb[14].mxu0  ;;  %2338 = vmatprep.subr.bf16.mxu1 %v2337_v5 }
 0x103   : > { %v848_v8 = vpop.f32.mrb[15].mxu0  ;;  %2340 = vmatpush3.bf16.msra.mxu1 %v2337_v5  ;;  %2148 = vmatprep.mubr.msk.f32.mxu1 %vm576_vm1, %v323_v6  ;;  %v348_v5 = vld [vmem:[%s2636_s17 + $0xe8] sm:$0xff] }
 0x104   : > { %v2341_v10 = vpack.c.bf16 %v2167_v7, %v848_v8  ;;  %v353_v7 = vld [vmem:[%s2636_s17 + $0x110] sm:$0xff]  ;;  %v350_v8 = vld [vmem:[%s2636_s17 + $0xf8] sm:$0xff] }
 0x106   : > { %2149 = vmatmul.mubr.msk.f32.gmra.mrb[4].mxu1 %vm576_vm1, %v324_v9  ;;  %v2170_v12 = vpop.f32.mrb[16].mxu0  ;;  %2342 = vmatprep.subr.bf16.mxu1 %v2341_v10  ;;  %v354_v9 = vld [vmem:[%s2636_s17 + $0x118] sm:$0xff] }
 0x107   : > { %v858_v13 = vpop.f32.mrb[17].mxu0  ;;  %2344 = vmatpush3.bf16.msra.mxu1 %v2341_v10  ;;  %2151 = vmatprep.mubr.msk.f32.mxu1 %vm576_vm1, %v325_v11  ;;  %v351_v10 = vld [vmem:[%s2636_s17 + $0x100] sm:$0xff] }
 0x108   : > { %v2345_v15 = vpack.c.bf16 %v2170_v12, %v858_v13  ;;  %v355_v11 = vld [vmem:[%s2636_s17 + $0x120] sm:$0xff]  ;;  %v352_v12 = vld [vmem:[%s2636_s17 + $0x108] sm:$0xff] }
 0x109   : > { %v356_v13 = vld [vmem:[%s2636_s17 + $0x128] sm:$0xff] }
 0x10a   : > { %2152 = vmatmul.mubr.msk.f32.gmra.mrb[6].mxu1 %vm576_vm1, %v326_v14  ;;  %v2173_v17 = vpop.f32.mrb[18].mxu0  ;;  %2346 = vmatprep.subr.bf16.mxu1 %v2345_v15  ;;  %v357_v14 = vld [vmem:[%s2636_s17 + $0x130] sm:$0xff] }
 0x10b   : > { %v868_v18 = vpop.f32.mrb[19].mxu0  ;;  %2348 = vmatpush3.bf16.msra.mxu1 %v2345_v15  ;;  %2154 = vmatprep.mubr.msk.f32.mxu1 %vm576_vm1, %v327_v16  ;;  %v358_v15 = vld [vmem:[%s2636_s17 + $0x138] sm:$0xff] }
 0x10c   : > { %v2349_v20 = vpack.c.bf16 %v2173_v17, %v868_v18 }
 0x10e   : > { %2155 = vmatmul.mubr.msk.f32.gmra.mrb[8].mxu1 %vm576_vm1, %v328_v19  ;;  %2350 = vmatprep.subr.bf16.mxu1 %v2349_v20  ;;  %v2213_v22 = vpop.f32.mrb[20].mxu0 }
 0x10f   : > { %2352 = vmatpush3.bf16.msra.mxu1 %v2349_v20  ;;  %v1128_v23 = vpop.f32.mrb[21].mxu0  ;;  %2194 = vmatprep.mubr.msk.f32.mxu1 %vm576_vm1, %v329_v21  ;;  %v404_v20 = vld [vmem:[%s2724_s21 + $0x8] sm:$0xff]  ;;  %v1896_v21 = vld [vmem:[%s2864_s3] ss:$0 sm:$0xff] }
 0x110   : > { %v2353_v25 = vpack.c.bf16 %v2213_v22, %v1128_v23  ;;  %v403_v22 = vld [vmem:[%s2724_s21] sm:$0xff]  ;;  %v421_v23 = vadd.f32 %v1896_v21, %v404_v20 }
 0x112   : > { %2195 = vmatmul.mubr.msk.f32.vlgmr.msra.gmra.mrb[0].mxu1 %vm576_vm1, %v330_v24  ;;  %v2216_v27 = vpop.f32.mrb[22].mxu0  ;;  %2354 = vmatprep.subr.bf16.mxu1 %v2353_v25  ;;  %v408_v24 = vld [vmem:[%s2724_s21 + $0x28] sm:$0xff] }
 0x113   : > { %v1138_v28 = vpop.f32.mrb[23].mxu0  ;;  %2356 = vmatpush3.bf16.msra.mxu1 %v2353_v25  ;;  %2197 = vmatprep.mubr.msk.f32.mxu1 %vm576_vm1, %v331_v26  ;;  %v420_v25 = vadd.f32 %v1896_v21, %v403_v22  ;;  %v406_v26 = vld [vmem:[%s2724_s21 + $0x18] sm:$0xff] }
 0x114   : > { %v2357_v30 = vpack.c.bf16 %v2216_v27, %v1138_v28  ;;  %v405_v27 = vld [vmem:[%s2724_s21 + $0x10] sm:$0xff]  ;;  %v425_v28 = vadd.f32 %v1896_v21, %v408_v24 }
 0x116   : > { %2198 = vmatmul.mubr.msk.f32.gmra.mrb[2].mxu1 %vm576_vm1, %v332_v29  ;;  %v2219_v32 = vpop.f32.mrb[24].mxu0  ;;  %2358 = vmatprep.subr.bf16.mxu1 %v2357_v30 }
 0x117   : > { %v1148_v33 = vpop.f32.mrb[25].mxu0  ;;  %2360 = vmatpush3.bf16.msra.mxu1 %v2357_v30  ;;  %2200 = vmatprep.mubr.msk.f32.mxu1 %vm576_vm1, %v333_v31  ;;  %v423_v30 = vadd.f32 %v1896_v21, %v406_v26 }
 0x118   : > { %v2361_v35 = vpack.c.bf16 %v2219_v32, %v1148_v33  ;;  %v422_v32 = vadd.f32 %v1896_v21, %v405_v27 }
 0x11a   : > { %2201 = vmatmul.mubr.msk.f32.gmra.mrb[4].mxu1 %vm576_vm1, %v334_v34  ;;  %v2222_v37 = vpop.f32.mrb[26].mxu0  ;;  %2362 = vmatprep.subr.bf16.mxu1 %v2361_v35  ;;  %v407_v34 = vld [vmem:[%s2724_s21 + $0x20] sm:$0xff] }
 0x11b   : > { %v1158_v38 = vpop.f32.mrb[27].mxu0  ;;  %2364 = vmatpush3.bf16.msra.mxu1 %v2361_v35  ;;  %2203 = vmatprep.mubr.msk.f32.mxu1 %vm576_vm1, %v335_v36 }
 0x11c   : > { %v2365_v40 = vpack.c.bf16 %v2222_v37, %v1158_v38  ;;  %v410_v38 = vld [vmem:[%s2724_s21 + $0x38] sm:$0xff] }
 0x11e   : > { %2204 = vmatmul.mubr.msk.f32.gmra.mrb[6].mxu1 %vm576_vm1, %v336_v39  ;;  %v2225_v42 = vpop.f32.mrb[28].mxu0  ;;  %2366 = vmatprep.subr.bf16.mxu1 %v2365_v40 }
 0x11f   : > { %v1168_v43 = vpop.f32.mrb[29].mxu0  ;;  %2368 = vmatpush3.bf16.msra.mxu1 %v2365_v40  ;;  %2206 = vmatprep.mubr.msk.f32.mxu1 %vm576_vm1, %v337_v41 }
 0x120   : > { %v2369_v45 = vpack.c.bf16 %v2225_v42, %v1168_v43  ;;  %v424_v43 = vadd.f32 %v1896_v21, %v407_v34 }
 0x122   : > { %2207 = vmatmul.mubr.msk.f32.gmra.mrb[8].mxu1 %vm576_vm1, %v338_v44  ;;  %2370 = vmatprep.subr.bf16.mxu1 %v2369_v45  ;;  %v2265_v47 = vpop.f32.mrb[30].mxu0 }
 0x123   : > { %2372 = vmatpush3.bf16.msra.mxu1 %v2369_v45  ;;  %v1428_v48 = vpop.f32.mrb[31].mxu0  ;;  %2246 = vmatprep.mubr.msk.f32.mxu1 %vm576_vm1, %v339_v46 }
 0x124   : > { %v2373_v50 = vpack.c.bf16 %v2265_v47, %v1428_v48  ;;  %v427_v48 = vadd.f32 %v1896_v21, %v410_v38 }
 0x126   : > { %2247 = vmatmul.mubr.msk.f32.vlgmr.msra.gmra.mrb[0].mxu1 %vm576_vm1, %v340_v49  ;;  %v2268_v52 = vpop.f32.mrb[32].mxu0  ;;  %2374 = vmatprep.subr.bf16.mxu0 %v2373_v50  ;;  %v409_v49 = vld [vmem:[%s2724_s21 + $0x30] sm:$0xff] }
 0x127   : > { %2393 = vmatprep.subr.bf16.mxu1 %v2373_v50  ;;  %v1438_v53 = vpop.f32.mrb[33].mxu0  ;;  %2376 = vmatpush3.bf16.msra.mxu0 %v2373_v50 }
 0x128   : > { %v2377_v55 = vpack.c.bf16 %v2268_v52, %v1438_v53  ;;  %2398 = vmatpush3.bf16.msra.mxu1 %v2373_v50  ;;  %2249 = vmatprep.mubr.msk.f32.mxu1 %vm576_vm1, %v341_v51 }
 0x12a   : > { %2250 = vmatmul.mubr.msk.f32.gmra.mrb[2].mxu1 %vm576_vm1, %v342_v54  ;;  %v2271_v57 = vpop.f32.mrb[34].mxu0  ;;  %2378 = vmatprep.subr.bf16.mxu0 %v2377_v55 }
 0x12b   : > { %2394 = vmatprep.subr.bf16.mxu1 %v2377_v55  ;;  %v1448_v58 = vpop.f32.mrb[35].mxu0  ;;  %2380 = vmatpush3.bf16.msra.mxu0 %v2377_v55 }
 0x12c   : > { %v2381_v60 = vpack.c.bf16 %v2271_v57, %v1448_v58  ;;  %2399 = vmatpush3.bf16.msra.mxu1 %v2377_v55  ;;  %2252 = vmatprep.mubr.msk.f32.mxu1 %vm576_vm1, %v343_v56  ;;  %v426_v56 = vadd.f32 %v1896_v21, %v409_v49 }
 0x12e   : > { %2253 = vmatmul.mubr.msk.f32.gmra.mrb[4].mxu1 %vm576_vm1, %v344_v59  ;;  %v2274_v62 = vpop.f32.mrb[36].mxu0  ;;  %2382 = vmatprep.subr.bf16.mxu0 %v2381_v60 }
 0x12f   : > { %2395 = vmatprep.subr.bf16.mxu1 %v2381_v60  ;;  %v1458_v63 = vpop.f32.mrb[37].mxu0  ;;  %2384 = vmatpush3.bf16.msra.mxu0 %v2381_v60 }
 0x130   : > { %v2385_v1 = vpack.c.bf16 %v2274_v62, %v1458_v63  ;;  %2400 = vmatpush3.bf16.msra.mxu1 %v2381_v60  ;;  %2255 = vmatprep.mubr.msk.f32.mxu1 %vm576_vm1, %v345_v61  ;;  %v411_v60 = vld [vmem:[%s2724_s21 + $0x40] sm:$0xff]  ;;  %v412_v61 = vld [vmem:[%s2724_s21 + $0x48] sm:$0xff] }
 0x132   : > { %2256 = vmatmul.mubr.msk.f32.gmra.mrb[6].mxu1 %vm576_vm1, %v346_v0  ;;  %v2277_v3 = vpop.f32.mrb[38].mxu0  ;;  %2386 = vmatprep.subr.bf16.mxu0 %v2385_v1 }
 0x133   : > { %2396 = vmatprep.subr.bf16.mxu1 %v2385_v1  ;;  %v1468_v4 = vpop.f32.mrb[39].mxu0  ;;  %2388 = vmatpush3.bf16.msra.mxu0 %v2385_v1 }
 0x134   : > { %v2389_v6 = vpack.c.bf16 %v2277_v3, %v1468_v4  ;;  %2401 = vmatpush3.bf16.msra.mxu1 %v2385_v1  ;;  %2258 = vmatprep.mubr.msk.f32.mxu1 %vm576_vm1, %v347_v2  ;;  %v428_v1 = vadd.f32 %v1896_v21, %v411_v60  ;;  %v429_v3 = vadd.f32 %v1896_v21, %v412_v61 }
 0x136   : > { %2259 = vmatmul.mubr.msk.f32.gmra.mrb[8].mxu1 %vm576_vm1, %v348_v5  ;;  %2390 = vmatprep.subr.bf16.mxu0 %v2389_v6 }
 0x137   : > { %2397 = vmatprep.subr.bf16.mxu1 %v2389_v6  ;;  %2392 = vmatpush3.bf16.msra.mxu0 %v2389_v6 }
 0x138   : > { %2402 = vmatpush3.bf16.msra.mxu1 %v2389_v6  ;;  %2304 = vmatprep.mubr.msk.f32.mxu1 %vm576_vm1, %v353_v7 }
 0x13a   : > { %2299 = vmatmul.mubr.msk.f32.vlgmr.msra.gmra.mrb[40].mxu0 %vm576_vm1, %v350_v8 }
 0x13b   : > { %2305 = vmatmul.mubr.msk.f32.vlgmr.msra.gmra.mrb[4].mxu1 %vm576_vm1, %v354_v9  ;;  %2301 = vmatprep.mubr.msk.f32.mxu0 %vm576_vm1, %v351_v10 }
 0x13c   : > { %2307 = vmatprep.mubr.msk.f32.mxu1 %vm576_vm1, %v355_v11 }
 0x13e   : > { %2302 = vmatmul.mubr.msk.f32.gmra.mrb[42].mxu0 %vm576_vm1, %v352_v12 }
 0x13f   : > { %2308 = vmatmul.mubr.msk.f32.gmra.mrb[6].mxu1 %vm576_vm1, %v356_v13 }
 0x140   : > { %2310 = vmatprep.mubr.msk.f32.mxu1 %vm576_vm1, %v357_v14 }
 0x143   : > { %2311 = vmatmul.mubr.msk.f32.gmra.mrb[8].mxu1 %vm576_vm1, %v358_v15 }
 0x1f9   : > { %v2248_v16 = vpop.f32.mrb[0].mxu1 }
 0x1fa   : > { %v1273_v17 = vpop.f32.mrb[1].mxu1  ;;  %v2403_v29 = vadd.f32 %v2248_v16, %v421_v23 }
 0x1fb   : > { %v2405_v31 = vadd.f32 %v1273_v17, %v420_v25 }
 0x1fd   : > { %v2251_v18 = vpop.f32.mrb[2].mxu1 }
 0x1fe   : > { %v1283_v19 = vpop.f32.mrb[3].mxu1  ;;  %v2407_v42 = vadd.f32 %v2251_v18, %v423_v30 }
 0x1ff   : > { %v2409_v45 = vadd.f32 %v1283_v19, %v422_v32 }
 0x20d   : > { %v2300_v33 = vpop.f32.mrb[40].mxu0 }
 0x20e   : > { %v2404_v35 = vadd.f32 %v2403_v29, %v2300_v33  ;;  %v2306_v36 = vpop.f32.mrb[4].mxu1  ;;  %v1573_v37 = vpop.f32.mrb[41].mxu0 }
 0x20f   : > { %v2411_v39 = vadd.f32 %v2306_v36, %v425_v28  ;;  %v2406_v40 = vadd.f32 %v2405_v31, %v1573_v37  ;;  %v1593_v41 = vpop.f32.mrb[5].mxu1 }
 0x210   : > { %v1638_v44 = vsel %vm1634_vm2, %v2404_v35, 0.0  ;;  %v2412_v55 = vadd.f32 %v1593_v41, %v424_v43 }
 0x211   : > { %v2303_v46 = vpop.f32.mrb[42].mxu0  ;;  %1639 = vadd.xlane.f32.xlu0 %v1638_v44  ;;  %v1650_v47 = vsel %vm1634_vm2, %v2411_v39, 0.0  ;;  %v1635_v57 = vsel %vm1634_vm2, %v2406_v40, 0.0 }
 0x212   : > { %v2408_v50 = vadd.f32 %v2407_v42, %v2303_v46  ;;  %1651 = vadd.xlane.f32.xlu1 %v1650_v47  ;;  %v2309_v51 = vpop.f32.mrb[6].mxu1  ;;  %v1583_v52 = vpop.f32.mrb[43].mxu0  ;;  %v1647_v2 = vsel %vm1634_vm2, %v2412_v55, 0.0 }
 0x213   : > { %v2739_v53 = vadd.f32 %v2409_v45, %v1583_v52  ;;  %v1603_v54 = vpop.f32.mrb[7].mxu1  ;;  %v2413_v59 = vadd.f32 %v2309_v51, %v427_v48 }
 0x214   : > { %v1644_v58 = vsel %vm1634_vm2, %v2408_v50, 0.0  ;;  %v2414_v0 = vadd.f32 %v1603_v54, %v426_v56 }
 0x215   : > { %1636 = vadd.xlane.f32.xlu0 %v1635_v57  ;;  %v1656_v4 = vsel %vm1634_vm2, %v2413_v59, 0.0  ;;  %v1641_v8 = vsel %vm1634_vm2, %v2739_v53, 0.0 }
 0x216   : > { %1645 = vadd.xlane.f32.xlu1 %v1644_v58  ;;  %v2312_v62 = vpop.f32.mrb[8].mxu1  ;;  %v1653_v6 = vsel %vm1634_vm2, %v2414_v0, 0.0 }
 0x217   : > { %v1613_v63 = vpop.f32.mrb[9].mxu1  ;;  %v2415_v7 = vadd.f32 %v2312_v62, %v429_v3 }
 0x218   : > { %v2416_v5 = vadd.f32 %v1613_v63, %v428_v1 }
 0x219   : > { %1648 = vadd.xlane.f32.xlu0 %v1647_v2  ;;  %v1662_v10 = vsel %vm1634_vm2, %v2415_v7, 0.0 }
 0x21a   : > { %1657 = vadd.xlane.f32.xlu1 %v1656_v4  ;;  %v1659_v9 = vsel %vm1634_vm2, %v2416_v5, 0.0 }
 0x21d   : > { %1654 = vadd.xlane.f32.xlu0 %v1653_v6 }
 0x21e   : > { %1642 = vadd.xlane.f32.xlu1 %v1641_v8 }
 0x221   : > { %1660 = vadd.xlane.f32.xlu0 %v1659_v9 }
 0x222   : > { %1663 = vadd.xlane.f32.xlu1 %v1662_v10 }
 0x29e   : > { %v1640_v11 = vpop.xlane.xlu0 %1639 }
 0x29f   : > { %v1667_v12 = vmul.f32 0.03125, %v1640_v11  ;;  %v1652_v13 = vpop.xlane.xlu1 %1651 }
 0x2a0   : > { %v1671_v14 = vmul.f32 0.03125, %v1652_v13 }
 0x2a1   : > { %v2752_v15 = vsub.f32 %v2404_v35, %v1667_v12 }
 0x2a2   : > { %v2754_v16 = vsub.f32 %v2411_v39, %v1671_v14  ;;  %v1637_v17 = vpop.xlane.xlu0 %1636 }
 0x2a3   : > { %v1666_v18 = vmul.f32 0.03125, %v1637_v17  ;;  %v1646_v19 = vpop.xlane.xlu1 %1645  ;;  %v1687_v20 = vmul.f32 %v2752_v15, %v2752_v15 }
 0x2a4   : > { %v1669_v21 = vmul.f32 0.03125, %v1646_v19  ;;  %v1691_v24 = vmul.f32 %v2754_v16, %v2754_v16  ;;  %v2806_v19 = vld [vmem:[%s2866_s5] ss:$0 sm:$0xff] }
 0x2a5   : > { %v2758_v22 = vsub.f32 %v2406_v40, %v1666_v18  ;;  %v1699_v23 = vsel %vm1634_vm2, %v1687_v20, 0.0 }
 0x2a6   : > { %v2763_v25 = vsub.f32 %v2408_v50, %v1669_v21  ;;  %v1649_v26 = vpop.xlane.xlu0 %1648  ;;  %1700 = vadd.xlane.f32.xlu1 %v1699_v23  ;;  %v1711_v32 = vsel %vm1634_vm2, %v1691_v24, 0.0  ;;  %v1978_v24 = vld [vmem:[%s2867_s6] ss:$0 sm:$0xff] }
 0x2a7   : > { %v1670_v27 = vmul.f32 0.03125, %v1649_v26  ;;  %v1658_v28 = vpop.xlane.xlu1 %1657  ;;  %v1686_v29 = vmul.f32 %v2758_v22, %v2758_v22 }
 0x2a8   : > { %v1673_v30 = vmul.f32 0.03125, %v1658_v28  ;;  %v1689_v34 = vmul.f32 %v2763_v25, %v2763_v25 }
 0x2a9   : > { %v2767_v31 = vsub.f32 %v2412_v55, %v1670_v27  ;;  %v1696_v33 = vsel %vm1634_vm2, %v1686_v29, 0.0 }
 0x2aa   : > { %v2773_v35 = vsub.f32 %v2413_v59, %v1673_v30  ;;  %v1655_v36 = vpop.xlane.xlu0 %1654  ;;  %1712 = vadd.xlane.f32.xlu1 %v1711_v32  ;;  %1697 = vadd.xlane.f32.xlu0 %v1696_v33  ;;  %v1705_v41 = vsel %vm1634_vm2, %v1689_v34, 0.0 }
 0x2ab   : > { %v1643_v37 = vpop.xlane.xlu1 %1642  ;;  %v1672_v38 = vmul.f32 0.03125, %v1655_v36  ;;  %v1690_v39 = vmul.f32 %v2767_v31, %v2767_v31 }
 0x2ac   : > { %v1668_v40 = vmul.f32 0.03125, %v1643_v37  ;;  %v1693_v43 = vmul.f32 %v2773_v35, %v2773_v35 }
 0x2ad   : > { %v1708_v42 = vsel %vm1634_vm2, %v1690_v39, 0.0  ;;  %v2784_v45 = vsub.f32 %v2414_v0, %v1672_v38 }
 0x2ae   : > { %v2782_v44 = vsub.f32 %v2739_v53, %v1668_v40  ;;  %1706 = vadd.xlane.f32.xlu1 %v1705_v41  ;;  %1709 = vadd.xlane.f32.xlu0 %v1708_v42  ;;  %v1661_v46 = vpop.xlane.xlu0 %1660  ;;  %v1717_v51 = vsel %vm1634_vm2, %v1693_v43, 0.0 }
 0x2af   : > { %v1664_v47 = vpop.xlane.xlu1 %1663  ;;  %v1674_v48 = vmul.f32 0.03125, %v1661_v46  ;;  %v1692_v55 = vmul.f32 %v2784_v45, %v2784_v45 }
 0x2b0   : > { %v1675_v49 = vmul.f32 0.03125, %v1664_v47  ;;  %v1688_v50 = vmul.f32 %v2782_v44, %v2782_v44 }
 0x2b1   : > { %v2791_v54 = vsub.f32 %v2416_v5, %v1674_v48  ;;  %v1714_v58 = vsel %vm1634_vm2, %v1692_v55, 0.0 }
 0x2b2   : > { %v2789_v52 = vsub.f32 %v2415_v7, %v1675_v49  ;;  %1718 = vadd.xlane.f32.xlu1 %v1717_v51  ;;  %v1702_v53 = vsel %vm1634_vm2, %v1688_v50, 0.0 }
 0x2b3   : > { %1703 = vadd.xlane.f32.xlu0 %v1702_v53  ;;  %v1694_v59 = vmul.f32 %v2791_v54, %v2791_v54 }
 0x2b4   : > { %v1695_v56 = vmul.f32 %v2789_v52, %v2789_v52 }
 0x2b5   : > { %v1720_v60 = vsel %vm1634_vm2, %v1694_v59, 0.0 }
 0x2b6   : > { %v1723_v57 = vsel %vm1634_vm2, %v1695_v56, 0.0 }
 0x2b7   : > { %1724 = vadd.xlane.f32.xlu1 %v1723_v57  ;;  %1715 = vadd.xlane.f32.xlu0 %v1714_v58 }
 0x2bb   : > { %1721 = vadd.xlane.f32.xlu0 %v1720_v60 }
 0x333   : > { %v1701_v61 = vpop.xlane.xlu1 %1700 }
 0x334   : > { %v1727_v62 = vmul.f32 0.03125, %v1701_v61 }
 0x336   : > { %v1737_v63 = vadd.f32 1e-05, %v1727_v62 }
 0x337   : > { %v1713_v0 = vpop.xlane.xlu1 %1712  ;;  %v1698_v1 = vpop.xlane.xlu0 %1697 }
 0x338   : > { %2453 = vrsqrt.f32 %v1737_v63  ;;  %v1731_v2 = vmul.f32 0.03125, %v1713_v0  ;;  %v1726_v3 = vmul.f32 0.03125, %v1698_v1 }
 0x33a   : > { %v1741_v4 = vadd.f32 1e-05, %v1731_v2  ;;  %v1736_v5 = vadd.f32 1e-05, %v1726_v3 }
 0x33b   : > { %v1707_v6 = vpop.xlane.xlu1 %1706  ;;  %v1710_v7 = vpop.xlane.xlu0 %1709 }
 0x33c   : > { %2455 = vrsqrt.f32 %v1741_v4  ;;  %v1729_v8 = vmul.f32 0.03125, %v1707_v6  ;;  %v1730_v9 = vmul.f32 0.03125, %v1710_v7 }
 0x33d   : > { %2457 = vrsqrt.f32 %v1736_v5 }
 0x33e   : > { %v1739_v10 = vadd.f32 1e-05, %v1729_v8  ;;  %v1740_v11 = vadd.f32 1e-05, %v1730_v9 }
 0x33f   : > { %v1719_v12 = vpop.xlane.xlu1 %1718 }
 0x340   : > { %2459 = vrsqrt.f32 %v1739_v10  ;;  %v1733_v13 = vmul.f32 0.03125, %v1719_v12  ;;  %v1704_v14 = vpop.xlane.xlu0 %1703 }
 0x341   : > { %2461 = vrsqrt.f32 %v1740_v11  ;;  %v1728_v17 = vmul.f32 0.03125, %v1704_v14 }
 0x342   : > { %v2454_v18 = vpop.eup %2453  ;;  %v1743_v20 = vadd.f32 1e-05, %v1733_v13 }
 0x343   : > { %v1757_v21 = vmul.f32 %v2454_v18, %v2752_v15  ;;  %v1738_v23 = vadd.f32 1e-05, %v1728_v17 }
 0x344   : > { %2463 = vrsqrt.f32 %v1743_v20  ;;  %v1725_v26 = vpop.xlane.xlu1 %1724  ;;  %v1716_v27 = vpop.xlane.xlu0 %1715 }
 0x345   : > { %v1773_v28 = vmul.f32 %v2806_v19, %v1757_v21  ;;  %2465 = vrsqrt.f32 %v1738_v23  ;;  %v1735_v29 = vmul.f32 0.03125, %v1725_v26  ;;  %v1732_v30 = vmul.f32 0.03125, %v1716_v27 }
 0x346   : > { %v2456_v32 = vpop.eup %2455 }
 0x347   : > { %v2458_v15 = vpop.eup %2457  ;;  %v1789_v33 = vadd.f32 %v1978_v24, %v1773_v28  ;;  %v1761_v34 = vmul.f32 %v2456_v32, %v2754_v16  ;;  %v1745_v36 = vadd.f32 1e-05, %v1735_v29  ;;  %v1742_v37 = vadd.f32 1e-05, %v1732_v30 }
 0x348   : > { %v1756_v38 = vmul.f32 %v2458_v15, %v2758_v22  ;;  %v1722_v39 = vpop.xlane.xlu0 %1721 }
 0x349   : > { %1799 = vst.msk [vmem:[%s2818_s9 + $0x8] sm:$0xff] %vm1634_vm2, %v1789_v33  ;;  %v1777_v40 = vmul.f32 %v2806_v19, %v1761_v34  ;;  %2467 = vrsqrt.f32 %v1745_v36  ;;  %v1734_v41 = vmul.f32 0.03125, %v1722_v39 }
 0x34a   : > { %v2460_v42 = vpop.eup %2459  ;;  %v1772_v43 = vmul.f32 %v2806_v19, %v1756_v38  ;;  %2469 = vrsqrt.f32 %v1742_v37 }
 0x34b   : > { %v2462_v46 = vpop.eup %2461  ;;  %v1793_v47 = vadd.f32 %v1978_v24, %v1777_v40  ;;  %v1759_v16 = vmul.f32 %v2460_v42, %v2763_v25  ;;  %v1744_v48 = vadd.f32 1e-05, %v1734_v41 }
 0x34c   : > { %v1788_v22 = vadd.f32 %v1978_v24, %v1772_v43  ;;  %v1760_v49 = vmul.f32 %v2462_v46, %v2767_v31 }
 0x34d   : > { %1803 = vst.msk [vmem:[%s2818_s9 + $0x28] sm:$0xff] %vm1634_vm2, %v1793_v47  ;;  %v1775_v50 = vmul.f32 %v2806_v19, %v1759_v16  ;;  %2471 = vrsqrt.f32 %v1744_v48 }
 0x34e   : > { %v2464_v51 = vpop.eup %2463  ;;  %1798 = vst.msk [vmem:[%s2818_s9] sm:$0xff] %vm1634_vm2, %v1788_v22  ;;  %v1776_v53 = vmul.f32 %v2806_v19, %v1760_v49 }
 0x34f   : > { %v2466_v55 = vpop.eup %2465  ;;  %v1791_v56 = vadd.f32 %v1978_v24, %v1775_v50  ;;  %v1763_v25 = vmul.f32 %v2464_v51, %v2773_v35 }
 0x350   : > { %v1792_v57 = vadd.f32 %v1978_v24, %v1776_v53  ;;  %v1758_v58 = vmul.f32 %v2466_v55, %v2782_v44 }
 0x351   : > { %1801 = vst.msk [vmem:[%s2818_s9 + $0x18] sm:$0xff] %vm1634_vm2, %v1791_v56  ;;  %v1779_v31 = vmul.f32 %v2806_v19, %v1763_v25 }
 0x352   : > { %1802 = vst.msk [vmem:[%s2818_s9 + $0x20] sm:$0xff] %vm1634_vm2, %v1792_v57  ;;  %v1774_v59 = vmul.f32 %v2806_v19, %v1758_v58 }
 0x353   : > { %v2468_v60 = vpop.eup %2467  ;;  %v1795_v61 = vadd.f32 %v1978_v24, %v1779_v31 }
 0x354   : > { %v2470_v62 = vpop.eup %2469  ;;  %v1790_v63 = vadd.f32 %v1978_v24, %v1774_v59  ;;  %v1765_v35 = vmul.f32 %v2468_v60, %v2789_v52 }
 0x355   : > { %1805 = vst.msk [vmem:[%s2818_s9 + $0x38] sm:$0xff] %vm1634_vm2, %v1795_v61  ;;  %v1762_v44 = vmul.f32 %v2470_v62, %v2784_v45 }
 0x356   : > { %1800 = vst.msk [vmem:[%s2818_s9 + $0x10] sm:$0xff] %vm1634_vm2, %v1790_v63  ;;  %v1781_v0 = vmul.f32 %v2806_v19, %v1765_v35 }
 0x357   : > { %v2472_v1 = vpop.eup %2471  ;;  %v1778_v2 = vmul.f32 %v2806_v19, %v1762_v44 }
 0x358   : > { %v1797_v3 = vadd.f32 %v1978_v24, %v1781_v0  ;;  %v1764_v4 = vmul.f32 %v2472_v1, %v2791_v54 }
 0x359   : > { %v1794_v5 = vadd.f32 %v1978_v24, %v1778_v2 }
 0x35a   : > { %1807 = vst.msk [vmem:[%s2818_s9 + $0x48] sm:$0xff] %vm1634_vm2, %v1797_v3  ;;  %v1780_v6 = vmul.f32 %v2806_v19, %v1764_v4 }
 0x35b   : > { %1804 = vst.msk [vmem:[%s2818_s9 + $0x30] sm:$0xff] %vm1634_vm2, %v1794_v5 }
 0x35c   : > { %v1796_v52 = vadd.f32 %v1978_v24, %v1780_v6 }
 0x35e   : > { %1806 = vst.msk [vmem:[%s2818_s9 + $0x40] sm:$0xff] %vm1634_vm2, %v1796_v52 }
 0x35f PF: > { %s17_s24 = sadd.s32 1, %s2479_s24  }
 0x360   : > { %p14_p4 = scmp.ge.s32.totalorder %s17_s24, 4  }
 0x362   :  { %16 = sbr.rel (!%p14_p4) target bundleno = 1 (0x1), region = 84 }

// kernel: deformable_transformer_forward.28
= control target key start
LH: loop header
LB: loop body
LE: loop exit
PB: predicated region body
PF: predicated region fallthrough
CT: control target
= control target key end

     0   :  { %vm27_vm0 = vcmask 261120   ;;  %vm109_vm1 = vcmask 392192   ;;  %s191_s1 = inlined_call_operand.vmem [shape: f32[32,48], index: 1, kind: input, shape index: {}]   ;;  %s192_s0 = inlined_call_operand.vmem [shape: f32[16,32], index: 0, kind: input, shape index: {}]   ;;  %s193_s2 = inlined_call_operand.vmem [shape: f32[1,48], index: 2, kind: input, shape index: {}]   ;;  %s194_s3 = inlined_call_operand.vmem [shape: f32[16,48], index: 3, kind: output, shape index: {}]  }
   0x1   :  { %v16_v0 = vld [vmem:[%s191_s1] sm:$0xff]  ;;  %v17_v1 = vld [vmem:[%s191_s1 + $0x8] sm:$0xff]  ;;  %v18_v2 = vld [vmem:[%s191_s1 + $0x10] sm:$0xff] }
   0x2   :  { %v136_v3 = vpack.c.bf16 %v17_v1, %v16_v0  ;;  %v19_v4 = vld [vmem:[%s191_s1 + $0x18] sm:$0xff]  ;;  %v14_v5 = vld [vmem:[%s192_s0] sm:$0xff]  ;;  %v15_v7 = vld [vmem:[%s192_s0 + $0x8] sm:$0xff] }
   0x3   :  { %v140_v6 = vpack.c.bf16 %v19_v4, %v18_v2  ;;  %133 = vmatprep.mubr.msk.f32.mxu0 %vm27_vm0, %v14_v5  ;;  %v116_v8 = vld [vmem:[%s193_s2] ss:$0 sm:$0xff] }
   0x4   :  { %137 = vmatprep.subr.bf16.mxu0 %v136_v3 }
   0x5   :  { %139 = vmatpush3.bf16.msra.mxu0 %v136_v3 }
   0x6   :  { %141 = vmatprep.subr.bf16.mxu0 %v140_v6 }
   0x9   :  { %143 = vmatpush3.bf16.msra.mxu0 %v140_v6 }
   0xc   :  { %134 = vmatmul.mubr.msk.f32.vlgmr.msra.gmra.mrb[0].mxu0 %vm27_vm0, %v15_v7 }
  0xdf   :  { %v135_v9 = vpop.f32.mrb[0].mxu0 }
  0xe0   :  { %v106_v10 = vadd.f32 %v135_v9, %v116_v8  ;;  %v100_v11 = vpop.f32.mrb[1].mxu0 }
  0xe1   :  { %v101_v12 = vadd.f32 %v116_v8, %v100_v11 }
  0xe2   :  { %111 = vst.msk [vmem:[%s194_s3 + $0x8] sm:$0xff] %vm109_vm1, %v106_v10 }
  0xe3   :  { %110 = vst.msk [vmem:[%s194_s3] sm:$0xff] %vm109_vm1, %v101_v12 }

// kernel: deformable_transformer_forward.26
= control target key start
LH: loop header
LB: loop body
LE: loop exit
PB: predicated region body
PF: predicated region fallthrough
CT: control target
= control target key end

     0   :  { %s1887_s13 = smov 0   ;;  %s2057_s0 = inlined_call_operand.vmem [shape: f32[2,8,32], index: 0, kind: input, shape index: {}]   ;;  %s2058_s1 = inlined_call_operand.vmem [shape: f32[2,8,32], index: 1, kind: input, shape index: {}]   ;;  %s2059_s2 = inlined_call_operand.vmem [shape: f32[32,64], index: 2, kind: input, shape index: {}]   ;;  %s2060_s3 = inlined_call_operand.vmem [shape: f32[1,64], index: 3, kind: input, shape index: {}]   ;;  %s2061_s4 = inlined_call_operand.vmem [shape: f32[32,32], index: 4, kind: input, shape index: {}]   ;;  %s2062_s5 = inlined_call_operand.vmem [shape: f32[1,32], index: 5, kind: input, shape index: {}]   ;;  %s2063_s6 = inlined_call_operand.vmem [shape: f32[32,32], index: 6, kind: input, shape index: {}]   ;;  %s2064_s7 = inlined_call_operand.vmem [shape: f32[1,32], index: 7, kind: input, shape index: {}]   ;;  %s2065_s8 = inlined_call_operand.vmem [shape: f32[1,32], index: 8, kind: input, shape index: {}]   ;;  %s2066_s9 = inlined_call_operand.vmem [shape: f32[1,32], index: 9, kind: input, shape index: {}]   ;;  %s2067_s10 = inlined_call_operand.vmem [shape: f32[2,8,32], index: 10, kind: output, shape index: {}]  }
   0x1 LB: > { %s1610_s14 = sadd.s32 4294967295, %s1820_s13   ;;  %p1614_p0 = scmp.ge.s32.totalorder %s1820_s13, 1  ;;  %s1820_s13 = sphi %s1887_s13, %s20_s13  }
   0x2   : > { %p320_p1 = scmp.lt.s32.totalorder %s1820_s13, 3 }
   0x4   : > { %p321_p2 = pnand %p1614_p0, %p320_p1 }
   0x5   : > { %v375_v0 = vld [vmem:[%s2059_s2] sm:$0xff] (!%p321_p2)  ;;  %v376_v1 = vld [vmem:[%s2059_s2 + $0x8] sm:$0xff] (!%p321_p2)  ;;  %v377_v2 = vld [vmem:[%s2059_s2 + $0x10] sm:$0xff] (!%p321_p2)  ;;  %v1822_v3 = vmov (!%p321_p2), 0.0|0.0   ;;  %vm1823_vm0 = vmmov (!%p321_p2), 0   ;;  %v1824_v6 = vmov (!%p321_p2), 0.0  }
   0x6   : > { %324 = sbr.rel (%p321_p2) target bundleno = 2688 (0xa80), region = 60  ;;  %1759 = vmatprep.subr.bf16.mxu0 (!%p321_p2), %v1822_v3  ;;  %v1760_v4 = vpack.c.bf16 (!%p321_p2), %v376_v1, %v375_v0  ;;  %v378_v5 = vld [vmem:[%s2059_s2 + $0x18] sm:$0xff] (!%p321_p2)  ;;  %1685 = vmatprep.mubr.msk.f32.mxu0 (!%p321_p2), %vm1823_vm0, %v1824_v6  ;;  %p360_p3 = scmp.lt.s32.totalorder (!%p321_p2), %s1610_s14, 1  ;;  %vm386_vm1 = vcmask (!%p321_p2), 261120   ;;  %v460_v11 = vld [vmem:[%s2061_s4] sm:$0xff] (!%p321_p2)  ;;  %v461_v12 = vld [vmem:[%s2061_s4 + $0x8] sm:$0xff] (!%p321_p2) }
   0x7   : > { %1765 = vmatprep.subr.bf16.mxu1 (!%p321_p2), %v1822_v3  ;;  %1696 = vmatprep.mubr.msk.f32.mxu1 (!%p321_p2), %vm1823_vm0, %v1824_v6  ;;  %v1763_v7 = vpack.c.bf16 (!%p321_p2), %v378_v5, %v377_v2  ;;  %v462_v13 = vld [vmem:[%s2061_s4 + $0x10] sm:$0xff] (!%p321_p2)  ;;  %v1766_v14 = vpack.c.bf16 (!%p321_p2), %v461_v12, %v460_v11  ;;  %v463_v15 = vld [vmem:[%s2061_s4 + $0x18] sm:$0xff] (!%p321_p2)  ;;  %v1618_v17 = vld [vmem:[%s2060_s3] ss:$0 sm:$0xff] (!%p321_p2)  ;;  %s1825_s21 = smov (!%p321_p2), 88   ;;  %s1826_s22 = smov (!%p321_p2), 96  }
   0x8   : > { %1761 = vmatpush3.bf16.msra.mxu0 (!%p321_p2), %v1760_v4  ;;  %v1769_v16 = vpack.c.bf16 (!%p321_p2), %v463_v15, %v462_v13  ;;  %s1827_s24 = smov (!%p321_p2), 120   ;;  %s1828_s25 = smov (!%p321_p2), 80   ;;  %vm559_vm2 = vcmask (!%p321_p2), 64512   ;;  %v1620_v23 = vld [vmem:[%s2062_s5] ss:$0 sm:$0xff] (!%p321_p2) }
   0x9   : > { %1762 = vmatprep.subr.bf16.mxu0 (!%p321_p2), %v1822_v3  ;;  %1767 = vmatpush3.bf16.msra.mxu1 (!%p321_p2), %v1766_v14  ;;  %s1829_s28 = smov (!%p321_p2), 112   ;;  %v544_v43 = vld [vmem:[%s2063_s6] sm:$0xff] (!%p321_p2)  ;;  %s1831_s12 = smov (!%p321_p2), 104  }
   0xa   : > { %1768 = vmatprep.subr.bf16.mxu1 (!%p321_p2), %v1822_v3 }
   0xc   : > { %1764 = vmatpush3.bf16.msra.mxu0 (!%p321_p2), %v1763_v7 }
   0xd   : > { %s2069_s14 = smov (!%p360_p3, %s1610_s14), 1  ;;  %1709 = vmatprep.subr.mxu0 %v1824_v6  ;;  %1770 = vmatpush3.bf16.msra.mxu1 %v1769_v16 }
   0xe   : > { %s1911_s23 = sshll.u32 %s2069_s14, 3  ;;  %1699 = vmatprep.subr.mxu1 %v1824_v6 }
   0xf   : > { %s363_s26 = scalar_lea.vmem %s2057_s0, %s1911_s23  ;;  %s367_s29 = scalar_lea.vmem %s2058_s1, %s1911_s23 }
  0x10   : > { %v1921_v8 = vld [vmem:[%s363_s26] sm:$0xff] }
  0x11   : > { %v373_v9 = vld [vmem:[%s367_s29] sm:$0xff]  ;;  %1697 = vmatmul.mubr.msk.f32.vlgmr.msra.gmra.mrb[0].mxu1 %vm386_vm1, %v1921_v8  ;;  %s1830_s29 = smov 72  }
  0x12   : > { %v374_v10 = vadd.f32 %v373_v9, %v1921_v8  ;;  %1701 = vmatprep.mubr.msk.f32.mxu1 %vm1823_vm0, %v1824_v6 }
  0x14   : > { %1686 = vmatmul.mubr.msk.f32.vlgmr.msra.gmra.mrb[0].mxu0 %vm386_vm1, %v374_v10 }
  0x15   : > { %1711 = vmatprep.mubr.msk.f32.mxu0 %vm1823_vm0, %v1824_v6  ;;  %1710 = vmatpush3.msra.mxu0 %v544_v43 }
  0x16   : > { %1719 = vmatprep.subr.mxu0 %v1824_v6 }
  0xe4   : > { %v540_v21 = vpop.f32.mrb[0].mxu1 }
  0xe5   : > { %v1698_v22 = vpop.f32.mrb[1].mxu1  ;;  %v1959_v25 = vadd.f32 %v1620_v23, %v540_v21  ;;  %v546_v23 = vld [vmem:[%s2063_s6 + $0x10] sm:$0xff] }
  0xe7   : > { %v456_v18 = vpop.f32.mrb[0].mxu0 }
  0xe8   : > { %v1948_v19 = vadd.f32 %v1618_v17, %v456_v18  ;;  %v1687_v20 = vpop.f32.mrb[1].mxu0  ;;  %v545_v17 = vld [vmem:[%s2063_s6 + $0x8] sm:$0xff] }
  0xea   : > { %795 = vrot.lane.b32.xlu1 %v1948_v19, %s1825_s21  ;;  %557 = vrot.lane.b32.xlu0 %v1948_v19, %s1826_s22 }
  0xee   : > { %793 = vrot.lane.b32.xlu1 %v1948_v19, %s1827_s24 }
  0xf2   : > { %1036 = vrot.lane.b32.xlu1 %v1948_v19, %s1828_s25 }
 0x15c   : > { %v558_v24 = vpop.permute.xlu0 %557  ;;  %v796_v35 = vpop.permute.xlu1 %795 }
 0x15d   : > { %1700 = vmatpush3.xpose.msk.msra.mxu1 %vm559_vm2, %v558_v24 }
 0x15e   : > { %1704 = vmatprep.subr.mxu1 %v1824_v6 }
 0x160   : > { %1702 = vmatmul.mubr.msk.f32.vlgmr.msra.gmra.mrb[2].mxu1 %vm559_vm2, %v1948_v19  ;;  %v794_v36 = vpop.permute.xlu1 %793 }
 0x161   : > { %1705 = vmatpush3.msra.mxu1 %v1959_v25  ;;  %1706 = vmatprep.mubr.msk.f32.mxu1 %vm1823_vm0, %v1824_v6 }
 0x162   : > { %1714 = vmatprep.subr.mxu1 %v1824_v6 }
 0x164   : > { %v1037_v37 = vpop.permute.xlu1 %1036 }
 0x233   : > { %v630_v26 = vpop.f32.mrb[2].mxu1 }
 0x234   : > { %v634_v27 = vmul.f32 0.35355338, %v630_v26  ;;  %v1703_v28 = vpop.f32.mrb[3].mxu1 }
 0x236   : > { %v635_v29 = vsel %vm559_vm2, %v634_v27, -inf }
 0x237   : > { %636 = vmax.xlane.f32.xlu0 %v635_v29 }
 0x24d   : > { %1124 = vrot.lane.b32.xlu0 %v1959_v25, %s1829_s28 }
 0x251   : > { %1276 = vrot.lane.b32.xlu0 %v1948_v19, %s1830_s29  ;;  %s371_s29 = scalar_lea.vmem %s2067_s10, %s1911_s23 }
 0x2c4   : > { %v637_v30 = vpop.xlane.xlu0 %636 }
 0x2c5   : > { %v638_v31 = vsub.f32 %v634_v27, %v637_v30  ;;  %v547_v30 = vld [vmem:[%s2063_s6 + $0x18] sm:$0xff] }
 0x2c7   : > { %v639_v32 = vmul.f32 1.442695, %v638_v31 }
 0x2c8   : > { %v1125_v42 = vpop.permute.xlu0 %1124 }
 0x2c9   : > { %1796 = vpow2.f32 %v639_v32 }
 0x2cc   : > { %v1277_v59 = vpop.permute.xlu0 %1276 }
 0x2d3   : > { %v1797_v33 = vpop.eup %1796 }
 0x2d4   : > { %v641_v34 = vsel %vm559_vm2, %v1797_v33, 0.0 }
 0x2d5   : > { %642 = vadd.xlane.f32.xlu1 %v641_v34 }
 0x2e6   : > { %1034 = vrot.lane.b32.xlu1 %v1948_v19, %s1829_s28 }
 0x362   : > { %v643_v38 = vpop.xlane.xlu1 %642 }
 0x363   : > { %1798 = vrcp.f32 %v643_v38 }
 0x366   : > { %v1035_v41 = vpop.permute.xlu1 %1034 }
 0x36d   : > { %v1799_v39 = vpop.eup %1798 }
 0x36e   : > { %v645_v40 = vmul.f32 %v1799_v39, %v1797_v33  ;;  %v1622_v33 = vld [vmem:[%s2064_s7] ss:$0 sm:$0xff] }
 0x36f   : > { %v555_v34 = vadd.f32 %v1622_v33, %v1921_v8  ;;  %v1639_v8 = vld [vmem:[%s2065_s8] ss:$0 sm:$0xff] }
 0x370   : > { %1707 = vmatmul.mubr.msk.f32.vlgmr.msra.gmra.mrb[4].mxu1 %vm559_vm2, %v645_v40 }
 0x371   : > { %1715 = vmatpush3.xpose.msk.msra.mxu1 %vm559_vm2, %v796_v35  ;;  %1716 = vmatprep.mubr.msk.f32.mxu1 %vm1823_vm0, %v1824_v6 }
 0x372   : > { %1729 = vmatprep.subr.mxu1 %v1824_v6 }
 0x374   : > { %1717 = vmatmul.mubr.msk.f32.vlgmr.msra.gmra.mrb[6].mxu1 %vm559_vm2, %v794_v36 }
 0x375   : > { %1730 = vmatpush3.xpose.msk.msra.mxu1 %vm559_vm2, %v1037_v37  ;;  %1731 = vmatprep.mubr.msk.f32.mxu1 %vm1823_vm0, %v1824_v6 }
 0x376   : > { %1734 = vmatprep.subr.mxu1 %v1824_v6 }
 0x378   : > { %1732 = vmatmul.mubr.msk.f32.vlgmr.msra.gmra.mrb[8].mxu1 %vm559_vm2, %v1035_v41 }
 0x379   : > { %1735 = vmatpush3.msra.mxu1 %v1125_v42  ;;  %1736 = vmatprep.mubr.msk.f32.mxu1 %vm1823_vm0, %v1824_v6 }
 0x37a   : > { %1744 = vmatprep.subr.mxu1 %v1824_v6 }
 0x443   : > { %v715_v44 = vpop.f32.mrb[4].mxu1 }
 0x444   : > { %v1708_v45 = vpop.f32.mrb[5].mxu1  ;;  %1712 = vmatmul.mubr.msk.f32.vlgmr.msra.gmra.mrb[2].mxu0 %vm559_vm2, %v715_v44 }
 0x445   : > { %1721 = vmatprep.mubr.msk.f32.mxu0 %vm1823_vm0, %v1824_v6 }
 0x447   : > { %v867_v46 = vpop.f32.mrb[6].mxu1 }
 0x448   : > { %v1718_v47 = vpop.f32.mrb[7].mxu1  ;;  %v871_v57 = vmul.f32 0.35355338, %v867_v46 }
 0x44a   : > { %v872_v58 = vsel %vm559_vm2, %v871_v57, -inf }
 0x44b   : > { %v1108_v48 = vpop.f32.mrb[8].mxu1 }
 0x44c   : > { %v1112_v49 = vmul.f32 0.35355338, %v1108_v48  ;;  %v1733_v50 = vpop.f32.mrb[9].mxu1  ;;  %v1640_v48 = vld [vmem:[%s2066_s9] ss:$0 sm:$0xff] }
 0x44e   : > { %v1113_v51 = vsel %vm559_vm2, %v1112_v49, -inf }
 0x44f   : > { %1114 = vmax.xlane.f32.xlu1 %v1113_v51 }
 0x4dc   : > { %v1115_v52 = vpop.xlane.xlu1 %1114 }
 0x4dd   : > { %v1116_v53 = vsub.f32 %v1112_v49, %v1115_v52 }
 0x4df   : > { %v1117_v54 = vmul.f32 1.442695, %v1116_v53 }
 0x4e1   : > { %1800 = vpow2.f32 %v1117_v54 }
 0x4eb   : > { %v1801_v55 = vpop.eup %1800 }
 0x4ec   : > { %v1119_v56 = vsel %vm559_vm2, %v1801_v55, 0.0 }
 0x4ed   : > { %1120 = vadd.xlane.f32.xlu0 %v1119_v56 }
 0x503   : > { %1274 = vrot.lane.b32.xlu0 %v1948_v19, %s1831_s12 }
 0x522   : > { %873 = vmax.xlane.f32.xlu0 %v872_v58 }
 0x57a   : > { %v1121_v60 = vpop.xlane.xlu0 %1120 }
 0x57b   : > { %1802 = vrcp.f32 %v1121_v60 }
 0x57e   : > { %v1275_v63 = vpop.permute.xlu0 %1274 }
 0x585   : > { %v1803_v61 = vpop.eup %1802 }
 0x586   : > { %v1123_v62 = vmul.f32 %v1803_v61, %v1801_v55 }
 0x588   : > { %1737 = vmatmul.mubr.msk.f32.vlgmr.msra.gmra.mrb[10].mxu1 %vm559_vm2, %v1123_v62 }
 0x589   : > { %1745 = vmatpush3.xpose.msk.msra.mxu1 %vm559_vm2, %v1277_v59  ;;  %1746 = vmatprep.mubr.msk.f32.mxu1 %vm1823_vm0, %v1824_v6 }
 0x58c   : > { %1747 = vmatmul.mubr.msk.f32.vlgmr.msra.gmra.mrb[12].mxu1 %vm559_vm2, %v1275_v63 }
 0x5af   : > { %v874_v0 = vpop.xlane.xlu0 %873 }
 0x5b0   : > { %v875_v1 = vsub.f32 %v871_v57, %v874_v0 }
 0x5b2   : > { %v876_v2 = vmul.f32 1.442695, %v875_v1 }
 0x5b4   : > { %1804 = vpow2.f32 %v876_v2 }
 0x5be   : > { %v1805_v3 = vpop.eup %1804 }
 0x5bf   : > { %v878_v4 = vsel %vm559_vm2, %v1805_v3, 0.0 }
 0x5c0   : > { %879 = vadd.xlane.f32.xlu1 %v878_v4 }
 0x5d1   : > { %884 = vrot.lane.b32.xlu1 %v1959_v25, %s1827_s24 }
 0x64d   : > { %v880_v5 = vpop.xlane.xlu1 %879 }
 0x64e   : > { %1806 = vrcp.f32 %v880_v5 }
 0x651   : > { %v885_v7 = vpop.permute.xlu1 %884 }
 0x652   : > { %1720 = vmatpush3.msra.mxu0 %v885_v7 }
 0x653   : > { %1724 = vmatprep.subr.mxu0 %v1824_v6 }
 0x658   : > { %v1807_v9 = vpop.eup %1806 }
 0x659   : > { %v882_v10 = vmul.f32 %v1807_v9, %v1805_v3 }
 0x65b   : > { %1722 = vmatmul.mubr.msk.f32.vlgmr.msra.gmra.mrb[4].mxu0 %vm559_vm2, %v882_v10  ;;  %v1196_v11 = vpop.f32.mrb[10].mxu1 }
 0x65c   : > { %v1738_v12 = vpop.f32.mrb[11].mxu1  ;;  %1726 = vmatprep.mubr.msk.f32.mxu0 %vm1823_vm0, %v1824_v6  ;;  %1725 = vmatpush3.msra.mxu0 %v545_v17 }
 0x65d   : > { %1739 = vmatprep.subr.mxu0 %v1824_v6 }
 0x65f   : > { %v1348_v13 = vpop.f32.mrb[12].mxu1 }
 0x660   : > { %v1352_v14 = vmul.f32 0.35355338, %v1348_v13  ;;  %v1748_v15 = vpop.f32.mrb[13].mxu1 }
 0x662   : > { %v1353_v16 = vsel %vm559_vm2, %v1352_v14, -inf }
 0x663   : > { %1354 = vmax.xlane.f32.xlu1 %v1353_v16 }
 0x6f0   : > { %v1355_v18 = vpop.xlane.xlu1 %1354 }
 0x6f1   : > { %v1356_v19 = vsub.f32 %v1352_v14, %v1355_v18 }
 0x6f3   : > { %v1357_v20 = vmul.f32 1.442695, %v1356_v19 }
 0x6f5   : > { %1808 = vpow2.f32 %v1357_v20 }
 0x6ff   : > { %v1809_v21 = vpop.eup %1808 }
 0x700   : > { %v1359_v22 = vsel %vm559_vm2, %v1809_v21, 0.0 }
 0x701   : > { %1360 = vadd.xlane.f32.xlu0 %v1359_v22 }
 0x717   : > { %1364 = vrot.lane.b32.xlu0 %v1959_v25, %s1831_s12 }
 0x72e   : > { %v956_v24 = vpop.f32.mrb[4].mxu0 }
 0x72f   : > { %v1723_v26 = vpop.f32.mrb[5].mxu0  ;;  %1727 = vmatmul.mubr.msk.f32.vlgmr.msra.gmra.mrb[2].mxu0 %vm559_vm2, %v956_v24 }
 0x730   : > { %1740 = vmatpush3.msra.mxu0 %v546_v23  ;;  %1741 = vmatprep.mubr.msk.f32.mxu0 %vm1823_vm0, %v1824_v6 }
 0x731   : > { %1749 = vmatprep.subr.mxu0 %v1824_v6 }
 0x737   : > { %1742 = vmatmul.mubr.msk.f32.vlgmr.msra.gmra.mrb[2].mxu0 %vm559_vm2, %v1196_v11 }
 0x738   : > { %1751 = vmatprep.mubr.msk.f32.mxu0 %vm1823_vm0, %v1824_v6 }
 0x78e   : > { %v1361_v25 = vpop.xlane.xlu0 %1360 }
 0x78f   : > { %1810 = vrcp.f32 %v1361_v25 }
 0x792   : > { %v1365_v27 = vpop.permute.xlu0 %1364 }
 0x793   : > { %1750 = vmatpush3.msra.mxu0 %v1365_v27 }
 0x794   : > { %1754 = vmatprep.subr.mxu0 %v1824_v6 }
 0x799   : > { %v1811_v28 = vpop.eup %1810 }
 0x79a   : > { %v1363_v29 = vmul.f32 %v1811_v28, %v1809_v21 }
 0x79c   : > { %1752 = vmatmul.mubr.msk.f32.vlgmr.msra.gmra.mrb[6].mxu0 %vm559_vm2, %v1363_v29 }
 0x79d   : > { %1755 = vmatpush3.msra.mxu0 %v547_v30  ;;  %1756 = vmatprep.mubr.msk.f32.mxu0 %vm1823_vm0, %v1824_v6 }
 0x86f   : > { %v1436_v31 = vpop.f32.mrb[6].mxu0 }
 0x870   : > { %v1753_v32 = vpop.f32.mrb[7].mxu0  ;;  %1757 = vmatmul.mubr.msk.f32.vlgmr.msra.gmra.mrb[2].mxu0 %vm559_vm2, %v1436_v31 }
 0x943   : > { %v1509_v35 = vpop.f32.mrb[2].mxu0 }
 0x944   : > { %v1771_v36 = vadd.f32 %v1509_v35, %v555_v34  ;;  %v1758_v37 = vpop.f32.mrb[3].mxu0 }
 0x946   : > { %v1516_v38 = vsel %vm386_vm1, %v1771_v36, 0.0 }
 0x947   : > { %1517 = vadd.xlane.f32.xlu0 %v1516_v38 }
 0x9d4   : > { %v1518_v39 = vpop.xlane.xlu0 %1517 }
 0x9d5   : > { %v1520_v40 = vmul.f32 0.03125, %v1518_v39 }
 0x9d7   : > { %v1521_v6 = vsub.f32 %v1771_v36, %v1520_v40 }
 0x9d9   : > { %v1522_v41 = vmul.f32 %v1521_v6, %v1521_v6 }
 0x9db   : > { %v1523_v42 = vsel %vm386_vm1, %v1522_v41, 0.0 }
 0x9dc   : > { %1524 = vadd.xlane.f32.xlu1 %v1523_v42 }
 0xa69   : > { %v1525_v43 = vpop.xlane.xlu1 %1524 }
 0xa6a   : > { %v1526_v44 = vmul.f32 0.03125, %v1525_v43 }
 0xa6c   : > { %v1527_v45 = vadd.f32 1e-05, %v1526_v44 }
 0xa6e   : > { %1812 = vrsqrt.f32 %v1527_v45 }
 0xa78   : > { %v1813_v46 = vpop.eup %1812 }
 0xa79   : > { %v1529_v47 = vmul.f32 %v1813_v46, %v1521_v6 }
 0xa7b   : > { %v1536_v49 = vmul.f32 %v1639_v8, %v1529_v47 }
 0xa7d   : > { %v1543_v50 = vadd.f32 %v1640_v48, %v1536_v49 }
 0xa7f   : > { %1544 = vst.msk [vmem:[%s371_s29] sm:$0xff] %vm386_vm1, %v1543_v50 }
 0xa80 PF: > { %s20_s13 = sadd.s32 1, %s1820_s13  }
 0xa81   : > { %p17_p4 = scmp.ge.s32.totalorder %s20_s13, 4  }
 0xa83   :  { %19 = sbr.rel (!%p17_p4) target bundleno = 1 (0x1), region = 93 }

// kernel: deformable_transformer_forward.30
= control target key start
LH: loop header
LB: loop body
LE: loop exit
PB: predicated region body
PF: predicated region fallthrough
CT: control target
= control target key end

     0   :  { %vm39_vm0 = vcmask 261120   ;;  %vm131_vm1 = vcmask 523264   ;;  %s465_s1 = inlined_call_operand.vmem [shape: f32[32,64], index: 1, kind: input, shape index: {}]   ;;  %s466_s0 = inlined_call_operand.vmem [shape: f32[16,32], index: 0, kind: input, shape index: {}]   ;;  %s467_s3 = inlined_call_operand.vmem [shape: f32[64,32], index: 3, kind: input, shape index: {}]   ;;  %s468_s2 = inlined_call_operand.vmem [shape: f32[1,64], index: 2, kind: input, shape index: {}]   ;;  %s469_s4 = inlined_call_operand.vmem [shape: f32[1,32], index: 4, kind: input, shape index: {}]   ;;  %s470_s5 = inlined_call_operand.vmem [shape: f32[1,32], index: 5, kind: input, shape index: {}]   ;;  %s471_s6 = inlined_call_operand.vmem [shape: f32[1,32], index: 6, kind: input, shape index: {}]   ;;  %s472_s7 = inlined_call_operand.vmem [shape: f32[16,32], index: 7, kind: output, shape index: {}]  }
   0x1   :  { %v28_v0 = vld [vmem:[%s465_s1] sm:$0xff]  ;;  %v29_v1 = vld [vmem:[%s465_s1 + $0x8] sm:$0xff]  ;;  %v30_v2 = vld [vmem:[%s465_s1 + $0x10] sm:$0xff] }
   0x2   :  { %v329_v3 = vpack.c.bf16 %v29_v1, %v28_v0  ;;  %v31_v4 = vld [vmem:[%s465_s1 + $0x18] sm:$0xff]  ;;  %v26_v5 = vld [vmem:[%s466_s0] sm:$0xff]  ;;  %v124_v8 = vld [vmem:[%s467_s3 + $0x8] sm:$0xff] }
   0x3   :  { %v333_v6 = vpack.c.bf16 %v31_v4, %v30_v2  ;;  %307 = vmatprep.mubr.msk.f32.mxu0 %vm39_vm0, %v26_v5  ;;  %v123_v7 = vld [vmem:[%s467_s3] sm:$0xff]  ;;  %v125_v9 = vld [vmem:[%s467_s3 + $0x10] sm:$0xff]  ;;  %v126_v11 = vld [vmem:[%s467_s3 + $0x18] sm:$0xff] }
   0x4   :  { %330 = vmatprep.subr.bf16.mxu0 %v329_v3  ;;  %v337_v10 = vpack.c.bf16 %v124_v8, %v123_v7  ;;  %v341_v12 = vpack.c.bf16 %v126_v11, %v125_v9  ;;  %v127_v13 = vld [vmem:[%s467_s3 + $0x20] sm:$0xff]  ;;  %v128_v14 = vld [vmem:[%s467_s3 + $0x28] sm:$0xff]  ;;  %v129_v17 = vld [vmem:[%s467_s3 + $0x30] sm:$0xff] }
   0x5   :  { %332 = vmatpush3.bf16.msra.mxu0 %v329_v3  ;;  %v345_v15 = vpack.c.bf16 %v128_v14, %v127_v13  ;;  %v27_v16 = vld [vmem:[%s466_s0 + $0x8] sm:$0xff]  ;;  %v130_v18 = vld [vmem:[%s467_s3 + $0x38] sm:$0xff]  ;;  %v275_v20 = vld [vmem:[%s468_s2] ss:$0 sm:$0xff] }
   0x6   :  { %334 = vmatprep.subr.bf16.mxu0 %v333_v6  ;;  %338 = vmatprep.subr.bf16.mxu1 %v337_v10  ;;  %v349_v19 = vpack.c.bf16 %v130_v18, %v129_v17  ;;  %v280_v29 = vld [vmem:[%s469_s4] ss:$0 sm:$0xff] }
   0x7   :  { %340 = vmatpush3.bf16.msra.mxu1 %v337_v10  ;;  %v281_v53 = vld [vmem:[%s470_s5] ss:$0 sm:$0xff] }
   0x8   :  { %342 = vmatprep.subr.bf16.mxu1 %v341_v12  ;;  %v282_v55 = vld [vmem:[%s471_s6] ss:$0 sm:$0xff] }
   0x9   :  { %336 = vmatpush3.bf16.msra.mxu0 %v333_v6 }
   0xb   :  { %344 = vmatpush3.bf16.msra.mxu1 %v341_v12 }
   0xc   :  { %308 = vmatmul.mubr.msk.f32.vlgmr.msra.gmra.mrb[0].mxu0 %vm39_vm0, %v27_v16  ;;  %346 = vmatprep.subr.bf16.mxu1 %v345_v15 }
   0xf   :  { %348 = vmatpush3.bf16.msra.mxu1 %v345_v15 }
  0x10   :  { %350 = vmatprep.subr.bf16.mxu1 %v349_v19 }
  0x13   :  { %352 = vmatpush3.bf16.msra.mxu1 %v349_v19 }
  0xdf   :  { %v309_v21 = vpop.f32.mrb[0].mxu0 }
  0xe0   :  { %v118_v22 = vadd.f32 %v309_v21, %v275_v20  ;;  %v112_v23 = vpop.f32.mrb[1].mxu0 }
  0xe1   :  { %v113_v24 = vadd.f32 %v275_v20, %v112_v23 }
  0xe2   :  { %v122_v26 = vmax.f32 %v118_v22, 0.0 }
  0xe3   :  { %v121_v25 = vmax.f32 %v113_v24, 0.0 }
  0xe5   :  { %326 = vmatprep.mubr.msk.f32.mxu1 %vm131_vm1, %v121_v25 }
  0xe6   :  { %327 = vmatmul.mubr.msk.f32.vlgmr.msra.gmra.mrb[0].mxu1 %vm131_vm1, %v122_v26 }
 0x1b9   :  { %v328_v27 = vpop.f32.mrb[0].mxu1 }
 0x1ba   :  { %v204_v28 = vpop.f32.mrb[1].mxu1  ;;  %v214_v30 = vadd.f32 %v328_v27, %v27_v16 }
 0x1bb   :  { %v213_v31 = vadd.f32 %v204_v28, %v26_v5 }
 0x1bc   :  { %v223_v34 = vadd.f32 %v280_v29, %v214_v30 }
 0x1bd   :  { %v222_v32 = vadd.f32 %v280_v29, %v213_v31 }
 0x1be   :  { %v229_v35 = vsel %vm39_vm0, %v223_v34, 0.0 }
 0x1bf   :  { %v226_v33 = vsel %vm39_vm0, %v222_v32, 0.0 }
 0x1c0   :  { %227 = vadd.xlane.f32.xlu0 %v226_v33 }
 0x1c4   :  { %230 = vadd.xlane.f32.xlu0 %v229_v35 }
 0x24d   :  { %v228_v36 = vpop.xlane.xlu0 %227 }
 0x24e   :  { %v233_v37 = vmul.f32 0.03125, %v228_v36 }
 0x250   :  { %v235_v38 = vsub.f32 %v222_v32, %v233_v37 }
 0x251   :  { %v231_v39 = vpop.xlane.xlu0 %230 }
 0x252   :  { %v234_v40 = vmul.f32 0.03125, %v231_v39  ;;  %v237_v41 = vmul.f32 %v235_v38, %v235_v38 }
 0x254   :  { %v236_v42 = vsub.f32 %v223_v34, %v234_v40  ;;  %v239_v43 = vsel %vm39_vm0, %v237_v41, 0.0 }
 0x255   :  { %240 = vadd.xlane.f32.xlu1 %v239_v43 }
 0x256   :  { %v238_v44 = vmul.f32 %v236_v42, %v236_v42 }
 0x258   :  { %v242_v45 = vsel %vm39_vm0, %v238_v44, 0.0 }
 0x259   :  { %243 = vadd.xlane.f32.xlu1 %v242_v45 }
 0x2e2   :  { %v241_v46 = vpop.xlane.xlu1 %240 }
 0x2e3   :  { %v245_v47 = vmul.f32 0.03125, %v241_v46 }
 0x2e5   :  { %v247_v48 = vadd.f32 1e-05, %v245_v47 }
 0x2e6   :  { %v244_v49 = vpop.xlane.xlu1 %243 }
 0x2e7   :  { %353 = vrsqrt.f32 %v247_v48  ;;  %v246_v50 = vmul.f32 0.03125, %v244_v49 }
 0x2e9   :  { %v248_v51 = vadd.f32 1e-05, %v246_v50 }
 0x2eb   :  { %355 = vrsqrt.f32 %v248_v51 }
 0x2f1   :  { %v354_v52 = vpop.eup %353 }
 0x2f2   :  { %v251_v54 = vmul.f32 %v354_v52, %v235_v38 }
 0x2f4   :  { %v259_v56 = vmul.f32 %v281_v53, %v251_v54 }
 0x2f5   :  { %v356_v57 = vpop.eup %355 }
 0x2f6   :  { %v267_v58 = vadd.f32 %v282_v55, %v259_v56  ;;  %v252_v59 = vmul.f32 %v356_v57, %v236_v42 }
 0x2f8   :  { %269 = vst.msk [vmem:[%s472_s7] sm:$0xff] %vm39_vm0, %v267_v58  ;;  %v260_v60 = vmul.f32 %v281_v53, %v252_v59 }
 0x2fa   :  { %v268_v61 = vadd.f32 %v282_v55, %v260_v60 }
 0x2fc   :  { %270 = vst.msk [vmem:[%s472_s7 + $0x8] sm:$0xff] %vm39_vm0, %v268_v61 }

// kernel: deformable_transformer_forward.29
= control target key start
LH: loop header
LB: loop body
LE: loop exit
PB: predicated region body
PF: predicated region fallthrough
CT: control target
= control target key end

     0   :  { %s1798_s24 = smov 0   ;;  %s1970_s0 = inlined_call_operand.vmem [shape: f32[2,4,8,80], index: 0, kind: input, shape index: {}]   ;;  %s1971_s1 = inlined_call_operand.vmem [shape: f32[2,4,80,8], index: 1, kind: input, shape index: {}]   ;;  %s1972_s2 = inlined_call_operand.vmem [shape: f32[32,32], index: 2, kind: input, shape index: {}]   ;;  %s1973_s3 = inlined_call_operand.vmem [shape: f32[1,32], index: 3, kind: input, shape index: {}]   ;;  %s1974_s4 = inlined_call_operand.vmem [shape: f32[2,8,32], index: 4, kind: input, shape index: {}]   ;;  %s1975_s5 = inlined_call_operand.vmem [shape: f32[1,32], index: 5, kind: input, shape index: {}]   ;;  %s1976_s6 = inlined_call_operand.vmem [shape: f32[1,32], index: 6, kind: input, shape index: {}]   ;;  %s1977_s7 = inlined_call_operand.vmem [shape: f32[2,8,32], index: 7, kind: output, shape index: {}]  }
   0x1 LB: > { %s1358_s25 = sadd.s32 4294967295, %s1753_s24   ;;  %p1362_p0 = scmp.ge.s32.totalorder %s1753_s24, 1  ;;  %s1753_s24 = sphi %s1798_s24, %s17_s24  }
   0x2   : > { %p256_p1 = scmp.lt.s32.totalorder %s1753_s24, 3 }
   0x4   : > { %p257_p2 = pnand %p1362_p0, %p256_p1 }
   0x5   : > { %v358_v0 = vld [vmem:[%s1972_s2] sm:$0xff] (!%p257_p2)  ;;  %p296_p3 = scmp.lt.s32.totalorder (!%p257_p2), %s1358_s25, 1  ;;  %v359_v1 = vld [vmem:[%s1972_s2 + $0x8] sm:$0xff] (!%p257_p2)  ;;  %vm371_vm0 = vcmask (!%p257_p2), 64512   ;;  %v360_v5 = vld [vmem:[%s1972_s2 + $0x10] sm:$0xff] (!%p257_p2)  ;;  %v1755_v44 = vmov (!%p257_p2), 0.0|0.0  }
   0x6   : > { %260 = sbr.rel (%p257_p2) target bundleno = 841 (0x349), region = 48  ;;  %1506 = vmatprep.subr.mxu0 (!%p257_p2), %v358_v0  ;;  %v361_v16 = vld [vmem:[%s1972_s2 + $0x18] sm:$0xff] (!%p257_p2)  ;;  %1666 = vmatprep.subr.bf16.mxu1 (!%p257_p2), %v1755_v44  ;;  %vm1756_vm1 = vmmov (!%p257_p2), 0   ;;  %v1757_v45 = vmov (!%p257_p2), 0.0   ;;  %vm517_vm2 = vcmask (!%p257_p2), 654336   ;;  %vm1251_vm3 = vcmask (!%p257_p2), 261120  }
   0x7   : > { %1507 = vmatpush3.msra.mxu0 (!%p257_p2), %v358_v0  ;;  %1543 = vmatprep.mubr.msk.f32.mxu1 (!%p257_p2), %vm1756_vm1, %v1757_v45 }
   0x8   : > { %1546 = vmatprep.subr.mxu0 (!%p257_p2), %v359_v1 }
   0xd   : > { %s1979_s25 = smov (!%p296_p3, %s1358_s25), 1 }
   0xe   : > { %s1733_s30 = smul.u32 320, %s1979_s25  ;;  %s1417_s15 = sshll.u32 %s1979_s25, 5 }
   0xf   : > { %s1917_s18 = scalar_lea.vmem %s1970_s0, %s1417_s15  ;;  %s1366_s19 = sshll.u32 %s1979_s25, 3 }
  0x10   : > { %s1818_s10 = scalar_lea.vmem %s1971_s1, %s1733_s30  ;;  %v314_v62 = vld [vmem:[%s1917_s18] sm:$0xff]  ;;  %s309_s22 = scalar_lea.vmem %s1974_s4, %s1366_s19 }
  0x11   : > { %v318_v2 = vld [vmem:[%s1818_s10] sm:$0xff]  ;;  %v319_v3 = vld [vmem:[%s1818_s10 + $0x8] sm:$0xff]  ;;  %v320_v4 = vld [vmem:[%s1818_s10 + $0x10] sm:$0xff]  ;;  %s313_s9 = scalar_lea.vmem %s1977_s7, %s1366_s19 }
  0x12   : > { %1508 = vmatprep.mubr.msk.f32.mxu0 %vm371_vm0, %v318_v2  ;;  %v321_v6 = vld [vmem:[%s1818_s10 + $0x18] sm:$0xff]  ;;  %v322_v7 = vld [vmem:[%s1818_s10 + $0x20] sm:$0xff]  ;;  %v323_v8 = vld [vmem:[%s1818_s10 + $0x28] sm:$0xff] }
  0x13   : > { %1509 = vmatmul.mubr.msk.f32.vlgmr.msra.gmra.mrb[0].mxu0 %vm371_vm0, %v319_v3  ;;  %v324_v9 = vld [vmem:[%s1818_s10 + $0x30] sm:$0xff]  ;;  %v325_v10 = vld [vmem:[%s1818_s10 + $0x38] sm:$0xff]  ;;  %v326_v11 = vld [vmem:[%s1818_s10 + $0x40] sm:$0xff] }
  0x14   : > { %1547 = vmatpush3.msra.mxu0 %v359_v1  ;;  %1511 = vmatprep.mubr.msk.f32.mxu0 %vm371_vm0, %v320_v4  ;;  %v327_v12 = vld [vmem:[%s1818_s10 + $0x48] sm:$0xff]  ;;  %v328_v13 = vld [vmem:[%s1818_s10 + $0x50] sm:$0xff]  ;;  %v329_v14 = vld [vmem:[%s1818_s10 + $0x58] sm:$0xff] }
  0x15   : > { %1586 = vmatprep.subr.mxu0 %v360_v5  ;;  %v330_v15 = vld [vmem:[%s1818_s10 + $0x60] sm:$0xff]  ;;  %v331_v17 = vld [vmem:[%s1818_s10 + $0x68] sm:$0xff]  ;;  %v332_v18 = vld [vmem:[%s1818_s10 + $0x70] sm:$0xff] }
  0x16   : > { %v333_v19 = vld [vmem:[%s1818_s10 + $0x78] sm:$0xff]  ;;  %v334_v20 = vld [vmem:[%s1818_s10 + $0x80] sm:$0xff]  ;;  %v335_v21 = vld [vmem:[%s1818_s10 + $0x88] sm:$0xff] }
  0x17   : > { %1512 = vmatmul.mubr.msk.f32.gmra.mrb[2].mxu0 %vm371_vm0, %v321_v6  ;;  %v336_v22 = vld [vmem:[%s1818_s10 + $0x90] sm:$0xff]  ;;  %v337_v23 = vld [vmem:[%s1818_s10 + $0x98] sm:$0xff]  ;;  %v338_v24 = vld [vmem:[%s1818_s10 + $0xa0] sm:$0xff] }
  0x18   : > { %1514 = vmatprep.mubr.msk.f32.mxu0 %vm371_vm0, %v322_v7  ;;  %v339_v25 = vld [vmem:[%s1818_s10 + $0xa8] sm:$0xff]  ;;  %v340_v26 = vld [vmem:[%s1818_s10 + $0xb0] sm:$0xff]  ;;  %v341_v27 = vld [vmem:[%s1818_s10 + $0xb8] sm:$0xff] }
  0x19   : > { %v342_v28 = vld [vmem:[%s1818_s10 + $0xc0] sm:$0xff]  ;;  %v343_v29 = vld [vmem:[%s1818_s10 + $0xc8] sm:$0xff]  ;;  %v344_v30 = vld [vmem:[%s1818_s10 + $0xd0] sm:$0xff] }
  0x1a   : > { %v345_v31 = vld [vmem:[%s1818_s10 + $0xd8] sm:$0xff]  ;;  %v346_v32 = vld [vmem:[%s1818_s10 + $0xe0] sm:$0xff]  ;;  %v347_v33 = vld [vmem:[%s1818_s10 + $0xe8] sm:$0xff] }
  0x1b   : > { %1515 = vmatmul.mubr.msk.f32.gmra.mrb[4].mxu0 %vm371_vm0, %v323_v8  ;;  %v348_v34 = vld [vmem:[%s1818_s10 + $0xf0] sm:$0xff]  ;;  %v349_v35 = vld [vmem:[%s1818_s10 + $0xf8] sm:$0xff]  ;;  %v350_v36 = vld [vmem:[%s1818_s10 + $0x100] sm:$0xff] }
  0x1c   : > { %1517 = vmatprep.mubr.msk.f32.mxu0 %vm371_vm0, %v324_v9  ;;  %v351_v37 = vld [vmem:[%s1818_s10 + $0x108] sm:$0xff]  ;;  %v352_v38 = vld [vmem:[%s1818_s10 + $0x110] sm:$0xff]  ;;  %v353_v39 = vld [vmem:[%s1818_s10 + $0x118] sm:$0xff] }
  0x1d   : > { %v354_v40 = vld [vmem:[%s1818_s10 + $0x120] sm:$0xff]  ;;  %v355_v41 = vld [vmem:[%s1818_s10 + $0x128] sm:$0xff]  ;;  %v356_v42 = vld [vmem:[%s1818_s10 + $0x130] sm:$0xff] }
  0x1e   : > { %v357_v43 = vld [vmem:[%s1818_s10 + $0x138] sm:$0xff] }
  0x1f   : > { %1518 = vmatmul.mubr.msk.f32.gmra.mrb[6].mxu0 %vm371_vm0, %v325_v10 }
  0x20   : > { %1520 = vmatprep.mubr.msk.f32.mxu0 %vm371_vm0, %v326_v11 }
  0x23   : > { %1521 = vmatmul.mubr.msk.f32.gmra.mrb[8].mxu0 %vm371_vm0, %v327_v12 }
  0x24   : > { %1548 = vmatprep.mubr.msk.f32.mxu0 %vm371_vm0, %v328_v13 }
  0x27   : > { %1549 = vmatmul.mubr.msk.f32.vlgmr.msra.gmra.mrb[10].mxu0 %vm371_vm0, %v329_v14  ;;  %v315_v14 = vld [vmem:[%s1917_s18 + $0x8] sm:$0xff] }
  0x28   : > { %1587 = vmatpush3.msra.mxu0 %v360_v5  ;;  %1551 = vmatprep.mubr.msk.f32.mxu0 %vm371_vm0, %v330_v15 }
  0x29   : > { %1626 = vmatprep.subr.mxu0 %v361_v16 }
  0x2b   : > { %1552 = vmatmul.mubr.msk.f32.gmra.mrb[12].mxu0 %vm371_vm0, %v331_v17 }
  0x2c   : > { %1554 = vmatprep.mubr.msk.f32.mxu0 %vm371_vm0, %v332_v18 }
  0x2f   : > { %1555 = vmatmul.mubr.msk.f32.gmra.mrb[14].mxu0 %vm371_vm0, %v333_v19 }
  0x30   : > { %1557 = vmatprep.mubr.msk.f32.mxu0 %vm371_vm0, %v334_v20 }
  0x33   : > { %1558 = vmatmul.mubr.msk.f32.gmra.mrb[16].mxu0 %vm371_vm0, %v335_v21 }
  0x34   : > { %1560 = vmatprep.mubr.msk.f32.mxu0 %vm371_vm0, %v336_v22 }
  0x37   : > { %1561 = vmatmul.mubr.msk.f32.gmra.mrb[18].mxu0 %vm371_vm0, %v337_v23 }
  0x38   : > { %1588 = vmatprep.mubr.msk.f32.mxu0 %vm371_vm0, %v338_v24 }
  0x3b   : > { %1589 = vmatmul.mubr.msk.f32.vlgmr.msra.gmra.mrb[20].mxu0 %vm371_vm0, %v339_v25 }
  0x3c   : > { %1627 = vmatpush3.msra.mxu0 %v361_v16  ;;  %1591 = vmatprep.mubr.msk.f32.mxu0 %vm371_vm0, %v340_v26 }
  0x3f   : > { %1592 = vmatmul.mubr.msk.f32.gmra.mrb[22].mxu0 %vm371_vm0, %v341_v27 }
  0x40   : > { %1594 = vmatprep.mubr.msk.f32.mxu0 %vm371_vm0, %v342_v28 }
  0x43   : > { %1595 = vmatmul.mubr.msk.f32.gmra.mrb[24].mxu0 %vm371_vm0, %v343_v29 }
  0x44   : > { %1597 = vmatprep.mubr.msk.f32.mxu0 %vm371_vm0, %v344_v30  ;;  %v316_v30 = vld [vmem:[%s1917_s18 + $0x10] sm:$0xff] }
  0x47   : > { %1598 = vmatmul.mubr.msk.f32.gmra.mrb[26].mxu0 %vm371_vm0, %v345_v31 }
  0x48   : > { %1600 = vmatprep.mubr.msk.f32.mxu0 %vm371_vm0, %v346_v32 }
  0x4b   : > { %1601 = vmatmul.mubr.msk.f32.gmra.mrb[28].mxu0 %vm371_vm0, %v347_v33 }
  0x4c   : > { %1628 = vmatprep.mubr.msk.f32.mxu0 %vm371_vm0, %v348_v34 }
  0x4f   : > { %1629 = vmatmul.mubr.msk.f32.vlgmr.msra.gmra.mrb[30].mxu0 %vm371_vm0, %v349_v35 }
  0x50   : > { %1631 = vmatprep.mubr.msk.f32.mxu0 %vm371_vm0, %v350_v36 }
  0x53   : > { %1632 = vmatmul.mubr.msk.f32.gmra.mrb[32].mxu0 %vm371_vm0, %v351_v37 }
  0x54   : > { %1634 = vmatprep.mubr.msk.f32.mxu0 %vm371_vm0, %v352_v38 }
  0x57   : > { %1635 = vmatmul.mubr.msk.f32.gmra.mrb[34].mxu0 %vm371_vm0, %v353_v39 }
  0x58   : > { %1637 = vmatprep.mubr.msk.f32.mxu0 %vm371_vm0, %v354_v40 }
  0x5b   : > { %1638 = vmatmul.mubr.msk.f32.gmra.mrb[36].mxu0 %vm371_vm0, %v355_v41 }
  0x5c   : > { %1640 = vmatprep.mubr.msk.f32.mxu0 %vm371_vm0, %v356_v42 }
  0x5f   : > { %1641 = vmatmul.mubr.msk.f32.gmra.mrb[38].mxu0 %vm371_vm0, %v357_v43 }
  0xe6   : > { %v1510_v46 = vpop.f32.mrb[0].mxu0 }
  0xe7   : > { %v468_v47 = vpop.f32.mrb[1].mxu0 }
  0xe8   : > { %v1667_v48 = vpack.c.bf16 %v1510_v46, %v468_v47  ;;  %v317_v46 = vld [vmem:[%s1917_s18 + $0x18] sm:$0xff]  ;;  %v362_v47 = vld [vmem:[%s309_s22] sm:$0xff] }
  0xea   : > { %v1513_v49 = vpop.f32.mrb[2].mxu0  ;;  %1668 = vmatpush3.bf16.msra.mxu1 %v1667_v48  ;;  %v1368_v48 = vld [vmem:[%s1973_s3] ss:$0 sm:$0xff] }
  0xeb   : > { %v478_v50 = vpop.f32.mrb[3].mxu0  ;;  %1669 = vmatprep.subr.bf16.mxu1 %v1755_v44 }
  0xec   : > { %v1670_v51 = vpack.c.bf16 %v1513_v49, %v478_v50  ;;  %v370_v49 = vadd.f32 %v1368_v48, %v362_v47 }
  0xee   : > { %v1516_v52 = vpop.f32.mrb[4].mxu0  ;;  %1671 = vmatpush3.bf16.msra.mxu1 %v1670_v51 }
  0xef   : > { %v488_v53 = vpop.f32.mrb[5].mxu0  ;;  %1672 = vmatprep.subr.bf16.mxu1 %v1755_v44 }
  0xf0   : > { %v1673_v54 = vpack.c.bf16 %v1516_v52, %v488_v53 }
  0xf2   : > { %v1519_v55 = vpop.f32.mrb[6].mxu0  ;;  %1674 = vmatpush3.bf16.msra.mxu1 %v1673_v54 }
  0xf3   : > { %v498_v56 = vpop.f32.mrb[7].mxu0  ;;  %1675 = vmatprep.subr.bf16.mxu1 %v1755_v44 }
  0xf4   : > { %v1676_v57 = vpack.c.bf16 %v1519_v55, %v498_v56 }
  0xf6   : > { %v1522_v58 = vpop.f32.mrb[8].mxu0  ;;  %1677 = vmatpush3.bf16.msra.mxu1 %v1676_v57 }
  0xf7   : > { %v508_v59 = vpop.f32.mrb[9].mxu0  ;;  %1678 = vmatprep.subr.bf16.mxu1 %v1755_v44 }
  0xf8   : > { %v1679_v60 = vpack.c.bf16 %v1522_v58, %v508_v59 }
  0xfa   : > { %1680 = vmatpush3.bf16.msra.mxu1 %v1679_v60  ;;  %v1550_v61 = vpop.f32.mrb[10].mxu0 }
  0xfb   : > { %v688_v63 = vpop.f32.mrb[11].mxu0  ;;  %1681 = vmatprep.subr.bf16.mxu1 %v1755_v44 }
  0xfc   : > { %v1682_v0 = vpack.c.bf16 %v1550_v61, %v688_v63 }
  0xfd   : > { %1544 = vmatmul.mubr.msk.f32.vlgmr.msra.gmra.mrb[0].mxu1 %vm517_vm2, %v314_v62  ;;  %v1413_v62 = vld [vmem:[%s1975_s5] ss:$0 sm:$0xff] }
  0xfe   : > { %v1553_v1 = vpop.f32.mrb[12].mxu0  ;;  %1683 = vmatpush3.bf16.msra.mxu1 %v1682_v0  ;;  %1583 = vmatprep.mubr.msk.f32.mxu1 %vm1756_vm1, %v1757_v45  ;;  %v1414_v0 = vld [vmem:[%s1976_s6] ss:$0 sm:$0xff] }
  0xff   : > { %v698_v2 = vpop.f32.mrb[13].mxu0  ;;  %1684 = vmatprep.subr.bf16.mxu1 %v1755_v44 }
 0x100   : > { %v1685_v3 = vpack.c.bf16 %v1553_v1, %v698_v2 }
 0x102   : > { %v1556_v4 = vpop.f32.mrb[14].mxu0  ;;  %1686 = vmatpush3.bf16.msra.mxu1 %v1685_v3 }
 0x103   : > { %v708_v5 = vpop.f32.mrb[15].mxu0  ;;  %1687 = vmatprep.subr.bf16.mxu1 %v1755_v44 }
 0x104   : > { %v1688_v6 = vpack.c.bf16 %v1556_v4, %v708_v5 }
 0x106   : > { %v1559_v7 = vpop.f32.mrb[16].mxu0  ;;  %1689 = vmatpush3.bf16.msra.mxu1 %v1688_v6 }
 0x107   : > { %v718_v8 = vpop.f32.mrb[17].mxu0  ;;  %1690 = vmatprep.subr.bf16.mxu1 %v1755_v44 }
 0x108   : > { %v1691_v9 = vpack.c.bf16 %v1559_v7, %v718_v8 }
 0x10a   : > { %v1562_v10 = vpop.f32.mrb[18].mxu0  ;;  %1692 = vmatpush3.bf16.msra.mxu1 %v1691_v9 }
 0x10b   : > { %v728_v11 = vpop.f32.mrb[19].mxu0  ;;  %1693 = vmatprep.subr.bf16.mxu1 %v1755_v44 }
 0x10c   : > { %v1694_v12 = vpack.c.bf16 %v1562_v10, %v728_v11 }
 0x10e   : > { %1695 = vmatpush3.bf16.msra.mxu1 %v1694_v12  ;;  %v1590_v13 = vpop.f32.mrb[20].mxu0 }
 0x10f   : > { %v907_v15 = vpop.f32.mrb[21].mxu0  ;;  %1696 = vmatprep.subr.bf16.mxu1 %v1755_v44 }
 0x110   : > { %v1697_v16 = vpack.c.bf16 %v1590_v13, %v907_v15 }
 0x111   : > { %1584 = vmatmul.mubr.msk.f32.vlgmr.msra.gmra.mrb[0].mxu1 %vm517_vm2, %v315_v14 }
 0x112   : > { %v1593_v17 = vpop.f32.mrb[22].mxu0  ;;  %1698 = vmatpush3.bf16.msra.mxu1 %v1697_v16  ;;  %1623 = vmatprep.mubr.msk.f32.mxu1 %vm1756_vm1, %v1757_v45 }
 0x113   : > { %v917_v18 = vpop.f32.mrb[23].mxu0  ;;  %1699 = vmatprep.subr.bf16.mxu1 %v1755_v44 }
 0x114   : > { %v1700_v19 = vpack.c.bf16 %v1593_v17, %v917_v18 }
 0x116   : > { %v1596_v20 = vpop.f32.mrb[24].mxu0  ;;  %1701 = vmatpush3.bf16.msra.mxu1 %v1700_v19 }
 0x117   : > { %v927_v21 = vpop.f32.mrb[25].mxu0  ;;  %1702 = vmatprep.subr.bf16.mxu1 %v1755_v44 }
 0x118   : > { %v1703_v22 = vpack.c.bf16 %v1596_v20, %v927_v21 }
 0x11a   : > { %v1599_v23 = vpop.f32.mrb[26].mxu0  ;;  %1704 = vmatpush3.bf16.msra.mxu1 %v1703_v22 }
 0x11b   : > { %v937_v24 = vpop.f32.mrb[27].mxu0  ;;  %1705 = vmatprep.subr.bf16.mxu1 %v1755_v44 }
 0x11c   : > { %v1706_v25 = vpack.c.bf16 %v1599_v23, %v937_v24 }
 0x11e   : > { %v1602_v26 = vpop.f32.mrb[28].mxu0  ;;  %1707 = vmatpush3.bf16.msra.mxu1 %v1706_v25 }
 0x11f   : > { %v947_v27 = vpop.f32.mrb[29].mxu0  ;;  %1708 = vmatprep.subr.bf16.mxu1 %v1755_v44 }
 0x120   : > { %v1709_v28 = vpack.c.bf16 %v1602_v26, %v947_v27 }
 0x122   : > { %1710 = vmatpush3.bf16.msra.mxu1 %v1709_v28  ;;  %v1630_v29 = vpop.f32.mrb[30].mxu0 }
 0x123   : > { %v1126_v31 = vpop.f32.mrb[31].mxu0  ;;  %1711 = vmatprep.subr.bf16.mxu1 %v1755_v44 }
 0x124   : > { %v1712_v32 = vpack.c.bf16 %v1630_v29, %v1126_v31 }
 0x125   : > { %1624 = vmatmul.mubr.msk.f32.vlgmr.msra.gmra.mrb[0].mxu1 %vm517_vm2, %v316_v30 }
 0x126   : > { %v1633_v33 = vpop.f32.mrb[32].mxu0  ;;  %1713 = vmatpush3.bf16.msra.mxu1 %v1712_v32  ;;  %1663 = vmatprep.mubr.msk.f32.mxu1 %vm1756_vm1, %v1757_v45 }
 0x127   : > { %v1136_v34 = vpop.f32.mrb[33].mxu0  ;;  %1714 = vmatprep.subr.bf16.mxu1 %v1755_v44 }
 0x128   : > { %v1715_v35 = vpack.c.bf16 %v1633_v33, %v1136_v34 }
 0x12a   : > { %v1636_v36 = vpop.f32.mrb[34].mxu0  ;;  %1716 = vmatpush3.bf16.msra.mxu1 %v1715_v35 }
 0x12b   : > { %v1146_v37 = vpop.f32.mrb[35].mxu0  ;;  %1717 = vmatprep.subr.bf16.mxu1 %v1755_v44 }
 0x12c   : > { %v1718_v38 = vpack.c.bf16 %v1636_v36, %v1146_v37 }
 0x12e   : > { %v1639_v39 = vpop.f32.mrb[36].mxu0  ;;  %1719 = vmatpush3.bf16.msra.mxu1 %v1718_v38 }
 0x12f   : > { %v1156_v40 = vpop.f32.mrb[37].mxu0  ;;  %1720 = vmatprep.subr.bf16.mxu1 %v1755_v44 }
 0x130   : > { %v1721_v41 = vpack.c.bf16 %v1639_v39, %v1156_v40 }
 0x132   : > { %v1642_v42 = vpop.f32.mrb[38].mxu0  ;;  %1722 = vmatpush3.bf16.msra.mxu1 %v1721_v41 }
 0x133   : > { %v1166_v43 = vpop.f32.mrb[39].mxu0  ;;  %1723 = vmatprep.subr.bf16.mxu1 %v1755_v44 }
 0x134   : > { %v1724_v45 = vpack.c.bf16 %v1642_v42, %v1166_v43 }
 0x136   : > { %1725 = vmatpush3.bf16.msra.mxu1 %v1724_v45 }
 0x139   : > { %1664 = vmatmul.mubr.msk.f32.vlgmr.msra.gmra.mrb[0].mxu1 %vm517_vm2, %v317_v46 }
 0x20c   : > { %v1244_v50 = vpop.f32.mrb[0].mxu1 }
 0x20d   : > { %v1726_v51 = vadd.f32 %v1244_v50, %v370_v49  ;;  %v1665_v44 = vpop.f32.mrb[1].mxu1 }
 0x20f   : > { %v1252_v52 = vsel %vm1251_vm3, %v1726_v51, 0.0 }
 0x210   : > { %1253 = vadd.xlane.f32.xlu0 %v1252_v52 }
 0x29d   : > { %v1254_v53 = vpop.xlane.xlu0 %1253 }
 0x29e   : > { %v1256_v54 = vmul.f32 0.03125, %v1254_v53 }
 0x2a0   : > { %v1257_v55 = vsub.f32 %v1726_v51, %v1256_v54 }
 0x2a2   : > { %v1258_v56 = vmul.f32 %v1257_v55, %v1257_v55 }
 0x2a4   : > { %v1259_v57 = vsel %vm1251_vm3, %v1258_v56, 0.0 }
 0x2a5   : > { %1260 = vadd.xlane.f32.xlu0 %v1259_v57 }
 0x332   : > { %v1261_v58 = vpop.xlane.xlu0 %1260 }
 0x333   : > { %v1262_v59 = vmul.f32 0.03125, %v1261_v58 }
 0x335   : > { %v1263_v60 = vadd.f32 1e-05, %v1262_v59 }
 0x337   : > { %1745 = vrsqrt.f32 %v1263_v60 }
 0x341   : > { %v1746_v61 = vpop.eup %1745 }
 0x342   : > { %v1265_v63 = vmul.f32 %v1746_v61, %v1257_v55 }
 0x344   : > { %v1272_v1 = vmul.f32 %v1413_v62, %v1265_v63 }
 0x346   : > { %v1279_v2 = vadd.f32 %v1414_v0, %v1272_v1 }
 0x348   : > { %1280 = vst.msk [vmem:[%s313_s9] sm:$0xff] %vm1251_vm3, %v1279_v2 }
 0x349 PF: > { %s17_s24 = sadd.s32 1, %s1753_s24  }
 0x34a   : > { %p14_p4 = scmp.ge.s32.totalorder %s17_s24, 4  }
 0x34c   :  { %16 = sbr.rel (!%p14_p4) target bundleno = 1 (0x1), region = 84 }

// kernel: deformable_transformer_forward.35
= control target key start
LH: loop header
LB: loop body
LE: loop exit
PB: predicated region body
PF: predicated region fallthrough
CT: control target
= control target key end

     0   :  { %vm40_vm0 = vcmask 261120   ;;  %s514_s0 = inlined_call_operand.vmem [shape: f32[16,32], index: 0, kind: input, shape index: {}]   ;;  %s515_s1 = inlined_call_operand.vmem [shape: f32[32,64], index: 1, kind: input, shape index: {}]   ;;  %s516_s2 = inlined_call_operand.vmem [shape: f32[1,64], index: 2, kind: input, shape index: {}]   ;;  %s517_s3 = inlined_call_operand.vmem [shape: f32[64,32], index: 3, kind: input, shape index: {}]   ;;  %s518_s4 = inlined_call_operand.vmem [shape: f32[1,32], index: 4, kind: input, shape index: {}]   ;;  %s519_s5 = inlined_call_operand.vmem [shape: f32[1,32], index: 5, kind: input, shape index: {}]   ;;  %s520_s6 = inlined_call_operand.vmem [shape: f32[1,32], index: 6, kind: input, shape index: {}]   ;;  %s521_s7 = inlined_call_operand.hbm [shape: f32[16,32], index: 7, kind: output, shape index: {}]  }
   0x1   :  { %v29_v0 = vld [vmem:[%s515_s1] sm:$0xff]  ;;  %v30_v1 = vld [vmem:[%s515_s1 + $0x8] sm:$0xff]  ;;  %v31_v2 = vld [vmem:[%s515_s1 + $0x10] sm:$0xff] }
   0x2   :  { %v342_v3 = vpack.c.bf16 %v30_v1, %v29_v0  ;;  %v32_v4 = vld [vmem:[%s515_s1 + $0x18] sm:$0xff]  ;;  %v27_v5 = vld [vmem:[%s514_s0] sm:$0xff]  ;;  %v125_v8 = vld [vmem:[%s517_s3 + $0x8] sm:$0xff] }
   0x3   :  { %v346_v6 = vpack.c.bf16 %v32_v4, %v31_v2  ;;  %320 = vmatprep.mubr.msk.f32.mxu0 %vm40_vm0, %v27_v5  ;;  %v124_v7 = vld [vmem:[%s517_s3] sm:$0xff]  ;;  %v126_v9 = vld [vmem:[%s517_s3 + $0x10] sm:$0xff]  ;;  %v127_v11 = vld [vmem:[%s517_s3 + $0x18] sm:$0xff] }
   0x4   :  { %343 = vmatprep.subr.bf16.mxu0 %v342_v3  ;;  %v350_v10 = vpack.c.bf16 %v125_v8, %v124_v7  ;;  %v354_v12 = vpack.c.bf16 %v127_v11, %v126_v9  ;;  %v128_v13 = vld [vmem:[%s517_s3 + $0x20] sm:$0xff]  ;;  %v129_v14 = vld [vmem:[%s517_s3 + $0x28] sm:$0xff] }
   0x5   :  { %345 = vmatpush3.bf16.msra.mxu0 %v342_v3 }
   0x6   :  { %12 = vsyncpa [#allocation3], 0  ;;  %347 = vmatprep.subr.bf16.mxu0 %v346_v6  ;;  %351 = vmatprep.subr.bf16.mxu1 %v350_v10  ;;  %v358_v15 = vpack.c.bf16 %v129_v14, %v128_v13  ;;  %v28_v16 = vld [vmem:[%s514_s0 + $0x8] sm:$0xff]  ;;  %v130_v17 = vld [vmem:[%s517_s3 + $0x30] sm:$0xff]  ;;  %vm132_vm1 = vcmask 523264   ;;  %s397_s9 = smov [#allocation2]  }
   0x7   :  { %353 = vmatpush3.bf16.msra.mxu1 %v350_v10  ;;  %v131_v18 = vld [vmem:[%s517_s3 + $0x38] sm:$0xff]  ;;  %v288_v20 = vld [vmem:[%s516_s2] ss:$0 sm:$0xff]  ;;  %s277_s10 = sshll.u32 %s397_s9, 4  ;;  %s278_s10 = int_to_ptr.vmem [resolvable:$true] %s277_s10 }
   0x8   :  { %355 = vmatprep.subr.bf16.mxu1 %v354_v12  ;;  %v362_v19 = vpack.c.bf16 %v131_v18, %v130_v17  ;;  %v293_v29 = vld [vmem:[%s518_s4] ss:$0 sm:$0xff]  ;;  %s373_s11 = scalar_lea.vmem %s278_s10, 256  ;;  %p378_p1 = scmp.lt.s32.totalorder %s278_s10, %s278_s10 }
   0x9   :  { %349 = vmatpush3.bf16.msra.mxu0 %v346_v6  ;;  %v294_v53 = vld [vmem:[%s519_s5] ss:$0 sm:$0xff]  ;;  %p374_p0 = scmp.ne.s32.totalorder %s278_s10, %s373_s11  ;;  %p379_p2 = scmp.lt.s32.totalorder %s373_s11, %s373_s11 }
   0xa   :  { %v295_v55 = vld [vmem:[%s520_s6] ss:$0 sm:$0xff] }
   0xb   :  { %357 = vmatpush3.bf16.msra.mxu1 %v354_v12  ;;  %p380_p3 = por %p379_p2, %p378_p1 }
   0xc   :  { %321 = vmatmul.mubr.msk.f32.vlgmr.msra.gmra.mrb[0].mxu0 %vm40_vm0, %v28_v16  ;;  %359 = vmatprep.subr.bf16.mxu1 %v358_v15 }
   0xd   :  { %p381_p4 = pnand %p380_p3, %p374_p0 }
   0xf   :  { %361 = vmatpush3.bf16.msra.mxu1 %v358_v15 }
  0x10   :  { %363 = vmatprep.subr.bf16.mxu1 %v362_v19 }
  0x13   :  { %365 = vmatpush3.bf16.msra.mxu1 %v362_v19 }
  0xdf   :  { %v322_v21 = vpop.f32.mrb[0].mxu0 }
  0xe0   :  { %v119_v22 = vadd.f32 %v322_v21, %v288_v20  ;;  %v113_v23 = vpop.f32.mrb[1].mxu0 }
  0xe1   :  { %v114_v24 = vadd.f32 %v288_v20, %v113_v23 }
  0xe2   :  { %v123_v26 = vmax.f32 %v119_v22, 0.0 }
  0xe3   :  { %v122_v25 = vmax.f32 %v114_v24, 0.0 }
  0xe5   :  { %339 = vmatprep.mubr.msk.f32.mxu1 %vm132_vm1, %v122_v25 }
  0xe6   :  { %340 = vmatmul.mubr.msk.f32.vlgmr.msra.gmra.mrb[0].mxu1 %vm132_vm1, %v123_v26 }
 0x1b9   :  { %v341_v27 = vpop.f32.mrb[0].mxu1 }
 0x1ba   :  { %v205_v28 = vpop.f32.mrb[1].mxu1  ;;  %v215_v30 = vadd.f32 %v341_v27, %v28_v16 }
 0x1bb   :  { %v214_v31 = vadd.f32 %v205_v28, %v27_v5 }
 0x1bc   :  { %v224_v34 = vadd.f32 %v293_v29, %v215_v30 }
 0x1bd   :  { %v223_v32 = vadd.f32 %v293_v29, %v214_v31 }
 0x1be   :  { %v230_v35 = vsel %vm40_vm0, %v224_v34, 0.0 }
 0x1bf   :  { %v227_v33 = vsel %vm40_vm0, %v223_v32, 0.0 }
 0x1c0   :  { %228 = vadd.xlane.f32.xlu0 %v227_v33 }
 0x1c4   :  { %231 = vadd.xlane.f32.xlu0 %v230_v35 }
 0x24d   :  { %v229_v36 = vpop.xlane.xlu0 %228 }
 0x24e   :  { %v234_v37 = vmul.f32 0.03125, %v229_v36 }
 0x250   :  { %v236_v38 = vsub.f32 %v223_v32, %v234_v37 }
 0x251   :  { %v232_v39 = vpop.xlane.xlu0 %231 }
 0x252   :  { %v235_v40 = vmul.f32 0.03125, %v232_v39  ;;  %v238_v41 = vmul.f32 %v236_v38, %v236_v38 }
 0x254   :  { %v237_v42 = vsub.f32 %v224_v34, %v235_v40  ;;  %v240_v43 = vsel %vm40_vm0, %v238_v41, 0.0 }
 0x255   :  { %241 = vadd.xlane.f32.xlu1 %v240_v43 }
 0x256   :  { %v239_v44 = vmul.f32 %v237_v42, %v237_v42 }
 0x258   :  { %v243_v45 = vsel %vm40_vm0, %v239_v44, 0.0 }
 0x259   :  { %244 = vadd.xlane.f32.xlu1 %v243_v45 }
 0x2e2   :  { %v242_v46 = vpop.xlane.xlu1 %241 }
 0x2e3   :  { %v246_v47 = vmul.f32 0.03125, %v242_v46 }
 0x2e5   :  { %v248_v48 = vadd.f32 1e-05, %v246_v47 }
 0x2e6   :  { %v245_v49 = vpop.xlane.xlu1 %244 }
 0x2e7   :  { %369 = vrsqrt.f32 %v248_v48  ;;  %v247_v50 = vmul.f32 0.03125, %v245_v49 }
 0x2e9   :  { %v249_v51 = vadd.f32 1e-05, %v247_v50 }
 0x2eb   :  { %371 = vrsqrt.f32 %v249_v51 }
 0x2f1   :  { %v370_v52 = vpop.eup %369 }
 0x2f2   :  { %v252_v54 = vmul.f32 %v370_v52, %v236_v38 }
 0x2f4   :  { %v260_v56 = vmul.f32 %v294_v53, %v252_v54 }
 0x2f5   :  { %v372_v57 = vpop.eup %371 }
 0x2f6   :  { %v253_v58 = vmul.f32 %v372_v57, %v237_v42  ;;  %v268_v59 = vadd.f32 %v295_v55, %v260_v56 }
 0x2f8   :  { %v261_v60 = vmul.f32 %v294_v53, %v253_v58  ;;  %270 = vst.msk [vmem:[#allocation2] sm:$0xff] %vm40_vm0, %v268_v59 }
 0x2fa   :  { %v269_v61 = vadd.f32 %v295_v55, %v261_v60 }
 0x2fc   :  { %271 = vst.msk [vmem:[#allocation2 + $0x8] sm:$0xff] %vm40_vm0, %v269_v61 }
 0x2fd   :  { %384 = shalt.err (!%p381_p4)
}
 0x2fe   :  { %s385_s12 = scalar_lea.hbm %s521_s7, 256 }
 0x2ff   :  { %p386_p5 = scmp.ne.s32.totalorder %s521_s7, %s385_s12  ;;  %p389_p6 = scmp.lt.u32.totalorder %s385_s12, %s521_s7 }
 0x301   :  { %p391_p7 = pnand %p389_p6, %p386_p5 }
 0x303   :  { %394 = shalt.err (!%p391_p7)
}
 0x304   :  { %s398_s1 = smov 128   ;;  %s399_s17 = smov 8  }
 0x305   :  { %283 = dma.vmem_to_hbm [thread:$0]  %s278_s10, 256, %s521_s7, [#allocation3], %s398_s1, %s398_s1, %s399_s17  }
 0x306   :  { %395 = dma.done.wait [#allocation3], 256  }
 0x307   :  { %396 = vsyncadd [#allocation3], 4294967040 }
 0x308   :  { %287 = vsyncpa [#allocation3], 1 }

</bundles_post_ra>
